<compile_context>
chip_gen: v6e
topology: v6e:2x2x1
jax: 0.10.0
libtpu: 0.0.40
codegen_flags: <defaults>
</compile_context>

<pallas_src>
import functools

import jax
import jax.numpy as jnp
from jax.experimental import pallas as pl
from jax.experimental.pallas import tpu as pltpu


# ----------------------------------------------------------------------------
# In-kernel exact GELU (erf via Abramowitz–Stegun 7.1.26).  The reciprocal is
# computed on the EUP (approx=True), total error vs torch.nn.GELU() ~1e-4.
# ----------------------------------------------------------------------------
def _erf(x):
    a1, a2, a3, a4, a5 = (0.254829592, -0.284496736, 1.421413741,
                          -1.453152027, 1.061405429)
    pc = 0.3275911
    ax = jnp.abs(x)
    t = pl.reciprocal(1.0 + pc * ax, approx=True)          # EUP slot
    poly = ((((a5 * t + a4) * t + a3) * t + a2) * t + a1) * t
    y = 1.0 - poly * jnp.exp(-ax * ax)                      # EUP exp
    return jnp.where(x >= 0.0, y, -y)


def _gelu(x):
    return 0.5 * x * (1.0 + _erf(x * 0.7071067811865476))


# ----------------------------------------------------------------------------
# Pallas kernel: one (batch, row-tile) block per grid step.
# ----------------------------------------------------------------------------
def _ca_ffn_kernel(x_ref, w1_ref, b1_ref, dww_ref, dwb_ref, decw_ref,
                   decb_ref, sig_ref, w2_ref, b2_ref, o_ref, pad_ref,
                   *, kernel_size, img_h, row_tile):
    K = kernel_size
    pd = K // 2
    TH = row_tile
    H = img_h
    W, C = x_ref.shape[2], x_ref.shape[3]
    Ch = w1_ref.shape[1]
    R = TH + 2 * pd            # tile rows including halo
    M = R * W                  # pixels entering fc1 (tile + halo)
    Mo = TH * W                # pixels produced by this tile

    i = pl.program_id(1)
    row0 = pl.multiple_of(i * TH, TH)      # first padded-input row of the tile

    # --- fc1 : 1x1 conv == channel matmul on the MXU (tile + halo rows) -----
    xt = x_ref[0, pl.ds(row0, R), :, :]                    # (R, W, C)
    h = jnp.dot(xt.reshape(M, C).astype(jnp.float32), w1_ref[...],
                preferred_element_type=jnp.float32) + b1_ref[...]     # (M, Ch)

    # Halo rows that fall in the zero-padded region must be zero after fc1
    # (otherwise the bias would leak into the depthwise conv's halo).
    pix = jax.lax.broadcasted_iota(jnp.int32, (M, 1), 0)
    valid = (pix >= (pd - row0) * W) & (pix < (pd + H - row0) * W)
    h = jnp.where(valid, h, 0.0)

    # --- depthwise KxK conv via a small per-tile padded scratch -------------
    # Only the pd-wide column halo is zeroed (cheap, every step, so it is
    # correct under any megacore split); the interior is fully rewritten.
    pad_ref[:, 0:pd, :] = jnp.zeros((R, pd, Ch), jnp.float32)
    pad_ref[:, pd + W:pd + W + pd, :] = jnp.zeros((R, pd, Ch), jnp.float32)
    pad_ref[:, pd:pd + W, :] = h.reshape(R, W, Ch)

    dww = dww_ref[...]                                     # (K, K, Ch)
    acc = jnp.zeros((TH, W, Ch), jnp.float32)
    for kh in range(K):                                    # static KxK unroll
        for kw in range(K):
            w_kk = dww[kh:kh + 1, kw:kw + 1, :]            # (1, 1, Ch)
            acc = acc + pad_ref[kh:kh + TH, kw:kw + W, :] * w_kk
    acc = acc + dwb_ref[...]                               # (1, Ch) broadcast

    # --- activation (dropout p=0 -> identity) -------------------------------
    a = _gelu(acc).reshape(Mo, Ch)

    # --- feat_decompose: x + sigma * (x - act(decompose(x))) ----------------
    d = jnp.sum(a * decw_ref[...], axis=-1, keepdims=True) + decb_ref[...]
    y = a + sig_ref[...] * (a - _gelu(d))

    # --- fc2 : 1x1 conv == channel matmul on the MXU ------------------------
    out = jnp.dot(y, w2_ref[...], preferred_element_type=jnp.float32) + b2_ref[...]
    o_ref[0] = out.reshape(TH, W, C).astype(o_ref.dtype)


# ----------------------------------------------------------------------------
# Row-tile selection: biggest divisor of H whose per-tile f32 working set
# (~8 live (TH+2pd, W, Ch) tiles) stays well under the scoped VMEM budget on
# all generations (v7x has only 64 MiB physical / 32 MiB scoped), while
# keeping >= 2 row tiles per image so the pipeline / megacore grid has depth.
# ----------------------------------------------------------------------------
def _pick_row_tile(H, W, Ch, pd, budget_bytes=6 * 1024 * 1024):
    divisors = [d for d in range(1, H + 1) if H % d == 0]
    candidates = [d for d in divisors if d < H] or divisors
    best = candidates[0]
    for d in candidates:
        if 8 * (d + 2 * pd) * W * Ch * 4 <= budget_bytes:
            best = d
    return best


# ----------------------------------------------------------------------------
# NHWC entry point (no HBM transposes).
# ----------------------------------------------------------------------------
@jax.jit
def channel_aggregation_ffn_nhwc(x, params):
    N, H, W, C = x.shape
    Ch = params["w1"].shape[1]
    K = params["dw_w"].shape[0]
    pd = K // 2
    Hp = H + 2 * pd
    TH = _pick_row_tile(H, W, Ch, pd)
    R = TH + 2 * pd
    Wp = ((W + 2 * pd + 7) // 8) * 8          # sublane dim rounded to 8

    # Zero-pad rows once so every row tile can read its halo in-bounds.
    x_pad = jnp.pad(x, ((0, 0), (pd, pd), (0, 0), (0, 0)))

    kernel = functools.partial(_ca_ffn_kernel, kernel_size=K, img_h=H,
                               row_tile=TH)

    grid_spec = pltpu.PrefetchScalarGridSpec(
        num_scalar_prefetch=0,
        grid=(N, H // TH),
        in_specs=[
            # Padded image: block index depends only on n -> resident per batch.
            pl.BlockSpec((1, Hp, W, C), lambda n, i: (n, 0, 0, 0)),
            pl.BlockSpec((C, Ch), lambda n, i: (0, 0)),               # w1
            pl.BlockSpec((1, Ch), lambda n, i: (0, 0)),               # b1
            pl.BlockSpec((K, K, Ch), lambda n, i: (0, 0, 0)),         # dw_w
            pl.BlockSpec((1, Ch), lambda n, i: (0, 0)),               # dw_b
            pl.BlockSpec((1, Ch), lambda n, i: (0, 0)),               # dec_w
            pl.BlockSpec((1, 1), lambda n, i: (0, 0)),                # dec_b
            pl.BlockSpec((1, Ch), lambda n, i: (0, 0)),               # sigma
            pl.BlockSpec((Ch, C), lambda n, i: (0, 0)),               # w2
            pl.BlockSpec((1, C), lambda n, i: (0, 0)),                # b2
        ],
        out_specs=pl.BlockSpec((1, TH, W, C), lambda n, i: (n, i, 0, 0)),
        scratch_shapes=[pltpu.VMEM((R, Wp, Ch), jnp.float32)],
    )

    cost = pl.CostEstimate(
        flops=2 * N * H * W * (2 * C * Ch + K * K * Ch + Ch),
        transcendentals=N * H * W * (Ch + 1),
        bytes_accessed=4 * (N * Hp * W * C + N * H * W * C
                            + C * Ch + Ch + K * K * Ch + Ch + Ch + 1
                            + Ch + Ch * C + C),
    )

    return pl.pallas_call(
        kernel,
        out_shape=jax.ShapeDtypeStruct((N, H, W, C), x.dtype),
        grid_spec=grid_spec,
        compiler_params=pltpu.CompilerParams(
            dimension_semantics=("parallel", "parallel")),
        cost_estimate=cost,
    )(x_pad, params["w1"], params["b1"], params["dw_w"], params["dw_b"],
      params["dec_w"], params["dec_b"], params["sigma"],
      params["w2"], params["b2"])


# ----------------------------------------------------------------------------
# NCHW wrapper matching the PyTorch module (prefer the NHWC entry point to
# avoid the two HBM transposes at realistic sizes).
# ----------------------------------------------------------------------------
@jax.jit
def channel_aggregation_ffn(x_nchw, params):
    x = jnp.transpose(x_nchw, (0, 2, 3, 1))               # -> NHWC
    out = channel_aggregation_ffn_nhwc(x, params)
    return jnp.transpose(out, (0, 3, 1, 2))               # -> NCHW


# ----------------------------------------------------------------------------
# Deterministic parameter init (shapes from ChannelAggregationFFN.__init__).
# ----------------------------------------------------------------------------
def init_params(key, embed_dims, kernel_size=3):
    Ch = int(embed_dims * 4)                              # feedforward_channels
    ks = jax.random.split(key, 8)
    s = 0.1
    return {
        "w1":    s * jax.random.normal(ks[0], (embed_dims, Ch), jnp.float32),
        "b1":    s * jax.random.normal(ks[1], (1, Ch), jnp.float32),
        "dw_w":  s * jax.random.normal(ks[2], (kernel_size, kernel_size, Ch),
                                       jnp.float32),
        "dw_b":  s * jax.random.normal(ks[3], (1, Ch), jnp.float32),
        "dec_w": s * jax.random.normal(ks[4], (1, Ch), jnp.float32),
        "dec_b": s * jax.random.normal(ks[5], (1, 1), jnp.float32),
        "sigma": 1e-05 * jnp.ones((1, Ch), jnp.float32),  # ElementScale init
        "w2":    s * jax.random.normal(ks[6], (Ch, embed_dims), jnp.float32),
        "b2":    s * jax.random.normal(ks[7], (1, embed_dims), jnp.float32),
    }


# ----------------------------------------------------------------------------
# Pure-JAX reference (exact GELU) for a sanity check.
# ----------------------------------------------------------------------------
def reference(x_nchw, params):
    x = jnp.transpose(x_nchw, (0, 2, 3, 1))
    N, H, W, C = x.shape
    K = params["dw_w"].shape[0]
    pd = K // 2

    h = jnp.einsum("nhwc,cf->nhwf", x, params["w1"]) + params["b1"][0]
    hp = jnp.pad(h, ((0, 0), (pd, pd), (pd, pd), (0, 0)))
    acc = jnp.zeros_like(h)
    for kh in range(K):
        for kw in range(K):
            acc = acc + hp[:, kh:kh + H, kw:kw + W, :] * params["dw_w"][kh, kw]
    acc = acc + params["dw_b"][0]
    a = jax.nn.gelu(acc, approximate=False)
    d = (jnp.sum(a * params["dec_w"][0], axis=-1, keepdims=True)
         + params["dec_b"][0, 0])
    y = a + params["sigma"][0] * (a - jax.nn.gelu(d, approximate=False))
    out = jnp.einsum("nhwf,fc->nhwc", y, params["w2"]) + params["b2"][0]
    return jnp.transpose(out, (0, 3, 1, 2))


if __name__ == "__main__":
    key = jax.random.PRNGKey(0)
    k_x, k_p = jax.random.split(key)

    N, C, H, W = 2, 4, 16, 16
    x = jax.random.normal(k_x, (N, C, H, W), jnp.float32)
    params = init_params(k_p, embed_dims=C, kernel_size=3)

    out = jax.block_until_ready(channel_aggregation_ffn(x, params))
    ref = jax.block_until_ready(reference(x, params))

    assert out.shape == (N, C, H, W), out.shape
    assert bool(jnp.all(jnp.isfinite(out)))
    max_err = float(jnp.max(jnp.abs(out - ref)))
    assert max_err < 1e-2, f"max abs error {max_err}"

    print("KERNEL_OK")
</pallas_src>

<mosaic_0001>
module attributes {stable_mosaic.version = 11 : i64} {
  func.func @_ca_ffn_kernel(%arg0: i32, %arg1: i32, %arg2: memref<1x18x16x4xf32, #tpu.memory_space<vmem>>, %arg3: memref<4x16xf32, #tpu.memory_space<vmem>>, %arg4: memref<1x16xf32, #tpu.memory_space<vmem>>, %arg5: memref<3x3x16xf32, #tpu.memory_space<vmem>>, %arg6: memref<1x16xf32, #tpu.memory_space<vmem>>, %arg7: memref<1x16xf32, #tpu.memory_space<vmem>>, %arg8: memref<1x1xf32, #tpu.memory_space<vmem>>, %arg9: memref<1x16xf32, #tpu.memory_space<vmem>>, %arg10: memref<16x4xf32, #tpu.memory_space<vmem>>, %arg11: memref<1x4xf32, #tpu.memory_space<vmem>>, %arg12: memref<1x8x16x4xf32, #tpu.memory_space<vmem>>, %arg13: memref<10x24x16xf32, #tpu.memory_space<vmem>>) attributes {dimension_semantics = [#tpu.dimension_semantics<parallel>, #tpu.dimension_semantics<parallel>], iteration_bounds = array<i64: 2, 2>, scalar_prefetch = 0 : i64, scratch_operands = 1 : i64, tpu.core_type = #tpu.core_type<tc>, window_params = [{transform_indices = @transform_0, window_bounds = array<i64: 1, 18, 16, 4>}, {pipeline_mode = #tpu.pipeline_mode<synchronous>, transform_indices = @transform_1, window_bounds = array<i64: 4, 16>}, {pipeline_mode = #tpu.pipeline_mode<synchronous>, transform_indices = @transform_2, window_bounds = array<i64: 1, 16>}, {pipeline_mode = #tpu.pipeline_mode<synchronous>, transform_indices = @transform_3, window_bounds = array<i64: 3, 3, 16>}, {pipeline_mode = #tpu.pipeline_mode<synchronous>, transform_indices = @transform_4, window_bounds = array<i64: 1, 16>}, {pipeline_mode = #tpu.pipeline_mode<synchronous>, transform_indices = @transform_5, window_bounds = array<i64: 1, 16>}, {pipeline_mode = #tpu.pipeline_mode<synchronous>, transform_indices = @transform_6, window_bounds = array<i64: 1, 1>}, {pipeline_mode = #tpu.pipeline_mode<synchronous>, transform_indices = @transform_7, window_bounds = array<i64: 1, 16>}, {pipeline_mode = #tpu.pipeline_mode<synchronous>, transform_indices = @transform_8, window_bounds = array<i64: 16, 4>}, {pipeline_mode = #tpu.pipeline_mode<synchronous>, transform_indices = @transform_9, window_bounds = array<i64: 1, 4>}, {transform_indices = @transform_10, window_bounds = array<i64: 1, 8, 16, 4>}]} {
    %c8_i32 = arith.constant 8 : i32
    %0 = arith.muli %arg1, %c8_i32 : i32
    %1 = tpu.assume_multiple %0, 8 : i32
    %c0 = arith.constant 0 : index
    %2 = arith.index_cast %1 : i32 to index
    %c0_0 = arith.constant 0 : index
    %c0_1 = arith.constant 0 : index
    %3 = vector.load %arg2[%c0, %2, %c0_0, %c0_1] : memref<1x18x16x4xf32, #tpu.memory_space<vmem>>, vector<1x10x16x4xf32>
    %4 = vector.shape_cast %3 : vector<1x10x16x4xf32> to vector<10x16x4xf32>
    %5 = vector.shape_cast %4 : vector<10x16x4xf32> to vector<160x4xf32>
    %c0_2 = arith.constant 0 : index
    %c0_3 = arith.constant 0 : index
    %6 = vector.load %arg3[%c0_2, %c0_3] : memref<4x16xf32, #tpu.memory_space<vmem>>, vector<4x16xf32>
    %cst = arith.constant dense<0.000000e+00> : vector<160x16xf32>
    %7 = tpu.matmul %5, %6, %cst {dimension_numbers = #tpu.dot_dimension_numbers<[1], [0], [0], [1], [0, 0, 1, 1], [], []>} : vector<160x4xf32>, vector<4x16xf32>, vector<160x16xf32> -> vector<160x16xf32>
    %c0_4 = arith.constant 0 : index
    %c0_5 = arith.constant 0 : index
    %8 = vector.load %arg4[%c0_4, %c0_5] : memref<1x16xf32, #tpu.memory_space<vmem>>, vector<1x16xf32>
    %9 = vector.broadcast %8 : vector<1x16xf32> to vector<160x16xf32>
    %10 = arith.addf %7, %9 : vector<160x16xf32>
    %11 = tpu.iota {dimensions = array<i32: 0>} : vector<160x1xi32>
    %c1_i32 = arith.constant 1 : i32
    %12 = arith.subi %c1_i32, %1 : i32
    %c16_i32 = arith.constant 16 : i32
    %13 = arith.muli %12, %c16_i32 : i32
    %14 = vector.broadcast %13 : i32 to vector<160x1xi32>
    %15 = arith.cmpi sge, %11, %14 : vector<160x1xi32>
    %c17_i32 = arith.constant 17 : i32
    %16 = arith.subi %c17_i32, %1 : i32
    %c16_i32_6 = arith.constant 16 : i32
    %17 = arith.muli %16, %c16_i32_6 : i32
    %18 = vector.broadcast %17 : i32 to vector<160x1xi32>
    %19 = arith.cmpi slt, %11, %18 : vector<160x1xi32>
    %20 = arith.andi %15, %19 : vector<160x1xi1>
    %cst_7 = arith.constant 0.000000e+00 : f32
    %21 = vector.shape_cast %20 : vector<160x1xi1> to vector<160x1xi1>
    %22 = vector.broadcast %21 : vector<160x1xi1> to vector<160x16xi1>
    %23 = vector.broadcast %cst_7 : f32 to vector<160x16xf32>
    %24 = arith.select %22, %10, %23 : vector<160x16xi1>, vector<160x16xf32>
    %cst_8 = arith.constant 0.000000e+00 : f32
    %25 = vector.broadcast %cst_8 : f32 to vector<10x1x16xf32>
    %c0_9 = arith.constant 0 : index
    %c0_10 = arith.constant 0 : index
    %c0_11 = arith.constant 0 : index
    %26 = vector.load %arg13[%c0_9, %c0_10, %c0_11] : memref<10x24x16xf32, #tpu.memory_space<vmem>>, vector<10x1x16xf32>
    tpu.vector_store %arg13[%c0_9, %c0_10, %c0_11], %25 {strides = array<i32>} : memref<10x24x16xf32, #tpu.memory_space<vmem>>, vector<10x1x16xf32>,
    %cst_12 = arith.constant 0.000000e+00 : f32
    %27 = vector.broadcast %cst_12 : f32 to vector<10x1x16xf32>
    %c0_13 = arith.constant 0 : index
    %c17 = arith.constant 17 : index
    %c0_14 = arith.constant 0 : index
    %28 = vector.load %arg13[%c0_13, %c17, %c0_14] : memref<10x24x16xf32, #tpu.memory_space<vmem>>, vector<10x1x16xf32>
    tpu.vector_store %arg13[%c0_13, %c17, %c0_14], %27 {strides = array<i32>} : memref<10x24x16xf32, #tpu.memory_space<vmem>>, vector<10x1x16xf32>,
    %29 = vector.shape_cast %24 : vector<160x16xf32> to vector<10x16x16xf32>
    %c0_15 = arith.constant 0 : index
    %c1 = arith.constant 1 : index
    %c0_16 = arith.constant 0 : index
    %30 = vector.load %arg13[%c0_15, %c1, %c0_16] : memref<10x24x16xf32, #tpu.memory_space<vmem>>, vector<10x16x16xf32>
    tpu.vector_store %arg13[%c0_15, %c1, %c0_16], %29 {strides = array<i32>} : memref<10x24x16xf32, #tpu.memory_space<vmem>>, vector<10x16x16xf32>,
    %c0_17 = arith.constant 0 : index
    %c0_18 = arith.constant 0 : index
    %c0_19 = arith.constant 0 : index
    %31 = vector.load %arg5[%c0_17, %c0_18, %c0_19] : memref<3x3x16xf32, #tpu.memory_space<vmem>>, vector<3x3x16xf32>
    %cst_20 = arith.constant 0.000000e+00 : f32
    %32 = vector.broadcast %cst_20 : f32 to vector<8x16x16xf32>
    %33 = vector.extract_strided_slice %31 {offsets = [0, 0, 0], sizes = [1, 1, 16], strides = [1, 1, 1]} : vector<3x3x16xf32> to vector<1x1x16xf32>
    %c0_21 = arith.constant 0 : index
    %c0_22 = arith.constant 0 : index
    %c0_23 = arith.constant 0 : index
    %34 = vector.load %arg13[%c0_21, %c0_22, %c0_23] : memref<10x24x16xf32, #tpu.memory_space<vmem>>, vector<8x16x16xf32>
    %35 = vector.broadcast %33 : vector<1x1x16xf32> to vector<8x16x16xf32>
    %36 = arith.mulf %34, %35 : vector<8x16x16xf32>
    %37 = arith.addf %32, %36 : vector<8x16x16xf32>
    %38 = vector.extract_strided_slice %31 {offsets = [0, 1, 0], sizes = [1, 1, 16], strides = [1, 1, 1]} : vector<3x3x16xf32> to vector<1x1x16xf32>
    %c0_24 = arith.constant 0 : index
    %c1_25 = arith.constant 1 : index
    %c0_26 = arith.constant 0 : index
    %39 = vector.load %arg13[%c0_24, %c1_25, %c0_26] : memref<10x24x16xf32, #tpu.memory_space<vmem>>, vector<8x16x16xf32>
    %40 = vector.broadcast %38 : vector<1x1x16xf32> to vector<8x16x16xf32>
    %41 = arith.mulf %39, %40 : vector<8x16x16xf32>
    %42 = arith.addf %37, %41 : vector<8x16x16xf32>
    %43 = vector.extract_strided_slice %31 {offsets = [0, 2, 0], sizes = [1, 1, 16], strides = [1, 1, 1]} : vector<3x3x16xf32> to vector<1x1x16xf32>
    %c0_27 = arith.constant 0 : index
    %c2 = arith.constant 2 : index
    %c0_28 = arith.constant 0 : index
    %44 = vector.load %arg13[%c0_27, %c2, %c0_28] : memref<10x24x16xf32, #tpu.memory_space<vmem>>, vector<8x16x16xf32>
    %45 = vector.broadcast %43 : vector<1x1x16xf32> to vector<8x16x16xf32>
    %46 = arith.mulf %44, %45 : vector<8x16x16xf32>
    %47 = arith.addf %42, %46 : vector<8x16x16xf32>
    %48 = vector.extract_strided_slice %31 {offsets = [1, 0, 0], sizes = [1, 1, 16], strides = [1, 1, 1]} : vector<3x3x16xf32> to vector<1x1x16xf32>
    %c1_29 = arith.constant 1 : index
    %c0_30 = arith.constant 0 : index
    %c0_31 = arith.constant 0 : index
    %49 = vector.load %arg13[%c1_29, %c0_30, %c0_31] : memref<10x24x16xf32, #tpu.memory_space<vmem>>, vector<8x16x16xf32>
    %50 = vector.broadcast %48 : vector<1x1x16xf32> to vector<8x16x16xf32>
    %51 = arith.mulf %49, %50 : vector<8x16x16xf32>
    %52 = arith.addf %47, %51 : vector<8x16x16xf32>
    %53 = vector.extract_strided_slice %31 {offsets = [1, 1, 0], sizes = [1, 1, 16], strides = [1, 1, 1]} : vector<3x3x16xf32> to vector<1x1x16xf32>
    %c1_32 = arith.constant 1 : index
    %c1_33 = arith.constant 1 : index
    %c0_34 = arith.constant 0 : index
    %54 = vector.load %arg13[%c1_32, %c1_33, %c0_34] : memref<10x24x16xf32, #tpu.memory_space<vmem>>, vector<8x16x16xf32>
    %55 = vector.broadcast %53 : vector<1x1x16xf32> to vector<8x16x16xf32>
    %56 = arith.mulf %54, %55 : vector<8x16x16xf32>
    %57 = arith.addf %52, %56 : vector<8x16x16xf32>
    %58 = vector.extract_strided_slice %31 {offsets = [1, 2, 0], sizes = [1, 1, 16], strides = [1, 1, 1]} : vector<3x3x16xf32> to vector<1x1x16xf32>
    %c1_35 = arith.constant 1 : index
    %c2_36 = arith.constant 2 : index
    %c0_37 = arith.constant 0 : index
    %59 = vector.load %arg13[%c1_35, %c2_36, %c0_37] : memref<10x24x16xf32, #tpu.memory_space<vmem>>, vector<8x16x16xf32>
    %60 = vector.broadcast %58 : vector<1x1x16xf32> to vector<8x16x16xf32>
    %61 = arith.mulf %59, %60 : vector<8x16x16xf32>
    %62 = arith.addf %57, %61 : vector<8x16x16xf32>
    %63 = vector.extract_strided_slice %31 {offsets = [2, 0, 0], sizes = [1, 1, 16], strides = [1, 1, 1]} : vector<3x3x16xf32> to vector<1x1x16xf32>
    %c2_38 = arith.constant 2 : index
    %c0_39 = arith.constant 0 : index
    %c0_40 = arith.constant 0 : index
    %64 = vector.load %arg13[%c2_38, %c0_39, %c0_40] : memref<10x24x16xf32, #tpu.memory_space<vmem>>, vector<8x16x16xf32>
    %65 = vector.broadcast %63 : vector<1x1x16xf32> to vector<8x16x16xf32>
    %66 = arith.mulf %64, %65 : vector<8x16x16xf32>
    %67 = arith.addf %62, %66 : vector<8x16x16xf32>
    %68 = vector.extract_strided_slice %31 {offsets = [2, 1, 0], sizes = [1, 1, 16], strides = [1, 1, 1]} : vector<3x3x16xf32> to vector<1x1x16xf32>
    %c2_41 = arith.constant 2 : index
    %c1_42 = arith.constant 1 : index
    %c0_43 = arith.constant 0 : index
    %69 = vector.load %arg13[%c2_41, %c1_42, %c0_43] : memref<10x24x16xf32, #tpu.memory_space<vmem>>, vector<8x16x16xf32>
    %70 = vector.broadcast %68 : vector<1x1x16xf32> to vector<8x16x16xf32>
    %71 = arith.mulf %69, %70 : vector<8x16x16xf32>
    %72 = arith.addf %67, %71 : vector<8x16x16xf32>
    %73 = vector.extract_strided_slice %31 {offsets = [2, 2, 0], sizes = [1, 1, 16], strides = [1, 1, 1]} : vector<3x3x16xf32> to vector<1x1x16xf32>
    %c2_44 = arith.constant 2 : index
    %c2_45 = arith.constant 2 : index
    %c0_46 = arith.constant 0 : index
    %74 = vector.load %arg13[%c2_44, %c2_45, %c0_46] : memref<10x24x16xf32, #tpu.memory_space<vmem>>, vector<8x16x16xf32>
    %75 = vector.broadcast %73 : vector<1x1x16xf32> to vector<8x16x16xf32>
    %76 = arith.mulf %74, %75 : vector<8x16x16xf32>
    %77 = arith.addf %72, %76 : vector<8x16x16xf32>
    %c0_47 = arith.constant 0 : index
    %c0_48 = arith.constant 0 : index
    %78 = vector.load %arg6[%c0_47, %c0_48] : memref<1x16xf32, #tpu.memory_space<vmem>>, vector<1x16xf32>
    %79 = vector.shape_cast %78 : vector<1x16xf32> to vector<1x1x16xf32>
    %80 = vector.broadcast %79 : vector<1x1x16xf32> to vector<8x16x16xf32>
    %81 = arith.addf %77, %80 : vector<8x16x16xf32>
    %cst_49 = arith.constant 5.000000e-01 : f32
    %82 = vector.broadcast %cst_49 : f32 to vector<8x16x16xf32>
    %83 = arith.mulf %82, %81 : vector<8x16x16xf32>
    %cst_50 = arith.constant 0.707106769 : f32
    %84 = vector.broadcast %cst_50 : f32 to vector<8x16x16xf32>
    %85 = arith.mulf %81, %84 : vector<8x16x16xf32>
    %86 = math.absf %85 : vector<8x16x16xf32>
    %cst_51 = arith.constant 0.327591091 : f32
    %87 = vector.broadcast %cst_51 : f32 to vector<8x16x16xf32>
    %88 = arith.mulf %87, %86 : vector<8x16x16xf32>
    %cst_52 = arith.constant 1.000000e+00 : f32
    %89 = vector.broadcast %cst_52 : f32 to vector<8x16x16xf32>
    %90 = arith.addf %89, %88 : vector<8x16x16xf32>
    %91 = tpu.reciprocal %90 {approx = true} : vector<8x16x16xf32> -> vector<8x16x16xf32>
    %cst_53 = arith.constant 1.06140542 : f32
    %92 = vector.broadcast %cst_53 : f32 to vector<8x16x16xf32>
    %93 = arith.mulf %92, %91 : vector<8x16x16xf32>
    %cst_54 = arith.constant -1.45315206 : f32
    %94 = vector.broadcast %cst_54 : f32 to vector<8x16x16xf32>
    %95 = arith.addf %93, %94 : vector<8x16x16xf32>
    %96 = arith.mulf %95, %91 : vector<8x16x16xf32>
    %cst_55 = arith.constant 1.42141378 : f32
    %97 = vector.broadcast %cst_55 : f32 to vector<8x16x16xf32>
    %98 = arith.addf %96, %97 : vector<8x16x16xf32>
    %99 = arith.mulf %98, %91 : vector<8x16x16xf32>
    %cst_56 = arith.constant -0.284496725 : f32
    %100 = vector.broadcast %cst_56 : f32 to vector<8x16x16xf32>
    %101 = arith.addf %99, %100 : vector<8x16x16xf32>
    %102 = arith.mulf %101, %91 : vector<8x16x16xf32>
    %cst_57 = arith.constant 0.254829586 : f32
    %103 = vector.broadcast %cst_57 : f32 to vector<8x16x16xf32>
    %104 = arith.addf %102, %103 : vector<8x16x16xf32>
    %105 = arith.mulf %104, %91 : vector<8x16x16xf32>
    %cst_58 = arith.constant 0.000000e+00 : f32
    %106 = vector.broadcast %cst_58 : f32 to vector<8x16x16xf32>
    %107 = arith.subf %106, %86 : vector<8x16x16xf32>
    %108 = arith.mulf %107, %86 : vector<8x16x16xf32>
    %109 = math.exp %108 : vector<8x16x16xf32>
    %110 = arith.mulf %105, %109 : vector<8x16x16xf32>
    %cst_59 = arith.constant 1.000000e+00 : f32
    %111 = vector.broadcast %cst_59 : f32 to vector<8x16x16xf32>
    %112 = arith.subf %111, %110 : vector<8x16x16xf32>
    %cst_60 = arith.constant 0.000000e+00 : f32
    %113 = vector.broadcast %cst_60 : f32 to vector<8x16x16xf32>
    %114 = arith.cmpf oge, %85, %113 : vector<8x16x16xf32>
    %cst_61 = arith.constant 0.000000e+00 : f32
    %115 = vector.broadcast %cst_61 : f32 to vector<8x16x16xf32>
    %116 = arith.subf %115, %112 : vector<8x16x16xf32>
    %117 = arith.select %114, %112, %116 : vector<8x16x16xi1>, vector<8x16x16xf32>
    %cst_62 = arith.constant 1.000000e+00 : f32
    %118 = vector.broadcast %cst_62 : f32 to vector<8x16x16xf32>
    %119 = arith.addf %118, %117 : vector<8x16x16xf32>
    %120 = arith.mulf %83, %119 : vector<8x16x16xf32>
    %121 = vector.shape_cast %120 : vector<8x16x16xf32> to vector<128x16xf32>
    %c0_63 = arith.constant 0 : index
    %c0_64 = arith.constant 0 : index
    %122 = vector.load %arg7[%c0_63, %c0_64] : memref<1x16xf32, #tpu.memory_space<vmem>>, vector<1x16xf32>
    %123 = vector.broadcast %122 : vector<1x16xf32> to vector<128x16xf32>
    %124 = arith.mulf %121, %123 : vector<128x16xf32>
    %cst_65 = arith.constant dense<0.000000e+00> : vector<128xf32>
    %125 = vector.multi_reduction <add>, %124, %cst_65 [1] : vector<128x16xf32> to vector<128xf32>
    %126 = vector.shape_cast %125 : vector<128xf32> to vector<128x1xf32>
    %c0_66 = arith.constant 0 : index
    %c0_67 = arith.constant 0 : index
    %127 = vector.load %arg8[%c0_66, %c0_67] : memref<1x1xf32, #tpu.memory_space<vmem>>, vector<1x1xf32>
    %128 = vector.broadcast %127 : vector<1x1xf32> to vector<128x1xf32>
    %129 = arith.addf %126, %128 : vector<128x1xf32>
    %c0_68 = arith.constant 0 : index
    %c0_69 = arith.constant 0 : index
    %130 = vector.load %arg9[%c0_68, %c0_69] : memref<1x16xf32, #tpu.memory_space<vmem>>, vector<1x16xf32>
    %cst_70 = arith.constant 5.000000e-01 : f32
    %131 = vector.broadcast %cst_70 : f32 to vector<128x1xf32>
    %132 = arith.mulf %131, %129 : vector<128x1xf32>
    %cst_71 = arith.constant 0.707106769 : f32
    %133 = vector.broadcast %cst_71 : f32 to vector<128x1xf32>
    %134 = arith.mulf %129, %133 : vector<128x1xf32>
    %135 = math.absf %134 : vector<128x1xf32>
    %cst_72 = arith.constant 0.327591091 : f32
    %136 = vector.broadcast %cst_72 : f32 to vector<128x1xf32>
    %137 = arith.mulf %136, %135 : vector<128x1xf32>
    %cst_73 = arith.constant 1.000000e+00 : f32
    %138 = vector.broadcast %cst_73 : f32 to vector<128x1xf32>
    %139 = arith.addf %138, %137 : vector<128x1xf32>
    %140 = tpu.reciprocal %139 {approx = true} : vector<128x1xf32> -> vector<128x1xf32>
    %cst_74 = arith.constant 1.06140542 : f32
    %141 = vector.broadcast %cst_74 : f32 to vector<128x1xf32>
    %142 = arith.mulf %141, %140 : vector<128x1xf32>
    %cst_75 = arith.constant -1.45315206 : f32
    %143 = vector.broadcast %cst_75 : f32 to vector<128x1xf32>
    %144 = arith.addf %142, %143 : vector<128x1xf32>
    %145 = arith.mulf %144, %140 : vector<128x1xf32>
    %cst_76 = arith.constant 1.42141378 : f32
    %146 = vector.broadcast %cst_76 : f32 to vector<128x1xf32>
    %147 = arith.addf %145, %146 : vector<128x1xf32>
    %148 = arith.mulf %147, %140 : vector<128x1xf32>
    %cst_77 = arith.constant -0.284496725 : f32
    %149 = vector.broadcast %cst_77 : f32 to vector<128x1xf32>
    %150 = arith.addf %148, %149 : vector<128x1xf32>
    %151 = arith.mulf %150, %140 : vector<128x1xf32>
    %cst_78 = arith.constant 0.254829586 : f32
    %152 = vector.broadcast %cst_78 : f32 to vector<128x1xf32>
    %153 = arith.addf %151, %152 : vector<128x1xf32>
    %154 = arith.mulf %153, %140 : vector<128x1xf32>
    %cst_79 = arith.constant 0.000000e+00 : f32
    %155 = vector.broadcast %cst_79 : f32 to vector<128x1xf32>
    %156 = arith.subf %155, %135 : vector<128x1xf32>
    %157 = arith.mulf %156, %135 : vector<128x1xf32>
    %158 = math.exp %157 : vector<128x1xf32>
    %159 = arith.mulf %154, %158 : vector<128x1xf32>
    %cst_80 = arith.constant 1.000000e+00 : f32
    %160 = vector.broadcast %cst_80 : f32 to vector<128x1xf32>
    %161 = arith.subf %160, %159 : vector<128x1xf32>
    %cst_81 = arith.constant 0.000000e+00 : f32
    %162 = vector.broadcast %cst_81 : f32 to vector<128x1xf32>
    %163 = arith.cmpf oge, %134, %162 : vector<128x1xf32>
    %cst_82 = arith.constant 0.000000e+00 : f32
    %164 = vector.broadcast %cst_82 : f32 to vector<128x1xf32>
    %165 = arith.subf %164, %161 : vector<128x1xf32>
    %166 = arith.select %163, %161, %165 : vector<128x1xi1>, vector<128x1xf32>
    %cst_83 = arith.constant 1.000000e+00 : f32
    %167 = vector.broadcast %cst_83 : f32 to vector<128x1xf32>
    %168 = arith.addf %167, %166 : vector<128x1xf32>
    %169 = arith.mulf %132, %168 : vector<128x1xf32>
    %170 = vector.broadcast %169 : vector<128x1xf32> to vector<128x16xf32>
    %171 = arith.subf %121, %170 : vector<128x16xf32>
    %172 = vector.broadcast %130 : vector<1x16xf32> to vector<128x16xf32>
    %173 = arith.mulf %172, %171 : vector<128x16xf32>
    %174 = arith.addf %121, %173 : vector<128x16xf32>
    %c0_84 = arith.constant 0 : index
    %c0_85 = arith.constant 0 : index
    %175 = vector.load %arg10[%c0_84, %c0_85] : memref<16x4xf32, #tpu.memory_space<vmem>>, vector<16x4xf32>
    %cst_86 = arith.constant dense<0.000000e+00> : vector<128x4xf32>
    %176 = tpu.matmul %174, %175, %cst_86 {dimension_numbers = #tpu.dot_dimension_numbers<[1], [0], [0], [1], [0, 0, 1, 1], [], []>} : vector<128x16xf32>, vector<16x4xf32>, vector<128x4xf32> -> vector<128x4xf32>
    %c0_87 = arith.constant 0 : index
    %c0_88 = arith.constant 0 : index
    %177 = vector.load %arg11[%c0_87, %c0_88] : memref<1x4xf32, #tpu.memory_space<vmem>>, vector<1x4xf32>
    %178 = vector.broadcast %177 : vector<1x4xf32> to vector<128x4xf32>
    %179 = arith.addf %176, %178 : vector<128x4xf32>
    %180 = vector.shape_cast %179 : vector<128x4xf32> to vector<8x16x4xf32>
    %c0_89 = arith.constant 0 : index
    %c0_90 = arith.constant 0 : index
    %c0_91 = arith.constant 0 : index
    %c0_92 = arith.constant 0 : index
    %181 = vector.load %arg12[%c0_89, %c0_90, %c0_91, %c0_92] : memref<1x8x16x4xf32, #tpu.memory_space<vmem>>, vector<1x8x16x4xf32>
    %182 = vector.shape_cast %181 : vector<1x8x16x4xf32> to vector<8x16x4xf32>
    %183 = vector.shape_cast %180 : vector<8x16x4xf32> to vector<1x8x16x4xf32>
    tpu.vector_store %arg12[%c0_89, %c0_90, %c0_91, %c0_92], %183 {strides = array<i32>} : memref<1x8x16x4xf32, #tpu.memory_space<vmem>>, vector<1x8x16x4xf32>,
    return
  }
  func.func @transform_0(%arg0: i32, %arg1: i32) -> (i32, i32, i32, i32) {
    %c0_i32 = arith.constant 0 : i32
    %c0_i32_0 = arith.constant 0 : i32
    %c0_i32_1 = arith.constant 0 : i32
    %c0_i32_2 = arith.constant 0 : i32
    return %arg0, %c0_i32, %c0_i32_0, %c0_i32_1 : i32, i32, i32, i32
  }
  func.func @transform_1(%arg0: i32, %arg1: i32) -> (i32, i32) {
    %c0_i32 = arith.constant 0 : i32
    %c0_i32_0 = arith.constant 0 : i32
    %c0_i32_1 = arith.constant 0 : i32
    return %c0_i32, %c0_i32_0 : i32, i32
  }
  func.func @transform_2(%arg0: i32, %arg1: i32) -> (i32, i32) {
    %c0_i32 = arith.constant 0 : i32
    %c0_i32_0 = arith.constant 0 : i32
    %c0_i32_1 = arith.constant 0 : i32
    return %c0_i32, %c0_i32_0 : i32, i32
  }
  func.func @transform_3(%arg0: i32, %arg1: i32) -> (i32, i32, i32) {
    %c0_i32 = arith.constant 0 : i32
    %c0_i32_0 = arith.constant 0 : i32
    %c0_i32_1 = arith.constant 0 : i32
    %c0_i32_2 = arith.constant 0 : i32
    return %c0_i32, %c0_i32_0, %c0_i32_1 : i32, i32, i32
  }
  func.func @transform_4(%arg0: i32, %arg1: i32) -> (i32, i32) {
    %c0_i32 = arith.constant 0 : i32
    %c0_i32_0 = arith.constant 0 : i32
    %c0_i32_1 = arith.constant 0 : i32
    return %c0_i32, %c0_i32_0 : i32, i32
  }
  func.func @transform_5(%arg0: i32, %arg1: i32) -> (i32, i32) {
    %c0_i32 = arith.constant 0 : i32
    %c0_i32_0 = arith.constant 0 : i32
    %c0_i32_1 = arith.constant 0 : i32
    return %c0_i32, %c0_i32_0 : i32, i32
  }
  func.func @transform_6(%arg0: i32, %arg1: i32) -> (i32, i32) {
    %c0_i32 = arith.constant 0 : i32
    %c0_i32_0 = arith.constant 0 : i32
    %c0_i32_1 = arith.constant 0 : i32
    return %c0_i32, %c0_i32_0 : i32, i32
  }
  func.func @transform_7(%arg0: i32, %arg1: i32) -> (i32, i32) {
    %c0_i32 = arith.constant 0 : i32
    %c0_i32_0 = arith.constant 0 : i32
    %c0_i32_1 = arith.constant 0 : i32
    return %c0_i32, %c0_i32_0 : i32, i32
  }
  func.func @transform_8(%arg0: i32, %arg1: i32) -> (i32, i32) {
    %c0_i32 = arith.constant 0 : i32
    %c0_i32_0 = arith.constant 0 : i32
    %c0_i32_1 = arith.constant 0 : i32
    return %c0_i32, %c0_i32_0 : i32, i32
  }
  func.func @transform_9(%arg0: i32, %arg1: i32) -> (i32, i32) {
    %c0_i32 = arith.constant 0 : i32
    %c0_i32_0 = arith.constant 0 : i32
    %c0_i32_1 = arith.constant 0 : i32
    return %c0_i32, %c0_i32_0 : i32, i32
  }
  func.func @transform_10(%arg0: i32, %arg1: i32) -> (i32, i32, i32, i32) {
    %c0_i32 = arith.constant 0 : i32
    %c0_i32_0 = arith.constant 0 : i32
    %c0_i32_1 = arith.constant 0 : i32
    return %arg0, %arg1, %c0_i32, %c0_i32_0 : i32, i32, i32, i32
  }
}

</mosaic_0001>

<bundles_post_ra>
// kernel: channel_aggregation_ffn_nhwc.1
= control target key start
LH: loop header
LB: loop body
LE: loop exit
PB: predicated region body
PF: predicated region fallthrough
CT: control target
= control target key end

     0   :  { %s3140_s15 = smov 0   ;;  %s3142_s16 = smov 0   ;;  %s4736_s0 = inlined_call_operand.vmem [shape: f32[2,18,16,4], index: 0, kind: input, shape index: {}]   ;;  %s4737_s1 = inlined_call_operand.vmem [shape: f32[4,16], index: 1, kind: input, shape index: {}]   ;;  %s4738_s2 = inlined_call_operand.vmem [shape: f32[1,16], index: 2, kind: input, shape index: {}]   ;;  %s4739_s3 = inlined_call_operand.vmem [shape: f32[3,3,16], index: 3, kind: input, shape index: {}]   ;;  %s4740_s4 = inlined_call_operand.vmem [shape: f32[1,16], index: 4, kind: input, shape index: {}]   ;;  %s4741_s5 = inlined_call_operand.vmem [shape: f32[1,16], index: 5, kind: input, shape index: {}]   ;;  %s4742_s6 = inlined_call_operand.<no memory space> [shape: f32[1,1], index: 6, kind: input, shape index: {}]   ;;  %s4743_s7 = inlined_call_operand.vmem [shape: f32[1,16], index: 7, kind: input, shape index: {}]   ;;  %s4744_s8 = inlined_call_operand.vmem [shape: f32[16,4], index: 8, kind: input, shape index: {}]   ;;  %s4745_s9 = inlined_call_operand.vmem [shape: f32[1,4], index: 9, kind: input, shape index: {}]   ;;  %s4746_s10 = inlined_call_operand.vmem [shape: f32[2,16,16,4], index: 10, kind: output, shape index: {}]  }
   0x1   :  { %v15_v0 = vstv %s4742_s6  ;;  %s3144_s17 = smov 0   ;;  %s3146_s18 = smov 0  }
   0x2   :  { %16 = vst [vmem:[#allocation3] sm:$0x1] %v15_v0  ;;  %s3148_s19 = smov 0  }
   0x3 LB: > { %s31_s6 = sadd.s32 1, %s3070_s17  ;;  %s34_s20 = sadd.s32 1, %s3074_s18  ;;  %s3078_s19 = sphi %s3148_s19, %s22_s19   ;;  %s3074_s18 = sphi %s3146_s18, %s4809_s18   ;;  %s3070_s17 = sphi %s3144_s17, %s4808_s17   ;;  %s3066_s16 = sphi %s3142_s16, %s4807_s16   ;;  %s3062_s15 = sphi %s3140_s15, %s4806_s15  }
   0x4   : > { %p32_p0 = scmp.ge.s32.totalorder %s31_s6, 2  ;;  %p2708_p1 = scmp.ge.s32.totalorder %s3078_s19, 1 }
   0x5   : > { %p328_p2 = scmp.lt.s32.totalorder %s3078_s19, 5 }
   0x6   : > { %s4811_s6 = smov (%p32_p0, %s31_s6), 0  ;;  %s4813_s20 = smov (!%p32_p0, %s34_s20), %s3074_s18 }
   0x7   : > { %p329_p3 = pnand %p2708_p1, %p328_p2  ;;  %p36_p4 = scmp.ge.s32.totalorder %s4813_s20, 2 }
   0x8   : > { %p371_p5 = scmp.lt.s32.totalorder (!%p329_p3), %s3066_s16, 1  ;;  %s2763_s24 = sshll.u32 (!%p329_p3), %s3062_s15, 7 }
   0x9   : > { %s4815_s20 = smov (%p36_p4, %s4813_s20), 0  ;;  %332 = sbr.rel (%p329_p3) target bundleno = 973 (0x3cd), region = 60 }
   0xa   : > { %s3245_s29 = sshll.u32 (!%p329_p3), %s3062_s15, 3 }
   0xb   : > { %s669_s30 = ssub.s32 (!%p329_p3), 1, %s3245_s29  ;;  %s692_s11 = ssub.s32 (!%p329_p3), 17, %s3245_s29 }
   0xc   : > { %s2738_s12 = sshll.u32 (!%p329_p3), %s669_s30, 4  ;;  %s2739_s13 = sshll.u32 (!%p329_p3), %s692_s11, 4 }
   0xd   : > { %p379_p6 = scmp.lt.s32.totalorder (!%p329_p3), %s3245_s29, 15 }
   0xe   : > { %v410_v1 = vld [vmem:[%s4737_s1] sm:$0xf]  ;;  %vm479_vm0 = vcmask 1043456   ;;  %s4817_s16 = smov (!%p371_p5, %s3066_s16), 1  ;;  %vm4747_vm1 = vcmask 31744   ;;  %vm795_vm2 = vcmask 122880   ;;  %v648_v23 = vlaneseq }
   0xf   : > { %2803 = vmatprep.subr.msk.mxu0 %vm479_vm0, %v410_v1  ;;  %2863 = vmatprep.subr.msk.mxu1 %vm479_vm0, %v410_v1  ;;  %s2865_s23 = smul.u32 288, %s4817_s16  ;;  %v3080_v22 = vmov 0.0   ;;  %v3252_v26 = vstv %s2738_s12  ;;  %v3254_v27 = vstv %s2739_s13  ;;  %v837_v32 = vld [vmem:[%s4739_s3] sm:$0x7]  ;;  %vm816_vm5 = vcmask 130048   ;;  %s4819_s29 = smov (!%p379_p6, %s3245_s29), 15 }
  0x10   : > { %2804 = vmatpush3.msk.msra.mxu0 %vm479_vm0, %v410_v1  ;;  %2864 = vmatpush3.msk.msra.mxu1 %vm479_vm0, %v410_v1  ;;  %796 = vst.msk [vmem:[#allocation2] sm:$0x1] %vm795_vm2, %v3080_v22  ;;  %797 = vst.msk [vmem:[#allocation2 + $0x18] sm:$0x1] %vm795_vm2, %v3080_v22  ;;  %v3248_v24 = vshrl.u32 %v648_v23, 7 }
  0x11   : > { %s375_s27 = scalar_lea.vmem %s4736_s0, %s2865_s23  ;;  %798 = vst.msk [vmem:[#allocation2 + $0x30] sm:$0x1] %vm795_vm2, %v3080_v22  ;;  %799 = vst.msk [vmem:[#allocation2 + $0x48] sm:$0x1] %vm795_vm2, %v3080_v22  ;;  %v3278_v35 = vld [vmem:[%s4738_s2] ss:$0 sm:$0xff] }
  0x12   : > { %s3182_s28 = scalar_lea.vmem %s375_s27, %s2763_s24  ;;  %800 = vst.msk [vmem:[#allocation2 + $0x60] sm:$0x1] %vm795_vm2, %v3080_v22  ;;  %801 = vst.msk [vmem:[#allocation2 + $0x78] sm:$0x1] %vm795_vm2, %v3080_v22  ;;  %v650_v25 = vadd.s32 8, %v3248_v24  ;;  %v652_v28 = vadd.s32 24, %v3248_v24  ;;  %vm672_vm6 = vcmp.ge.s32.totalorder %v3248_v24, %v3252_v26  ;;  %vm695_vm7 = vcmp.lt.s32.totalorder %v3248_v24, %v3254_v27 }
  0x13   : > { %v390_v2 = vld [vmem:[%s3182_s28] sm:$0xff]  ;;  %v391_v3 = vld [vmem:[%s3182_s28 + $0x8] sm:$0xff]  ;;  %v392_v4 = vld [vmem:[%s3182_s28 + $0x10] sm:$0xff]  ;;  %802 = vst.msk [vmem:[#allocation2 + $0x90] sm:$0x1] %vm795_vm2, %v3080_v22  ;;  %v651_v29 = vadd.s32 16, %v3248_v24 }
  0x14   : > { %2805 = vmatprep.mubr.msk.f32.mxu0 %vm4747_vm1, %v390_v2  ;;  %v393_v5 = vld [vmem:[%s3182_s28 + $0x18] sm:$0xff]  ;;  %v394_v6 = vld [vmem:[%s3182_s28 + $0x20] sm:$0xff]  ;;  %v408_v7 = vld [vmem:[%s3182_s28 + $0x90] sm:$0xff]  ;;  %803 = vst.msk [vmem:[#allocation2 + $0xa8] sm:$0x1] %vm795_vm2, %v3080_v22  ;;  %v3259_v30 = vsub.s32 1, %v3248_v24  ;;  %vm673_vm3 = vcmp.ge.s32.totalorder %v650_v25, %v3252_v26  ;;  %vm696_vm4 = vcmp.lt.s32.totalorder %v650_v25, %v3254_v27  ;;  %vm675_vm8 = vcmp.ge.s32.totalorder %v652_v28, %v3252_v26 }
  0x15   : > { %2806 = vmatmul.mubr.msk.f32.vlgmr.msra.gmra.mxu0 %vm4747_vm1, %v391_v3  ;;  %v409_v8 = vld [vmem:[%s3182_s28 + $0x98] sm:$0xff]  ;;  %v395_v9 = vld [vmem:[%s3182_s28 + $0x28] sm:$0xff]  ;;  %2832 = vmatprep.mubr.msk.f32.mxu1 %vm4747_vm1, %v408_v7  ;;  %v396_v10 = vld [vmem:[%s3182_s28 + $0x30] sm:$0xff]  ;;  %804 = vst.msk [vmem:[#allocation2 + $0xc0] sm:$0x1] %vm795_vm2, %v3080_v22  ;;  %v654_v31 = vadd.s32 40, %v3248_v24  ;;  %vm698_vm9 = vcmp.lt.s32.totalorder %v652_v28, %v3254_v27  ;;  %vm674_vm10 = vcmp.ge.s32.totalorder %v651_v29, %v3252_v26 }
  0x16   : > { %2808 = vmatprep.mubr.msk.f32.mxu0 %vm4747_vm1, %v392_v4  ;;  %2833 = vmatmul.mubr.msk.f32.vlgmr.msra.gmra.mxu1 %vm4747_vm1, %v409_v8  ;;  %v397_v11 = vld [vmem:[%s3182_s28 + $0x38] sm:$0xff]  ;;  %v398_v12 = vld [vmem:[%s3182_s28 + $0x40] sm:$0xff]  ;;  %v399_v13 = vld [vmem:[%s3182_s28 + $0x48] sm:$0xff]  ;;  %805 = vst.msk [vmem:[#allocation2 + $0xd8] sm:$0x1] %vm795_vm2, %v3080_v22  ;;  %v3267_v33 = vsub.s32 2, %v3248_v24  ;;  %vm697_vm11 = vcmp.lt.s32.totalorder %v651_v29, %v3254_v27  ;;  %v3294_v39 = vrot.slane %v837_v32, %v3259_v30 }
  0x17   : > { %v400_v14 = vld [vmem:[%s3182_s28 + $0x50] sm:$0xff]  ;;  %v401_v15 = vld [vmem:[%s3182_s28 + $0x58] sm:$0xff]  ;;  %v402_v16 = vld [vmem:[%s3182_s28 + $0x60] sm:$0xff]  ;;  %806 = vst.msk [vmem:[#allocation2 + $0x11] sm:$0x1] %vm795_vm2, %v3080_v22  ;;  %v3273_v34 = vadd.s32 32, %v3248_v24  ;;  %vm677_vm13 = vcmp.ge.s32.totalorder %v654_v31, %v3252_v26  ;;  %vm700_vm14 = vcmp.lt.s32.totalorder %v654_v31, %v3254_v27 }
  0x18   : > { %v403_v17 = vld [vmem:[%s3182_s28 + $0x68] sm:$0xff]  ;;  %v404_v18 = vld [vmem:[%s3182_s28 + $0x70] sm:$0xff]  ;;  %v405_v19 = vld [vmem:[%s3182_s28 + $0x78] sm:$0xff]  ;;  %807 = vst.msk [vmem:[#allocation2 + $0x29] sm:$0x1] %vm795_vm2, %v3080_v22  ;;  %v3285_v36 = vsub.s32 0, %v3248_v24  ;;  %v3310_v43 = vrot.slane %v837_v32, %v3267_v33 }
  0x19   : > { %2809 = vmatmul.mubr.msk.f32.gmra.mxu0 %vm4747_vm1, %v393_v5  ;;  %v406_v20 = vld [vmem:[%s3182_s28 + $0x80] sm:$0xff]  ;;  %v407_v21 = vld [vmem:[%s3182_s28 + $0x88] sm:$0xff]  ;;  %808 = vst.msk [vmem:[#allocation2 + $0x41] sm:$0x1] %vm795_vm2, %v3080_v22  ;;  %809 = vst.msk [vmem:[#allocation2 + $0x59] sm:$0x1] %vm795_vm2, %v3080_v22  ;;  %vm676_vm15 = vcmp.ge.s32.totalorder %v3273_v34, %v3252_v26  ;;  %vm699_vm0 = vcmp.lt.s32.totalorder %v3273_v34, %v3254_v27 }
  0x1a   : > { %2811 = vmatprep.mubr.msk.f32.mxu0 %vm4747_vm1, %v394_v6  ;;  %810 = vst.msk [vmem:[#allocation2 + $0x71] sm:$0x1] %vm795_vm2, %v3080_v22  ;;  %811 = vst.msk [vmem:[#allocation2 + $0x89] sm:$0x1] %vm795_vm2, %v3080_v22  ;;  %v668_v37 = vadd.s32 152, %v3248_v24  ;;  %v3307_v42 = vadd.s32 56, %v3248_v24  ;;  %v3335_v50 = vrot.slane %v837_v32, %v3285_v36 }
  0x1b   : > { %812 = vst.msk [vmem:[#allocation2 + $0xa1] sm:$0x1] %vm795_vm2, %v3080_v22  ;;  %813 = vst.msk [vmem:[#allocation2 + $0xb9] sm:$0x1] %vm795_vm2, %v3080_v22  ;;  %v838_v38 = vld [vmem:[%s4739_s3 + $0x4] sm:$0x7] }
  0x1c   : > { %814 = vst.msk [vmem:[#allocation2 + $0xd1] sm:$0x1] %vm795_vm2, %v3080_v22  ;;  %815 = vst.msk [vmem:[#allocation2 + $0xe9] sm:$0x1] %vm795_vm2, %v3080_v22  ;;  %v667_v45 = vadd.s32 144, %v3248_v24  ;;  %v3329_v48 = vadd.s32 48, %v3248_v24  ;;  %v3338_v51 = vrot.slane %v838_v38, %v3259_v30  ;;  %v3362_v57 = vrot.slane %v838_v38, %v3267_v33 }
  0x1d   : > { %2812 = vmatmul.mubr.msk.f32.gmra.mxu0 %vm4747_vm1, %v395_v9  ;;  %vm3300_vm12 = vmand %vm673_vm3, %vm696_vm4  ;;  %v3332_v49 = vadd.s32 72, %v3248_v24  ;;  %vm691_vm3 = vcmp.ge.s32.totalorder %v668_v37, %v3252_v26  ;;  %vm714_vm4 = vcmp.lt.s32.totalorder %v668_v37, %v3254_v27  ;;  %v3359_v56 = vadd.s32 64, %v3248_v24  ;;  %v839_v5 = vld [vmem:[%s4739_s3 + $0x8] sm:$0x7]  ;;  %s2711_s27 = sshll.u32 %s4819_s29, 1  ;;  %s2712_s28 = sshll.u32 %s4817_s16, 5 }
  0x1e   : > { %2814 = vmatprep.mubr.msk.f32.mxu0 %vm4747_vm1, %v396_v10  ;;  %vm3324_vm2 = vmand %vm672_vm6, %vm695_vm7  ;;  %vm701_vm7 = vcmp.lt.s32.totalorder %v3329_v48, %v3254_v27  ;;  %v3393_v0 = vrot.slane %v838_v38, %v3285_v36  ;;  %v3416_v7 = vadd.s32 88, %v3248_v24  ;;  %v3419_v8 = vadd.s32 80, %v3248_v24  ;;  %s383_s30 = sadd.s32 %s2712_s28, %s2711_s27 }
  0x1f   : > { %vm3350_vm6 = vmand %vm675_vm8, %vm698_vm9  ;;  %vm690_vm9 = vcmp.ge.s32.totalorder %v667_v45, %v3252_v26  ;;  %v3422_v9 = vadd.s32 104, %v3248_v24  ;;  %v3465_v23 = vadd.s32 96, %v3248_v24  ;;  %v3511_v41 = vadd.s32 112, %v3248_v24  ;;  %s2713_s11 = sshll.u32 %s383_s30, 3 }
  0x20   : > { %vm3371_vm8 = vmand %vm674_vm10, %vm697_vm11  ;;  %v3536_v60 = vadd.s32 136, %v3248_v24  ;;  %s4687_s21 = scalar_lea.vmem %s4746_s10, %s2713_s11 }
  0x21   : > { %2815 = vmatmul.mubr.msk.f32.gmra.mxu0 %vm4747_vm1, %v397_v11  ;;  %vm3388_vm10 = vmand %vm691_vm3, %vm714_vm4  ;;  %vm704_vm3 = vcmp.lt.s32.totalorder %v3332_v49, %v3254_v27  ;;  %vm680_vm4 = vcmp.ge.s32.totalorder %v3359_v56, %v3252_v26 }
  0x22   : > { %2817 = vmatprep.mubr.msk.f32.mxu0 %vm4747_vm1, %v398_v12  ;;  %vm3402_vm11 = vmand %vm677_vm13, %vm700_vm14  ;;  %vm703_vm14 = vcmp.lt.s32.totalorder %v3359_v56, %v3254_v27 }
  0x25   : > { %2818 = vmatmul.mubr.msk.f32.gmra.mxu0 %vm4747_vm1, %v399_v13 }
  0x26   : > { %2820 = vmatprep.mubr.msk.f32.mxu0 %vm4747_vm1, %v400_v14 }
  0x29   : > { %2821 = vmatmul.mubr.msk.f32.gmra.mxu0 %vm4747_vm1, %v401_v15 }
  0x2a   : > { %2823 = vmatprep.mubr.msk.f32.mxu0 %vm4747_vm1, %v402_v16 }
  0x2d   : > { %2824 = vmatmul.mubr.msk.f32.gmra.mxu0 %vm4747_vm1, %v403_v17 }
  0x2e   : > { %2826 = vmatprep.mubr.msk.f32.mxu0 %vm4747_vm1, %v404_v18  ;;  %v3453_v18 = vrot.slane %v839_v5, %v3285_v36 }
  0x31   : > { %2827 = vmatmul.mubr.msk.f32.gmra.mxu0 %vm4747_vm1, %v405_v19  ;;  %v3456_v19 = vrot.slane %v839_v5, %v3259_v30 }
  0x32   : > { %2829 = vmatprep.mubr.msk.f32.mxu0 %vm4747_vm1, %v406_v20  ;;  %v3459_v20 = vrot.slane %v839_v5, %v3267_v33  ;;  %v3495_v33 = vadd.s32 120, %v3248_v24 }
  0x35   : > { %2830 = vmatmul.mubr.msk.f32.gmra.mxu0 %vm4747_vm1, %v407_v21  ;;  %vm713_vm1 = vcmp.lt.s32.totalorder %v667_v45, %v3254_v27 }
  0x36   : > { %vm3428_vm13 = vmand %vm690_vm9, %vm713_vm1  ;;  %vm706_vm9 = vcmp.lt.s32.totalorder %v3416_v7, %v3254_v27 }
  0x37   : > { %vm3445_vm1 = vmand %vm676_vm15, %vm699_vm0  ;;  %vm4764_vm15 = vcmp.lt.s32.totalorder %v3307_v42, %v3254_v27  ;;  %vm4765_vm0 = vcmp.ge.s32.totalorder %v3307_v42, %v3252_v26 }
  0xd5   : > { %v2807_v40 = vpop.f32.mrf.mxu0 }
  0xd6   : > { %v555_v44 = vadd.f32 %v2807_v40, %v3278_v35  ;;  %v2834_v62 = vpop.f32.mrf.mxu1 }
  0xd7   : > { %v549_v46 = vpop.f32.mrf.mxu0  ;;  %v645_v4 = vadd.f32 %v2834_v62, %v3278_v35 }
  0xd8   : > { %v776_v52 = vsel %vm3300_vm12, %v555_v44, 0.0  ;;  %v550_v53 = vadd.f32 %v3278_v35, %v549_v46  ;;  %vm681_vm12 = vcmp.ge.s32.totalorder %v3332_v49, %v3252_v26  ;;  %v639_v10 = vpop.f32.mrf.mxu1 }
  0xd9   : > { %818 = vst.msk [vmem:[#allocation2 + $0x9] sm:$0xff] %vm816_vm5, %v776_v52  ;;  %v2810_v54 = vpop.f32.mrf.mxu0  ;;  %v794_v14 = vsel %vm3388_vm10, %v645_v4, 0.0  ;;  %v640_v15 = vadd.f32 %v3278_v35, %v639_v10  ;;  %vm682_vm10 = vcmp.ge.s32.totalorder %v3419_v8, %v3252_v26 }
  0xda   : > { %v775_v58 = vsel %vm3324_vm2, %v550_v53, 0.0  ;;  %v565_v59 = vadd.f32 %v2810_v54, %v3278_v35  ;;  %vm678_vm2 = vcmp.ge.s32.totalorder %v3329_v48, %v3252_v26  ;;  %836 = vst.msk [vmem:[#allocation2 + $0xe1] sm:$0xff] %vm816_vm5, %v794_v14 }
  0xdb   : > { %817 = vst.msk [vmem:[#allocation2 + $0x1] sm:$0xff] %vm816_vm5, %v775_v58  ;;  %v559_v61 = vpop.f32.mrf.mxu0  ;;  %v793_v25 = vsel %vm3428_vm13, %v640_v15, 0.0  ;;  %vm685_vm13 = vcmp.ge.s32.totalorder %v3422_v9, %v3252_v26 }
  0xdc   : > { %v778_v1 = vsel %vm3350_vm6, %v565_v59, 0.0  ;;  %v560_v2 = vadd.f32 %v3278_v35, %v559_v61  ;;  %vm3476_vm6 = vmand %vm4765_vm0, %vm4764_vm15  ;;  %835 = vst.msk [vmem:[#allocation2 + $0xd9] sm:$0xff] %vm816_vm5, %v793_v25  ;;  %vm708_vm15 = vcmp.lt.s32.totalorder %v3422_v9, %v3254_v27  ;;  %v3539_v61 = vadd.s32 128, %v3248_v24 }
  0xdd   : > { %820 = vst.msk [vmem:[#allocation2 + $0x21] sm:$0xff] %vm816_vm5, %v778_v1  ;;  %v2813_v6 = vpop.f32.mrf.mxu0  ;;  %vm3531_vm0 = vmand %vm681_vm12, %vm704_vm3  ;;  %vm687_vm12 = vcmp.ge.s32.totalorder %v3495_v33, %v3252_v26  ;;  %vm710_vm3 = vcmp.lt.s32.totalorder %v3495_v33, %v3254_v27  ;;  %v3701_v33 = vld [vmem:[%s4740_s4] ss:$0 sm:$0xff] }
  0xde   : > { %v777_v12 = vsel %vm3371_vm8, %v560_v2, 0.0  ;;  %v575_v13 = vadd.f32 %v2813_v6, %v3278_v35  ;;  %vm683_vm8 = vcmp.ge.s32.totalorder %v3416_v7, %v3252_v26 }
  0xdf   : > { %819 = vst.msk [vmem:[#allocation2 + $0x19] sm:$0xff] %vm816_vm5, %v777_v12  ;;  %v569_v16 = vpop.f32.mrf.mxu0 }
  0xe0   : > { %v780_v21 = vsel %vm3402_vm11, %v575_v13, 0.0  ;;  %v570_v22 = vadd.f32 %v3278_v35, %v569_v16  ;;  %vm705_vm11 = vcmp.lt.s32.totalorder %v3419_v8, %v3254_v27  ;;  %v893_v30 = vld [vmem:[#allocation2 + $0x9] sm:$0xff] }
  0xe1   : > { %822 = vst.msk [vmem:[#allocation2 + $0x39] sm:$0xff] %vm816_vm5, %v780_v21  ;;  %v2816_v28 = vpop.f32.mrf.mxu0  ;;  %v945_v46 = vld [vmem:[#allocation2 + $0xa] sm:$0xff]  ;;  %v913_v53 = vmul.f32 %v3294_v39, %v893_v30 }
  0xe2   : > { %v779_v31 = vsel %vm3445_vm1, %v570_v22, 0.0  ;;  %v585_v32 = vadd.f32 %v2816_v28, %v3278_v35  ;;  %v840_v34 = vld [vmem:[#allocation2] sm:$0xff]  ;;  %vm3504_vm1 = vmand %vm678_vm2, %vm701_vm7  ;;  %v841_v45 = vld [vmem:[#allocation2 + $0x8] sm:$0xff]  ;;  %vm684_vm7 = vcmp.ge.s32.totalorder %v3465_v23, %v3252_v26  ;;  %vm707_vm2 = vcmp.lt.s32.totalorder %v3465_v23, %v3254_v27 }
  0xe3   : > { %v892_v36 = vld [vmem:[#allocation2 + $0x1] sm:$0xff]  ;;  %821 = vst.msk [vmem:[#allocation2 + $0x31] sm:$0xff] %vm816_vm5, %v779_v31  ;;  %v579_v38 = vpop.f32.mrf.mxu0  ;;  %v860_v42 = vmul.f32 %v3335_v50, %v840_v34  ;;  %v861_v52 = vmul.f32 %v3335_v50, %v841_v45  ;;  %v965_v24 = vmul.f32 %v3310_v43, %v945_v46 }
  0xe4   : > { %v944_v37 = vld [vmem:[#allocation2 + $0x2] sm:$0xff]  ;;  %v912_v44 = vmul.f32 %v3294_v39, %v892_v36  ;;  %v782_v47 = vsel %vm3476_vm6, %v585_v32, 0.0  ;;  %v580_v48 = vadd.f32 %v3278_v35, %v579_v38  ;;  %vm3557_vm6 = vmand %vm680_vm4, %vm703_vm14  ;;  %vm686_vm4 = vcmp.ge.s32.totalorder %v3511_v41, %v3252_v26 }
  0xe5   : > { %v1050_v54 = vld [vmem:[#allocation2 + $0x21] sm:$0xff]  ;;  %824 = vst.msk [vmem:[#allocation2 + $0x51] sm:$0xff] %vm816_vm5, %v782_v47  ;;  %v2819_v58 = vpop.f32.mrf.mxu0  ;;  %v964_v63 = vmul.f32 %v3310_v43, %v944_v37  ;;  %v929_v4 = vadd.f32 %v913_v53, %v861_v52  ;;  %vm709_vm14 = vcmp.lt.s32.totalorder %v3511_v41, %v3254_v27 }
  0xe6   : > { %v1102_v55 = vld [vmem:[#allocation2 + $0x22] sm:$0xff]  ;;  %v928_v62 = vadd.f32 %v912_v44, %v860_v42  ;;  %v781_v1 = vsel %vm3504_vm1, %v580_v48, 0.0  ;;  %v595_v2 = vadd.f32 %v2819_v58, %v3278_v35  ;;  %v997_v49 = vld [vmem:[#allocation2 + $0x18] sm:$0xff]  ;;  %v1070_v14 = vmul.f32 %v3338_v51, %v1050_v54  ;;  %vm3584_vm1 = vmand %vm683_vm8, %vm706_vm9 }
  0xe7   : > { %v1049_v3 = vld [vmem:[#allocation2 + $0x19] sm:$0xff]  ;;  %823 = vst.msk [vmem:[#allocation2 + $0x49] sm:$0xff] %vm816_vm5, %v781_v1  ;;  %v589_v5 = vpop.f32.mrf.mxu0  ;;  %v1017_v11 = vmul.f32 %v3393_v0, %v997_v49  ;;  %v3566_v15 = vmul.f32 %v3362_v57, %v1102_v55  ;;  %v862_v17 = vmul.f32 %v997_v49, %v3335_v50  ;;  %v981_v30 = vadd.f32 %v965_v24, %v929_v4  ;;  %vm3610_vm9 = vmand %vm682_vm10, %vm705_vm11 }
  0xe8   : > { %v980_v10 = vadd.f32 %v964_v63, %v928_v62  ;;  %v1101_v12 = vld [vmem:[#allocation2 + $0x1a] sm:$0xff]  ;;  %v784_v16 = vsel %vm3531_vm0, %v595_v2, 0.0  ;;  %v590_v56 = vadd.f32 %v3278_v35, %v589_v5  ;;  %v914_v21 = vmul.f32 %v1049_v3, %v3294_v39  ;;  %vm3637_vm11 = vmand %vm685_vm13, %vm708_vm15 }
  0xe9   : > { %v3562_v13 = vld [vmem:[#allocation2 + $0x20] sm:$0xff]  ;;  %826 = vst.msk [vmem:[#allocation2 + $0x69] sm:$0xff] %vm816_vm5, %v784_v16  ;;  %v2822_v22 = vpop.f32.mrf.mxu0  ;;  %v1069_v29 = vmul.f32 %v3338_v51, %v1049_v3  ;;  %vm689_vm0 = vcmp.ge.s32.totalorder %v3536_v60, %v3252_v26  ;;  %vm712_vm8 = vcmp.lt.s32.totalorder %v3536_v60, %v3254_v27  ;;  %v966_v38 = vmul.f32 %v1101_v12, %v3310_v43  ;;  %vm3661_vm13 = vmand %vm684_vm7, %vm707_vm2 }
  0xea   : > { %v1033_v28 = vadd.f32 %v1017_v11, %v980_v10  ;;  %v1018_v31 = vmul.f32 %v3393_v0, %v3562_v13  ;;  %v783_v32 = vsel %vm3557_vm6, %v590_v56, 0.0  ;;  %v605_v34 = vadd.f32 %v2822_v22, %v3278_v35  ;;  %v3598_v7 = vld [vmem:[#allocation2 + $0x30] sm:$0xff]  ;;  %v3652_v24 = vld [vmem:[#allocation2 + $0x38] sm:$0xff]  ;;  %vm3685_vm15 = vmand %vm687_vm12, %vm710_vm3 }
  0xeb   : > { %v3600_v36 = vld [vmem:[#allocation2 + $0x31] sm:$0xff]  ;;  %v930_v37 = vadd.f32 %v914_v21, %v862_v17  ;;  %825 = vst.msk [vmem:[#allocation2 + $0x61] sm:$0xff] %vm816_vm5, %v783_v32  ;;  %v599_v40 = vpop.f32.mrf.mxu0  ;;  %v1121_v45 = vmul.f32 %v3362_v57, %v1101_v12  ;;  %v915_v46 = vmul.f32 %v1050_v54, %v3294_v39  ;;  %v3617_v47 = vmul.f32 %v1102_v55, %v3310_v43  ;;  %v3676_v25 = vld [vmem:[#allocation2 + $0x39] sm:$0xff]  ;;  %vm3713_vm7 = vmand %vm686_vm4, %vm709_vm14 }
  0xec   : > { %v1085_v44 = vadd.f32 %v1069_v29, %v1033_v28  ;;  %v786_v48 = vsel %vm3584_vm1, %v605_v34, 0.0  ;;  %v600_v52 = vadd.f32 %v3278_v35, %v599_v40  ;;  %vm688_vm6 = vcmp.ge.s32.totalorder %v3539_v61, %v3252_v26  ;;  %v3626_v8 = vld [vmem:[#allocation2 + $0x32] sm:$0xff]  ;;  %v3704_v42 = vld [vmem:[#allocation2 + $0x3a] sm:$0xff]  ;;  %vm3733_vm2 = vmand %vm689_vm0, %vm712_vm8 }
  0xed   : > { %vm711_vm10 = vcmp.lt.s32.totalorder %v3539_v61, %v3254_v27  ;;  %v982_v53 = vadd.f32 %v966_v38, %v930_v37  ;;  %v1019_v54 = vmul.f32 %v3598_v7, %v3393_v0  ;;  %828 = vst.msk [vmem:[#allocation2 + $0x81] sm:$0xff] %vm816_vm5, %v786_v48  ;;  %v2825_v55 = vpop.f32.mrf.mxu0  ;;  %v1174_v62 = vmul.f32 %v3453_v18, %v3598_v7 }
  0xee   : > { %v1137_v59 = vadd.f32 %v1121_v45, %v1085_v44  ;;  %v1226_v63 = vmul.f32 %v3456_v19, %v3600_v36  ;;  %v1034_v1 = vadd.f32 %v1018_v31, %v981_v30  ;;  %v785_v2 = vsel %vm3610_vm9, %v600_v52, 0.0  ;;  %v3650_v4 = vld [vmem:[#allocation2 + $0x48] sm:$0xff]  ;;  %vm3755_vm12 = vmand %vm688_vm6, %vm711_vm10 }
  0xef   : > { %v615_v49 = vadd.f32 %v2825_v55, %v3278_v35  ;;  %v1035_v3 = vadd.f32 %v1019_v54, %v982_v53  ;;  %v1071_v9 = vmul.f32 %v3600_v36, %v3338_v51  ;;  %827 = vst.msk [vmem:[#allocation2 + $0x79] sm:$0xff] %vm816_vm5, %v785_v2  ;;  %v609_v5 = vpop.f32.mrf.mxu0  ;;  %v1278_v11 = vmul.f32 %v3459_v20, %v3626_v8  ;;  %v3674_v21 = vld [vmem:[#allocation2 + $0x49] sm:$0xff] }
  0xf0   : > { %v1190_v10 = vadd.f32 %v1174_v62, %v1137_v59  ;;  %v1123_v12 = vmul.f32 %v3626_v8, %v3362_v57  ;;  %v1176_v16 = vmul.f32 %v3453_v18, %v3650_v4  ;;  %v610_v17 = vadd.f32 %v3278_v35, %v609_v5  ;;  %v3724_v58 = vld [vmem:[#allocation2 + $0x4a] sm:$0xff] }
  0xf1   : > { %v788_v56 = vsel %vm3637_vm11, %v615_v49, 0.0  ;;  %v1087_v23 = vadd.f32 %v1071_v9, %v1035_v3  ;;  %v1086_v22 = vadd.f32 %v1070_v14, %v1034_v1  ;;  %v2828_v28 = vpop.f32.mrf.mxu0  ;;  %v1228_v31 = vmul.f32 %v3456_v19, %v3674_v21 }
  0xf2   : > { %830 = vst.msk [vmem:[#allocation2 + $0x99] sm:$0xff] %vm816_vm5, %v788_v56  ;;  %v1242_v30 = vadd.f32 %v1226_v63, %v1190_v10  ;;  %v1175_v14 = vmul.f32 %v3453_v18, %v3652_v24  ;;  %v863_v32 = vmul.f32 %v3562_v13, %v3335_v50  ;;  %v787_v34 = vsel %vm3661_vm13, %v610_v17, 0.0  ;;  %v3769_v56 = vld [vmem:[#allocation2 + $0x50] sm:$0xff] }
  0xf3   : > { %v625_v37 = vadd.f32 %v2828_v28, %v3278_v35  ;;  %v1139_v38 = vadd.f32 %v1123_v12, %v1087_v23  ;;  %v1138_v40 = vadd.f32 %v3566_v15, %v1086_v22  ;;  %829 = vst.msk [vmem:[#allocation2 + $0x91] sm:$0xff] %vm816_vm5, %v787_v34  ;;  %v619_v44 = vpop.f32.mrf.mxu0  ;;  %v1227_v48 = vmul.f32 %v3456_v19, %v3676_v25 }
  0xf4   : > { %v1294_v45 = vadd.f32 %v1278_v11, %v1242_v30  ;;  %v931_v15 = vadd.f32 %v915_v46, %v863_v32  ;;  %v1020_v52 = vmul.f32 %v3652_v24, %v3393_v0  ;;  %v620_v54 = vadd.f32 %v3278_v35, %v619_v44 }
  0xf5   : > { %v790_v53 = vsel %vm3685_vm15, %v625_v37, 0.0  ;;  %v1192_v55 = vadd.f32 %v1176_v16, %v1139_v38  ;;  %v1191_v41 = vadd.f32 %v1175_v14, %v1138_v40  ;;  %v2831_v59 = vpop.f32.mrf.mxu0  ;;  %v1280_v63 = vmul.f32 %v3459_v20, %v3724_v58 }
  0xf6   : > { %832 = vst.msk [vmem:[#allocation2 + $0xb1] sm:$0xff] %vm816_vm5, %v790_v53  ;;  %v3738_v62 = vadd.f32 %v3701_v33, %v1294_v45  ;;  %v1279_v1 = vmul.f32 %v3459_v20, %v3704_v42  ;;  %v983_v2 = vadd.f32 %v3617_v47, %v931_v15  ;;  %v789_v49 = vsel %vm3713_vm7, %v620_v54, 0.0  ;;  %v3798_v45 = vld [vmem:[#allocation2 + $0x52] sm:$0xff] }
  0xf7   : > { %v635_v60 = vadd.f32 %v2831_v59, %v3278_v35  ;;  %v1244_v3 = vadd.f32 %v1228_v31, %v1192_v55  ;;  %v1243_v9 = vadd.f32 %v1227_v48, %v1191_v41  ;;  %831 = vst.msk [vmem:[#allocation2 + $0xa9] sm:$0xff] %vm816_vm5, %v789_v49  ;;  %v629_v5 = vpop.f32.mrf.mxu0  ;;  %v1072_v11 = vmul.f32 %v3676_v25, %v3338_v51  ;;  %v3785_v31 = vld [vmem:[#allocation2 + $0x51] sm:$0xff] }
  0xf8   : > { %v3760_v47 = vmul.f32 0.70710677, %v3738_v62  ;;  %v1036_v10 = vadd.f32 %v1020_v52, %v983_v2  ;;  %v1124_v12 = vmul.f32 %v3704_v42, %v3362_v57  ;;  %v630_v16 = vadd.f32 %v3278_v35, %v629_v5 }
  0xf9   : > { %v792_v27 = vsel %vm3733_vm2, %v635_v60, 0.0  ;;  %v1296_v26 = vadd.f32 %v1280_v63, %v1244_v3  ;;  %v1295_v61 = vadd.f32 %v1279_v1, %v1243_v9  ;;  %v1177_v22 = vmul.f32 %v3453_v18, %v3769_v56 }
  0xfa   : > { %834 = vst.msk [vmem:[#allocation2 + $0xc9] sm:$0xff] %vm816_vm5, %v792_v27  ;;  %v1365_v17 = vand.u32 2147483647, %v3760_v47  ;;  %v1088_v23 = vadd.f32 %v1072_v11, %v1036_v10  ;;  %v864_v28 = vmul.f32 %v3598_v7, %v3335_v50  ;;  %v791_v29 = vsel %vm3755_vm12, %v630_v16, 0.0  ;;  %v3815_v16 = vld [vmem:[#allocation2 + $0x60] sm:$0xff] }
  0xfb   : > { %v3780_v35 = vadd.f32 %v3701_v33, %v1296_v26  ;;  %v3783_v30 = vadd.f32 %v3701_v33, %v1295_v61  ;;  %v916_v14 = vmul.f32 %v3600_v36, %v3294_v39  ;;  %833 = vst.msk [vmem:[#allocation2 + $0xc1] sm:$0xff] %vm816_vm5, %v791_v29  ;;  %v1229_v7 = vmul.f32 %v3456_v19, %v3785_v31 }
  0xfc   : > { %v1381_v32 = vmul.f32 0.3275911, %v1365_v17  ;;  %v1573_v34 = vsub.f32 0.0, %v1365_v17  ;;  %v1140_v37 = vadd.f32 %v1124_v12, %v1088_v23  ;;  %v968_v36 = vmul.f32 %v3626_v8, %v3310_v43 }
  0xfd   : > { %v3793_v38 = vmul.f32 0.70710677, %v3780_v35  ;;  %v3796_v40 = vmul.f32 0.70710677, %v3783_v30  ;;  %v932_v48 = vadd.f32 %v916_v14, %v864_v28  ;;  %v1281_v53 = vmul.f32 %v3459_v20, %v3798_v45  ;;  %v3825_v28 = vld [vmem:[#allocation2 + $0x61] sm:$0xff] }
  0xfe   : > { %v1397_v44 = vadd.f32 1.0, %v1381_v32  ;;  %v1193_v13 = vadd.f32 %v1177_v22, %v1140_v37  ;;  %v1589_v54 = vmul.f32 %v1573_v34, %v1365_v17  ;;  %v1021_v49 = vmul.f32 %v3650_v4, %v3393_v0 }
  0xff   : > { %v1367_v15 = vand.u32 2147483647, %v3793_v38  ;;  %v1366_v52 = vand.u32 2147483647, %v3796_v40  ;;  %v984_v41 = vadd.f32 %v968_v36, %v932_v48  ;;  %v1073_v8 = vmul.f32 %v3674_v21, %v3338_v51 }
 0x100   : > { %2910 = vrcp.f32 %v1397_v44  ;;  %v1245_v55 = vadd.f32 %v1229_v7, %v1193_v13  ;;  %v1605_v6 = vmul.f32 1.442695, %v1589_v54  ;;  %v1125_v12 = vmul.f32 %v3724_v58, %v3362_v57  ;;  %v3834_v7 = vld [vmem:[#allocation2 + $0x62] sm:$0xff] }
 0x101   : > { %v1383_v59 = vmul.f32 0.3275911, %v1367_v15  ;;  %v1575_v46 = vsub.f32 0.0, %v1367_v15  ;;  %v1382_v63 = vmul.f32 0.3275911, %v1366_v52  ;;  %v1574_v1 = vsub.f32 0.0, %v1366_v52 }
 0x102   : > { %v1297_v2 = vadd.f32 %v1281_v53, %v1245_v55  ;;  %v1037_v11 = vadd.f32 %v1021_v49, %v984_v41  ;;  %v1178_v17 = vmul.f32 %v3453_v18, %v3815_v16  ;;  %v3823_v23 = vmul.f32 0.5, %v3738_v62 }
 0x103   : > { %v1399_v60 = vadd.f32 1.0, %v1383_v59  ;;  %v1591_v3 = vmul.f32 %v1575_v46, %v1367_v15  ;;  %v1398_v9 = vadd.f32 1.0, %v1382_v63  ;;  %v1590_v5 = vmul.f32 %v1574_v1, %v1366_v52 }
 0x104   : > { %v3811_v10 = vadd.f32 %v3701_v33, %v1297_v2  ;;  %v1089_v61 = vadd.f32 %v1073_v8, %v1037_v11  ;;  %v865_v29 = vmul.f32 %v3652_v24, %v3335_v50  ;;  %v917_v14 = vmul.f32 %v3676_v25, %v3294_v39 }
 0x105   : > { %2912 = vrcp.f32 %v1399_v60  ;;  %v1609_v27 = vmul.f32 1.442695, %v1591_v3  ;;  %v1607_v22 = vmul.f32 1.442695, %v1590_v5  ;;  %v1230_v37 = vmul.f32 %v3456_v19, %v3825_v28  ;;  %v3861_v60 = vld [vmem:[#allocation2 + $0x68] sm:$0xff] }
 0x106   : > { %2914 = vrcp.f32 %v1398_v9  ;;  %v3818_v26 = vmul.f32 0.70710677, %v3811_v10  ;;  %v1141_v34 = vadd.f32 %v1125_v12, %v1089_v61  ;;  %v933_v62 = vadd.f32 %v917_v14, %v865_v29  ;;  %v3865_v9 = vld [vmem:[#allocation2 + $0x69] sm:$0xff]  ;;  %v3880_v29 = vld [vmem:[#allocation2 + $0x78] sm:$0xff] }
 0x107   : > { %2916 = vpow2.f32 %v1605_v6  ;;  %v969_v44 = vmul.f32 %v3704_v42, %v3310_v43  ;;  %v1022_v24 = vmul.f32 %v3769_v56, %v3393_v0  ;;  %v1282_v36 = vmul.f32 %v3459_v20, %v3834_v7  ;;  %v3867_v5 = vld [vmem:[#allocation2 + $0x6a] sm:$0xff] }
 0x108   : > { %v1368_v32 = vand.u32 2147483647, %v3818_v26  ;;  %2918 = vpow2.f32 %v1609_v27  ;;  %v1194_v25 = vadd.f32 %v1178_v17, %v1141_v34  ;;  %v3843_v15 = vmul.f32 0.5, %v3780_v35 }
 0x109   : > { %2920 = vpow2.f32 %v1607_v22  ;;  %v985_v52 = vadd.f32 %v969_v44, %v933_v62  ;;  %v1074_v53 = vmul.f32 %v3785_v31, %v3338_v51  ;;  %v1126_v42 = vmul.f32 %v3798_v45, %v3362_v57  ;;  %v3892_v44 = vld [vmem:[#allocation2 + $0x79] sm:$0xff] }
 0x10a   : > { %v1384_v13 = vmul.f32 0.3275911, %v1368_v32  ;;  %v1576_v48 = vsub.f32 0.0, %v1368_v32  ;;  %v1246_v55 = vadd.f32 %v1230_v37, %v1194_v25  ;;  %v866_v41 = vmul.f32 %v3650_v4, %v3335_v50 }
 0x10b   : > { %v1038_v63 = vadd.f32 %v1022_v24, %v985_v52  ;;  %v918_v35 = vmul.f32 %v3674_v21, %v3294_v39  ;;  %v970_v1 = vmul.f32 %v3724_v58, %v3310_v43  ;;  %v3859_v49 = vmul.f32 0.5, %v3783_v30 }
 0x10c   : > { %v1400_v54 = vadd.f32 1.0, %v1384_v13  ;;  %v1592_v46 = vmul.f32 %v1576_v48, %v1368_v32  ;;  %v1298_v8 = vadd.f32 %v1282_v36, %v1246_v55  ;;  %v1179_v3 = vmul.f32 %v3453_v18, %v3861_v60 }
 0x10d   : > { %v3851_v59 = vpop.eup %2910  ;;  %v1090_v4 = vadd.f32 %v1074_v53, %v1038_v63  ;;  %v934_v21 = vadd.f32 %v918_v35, %v866_v41  ;;  %v1023_v58 = vmul.f32 %v3815_v16, %v3393_v0  ;;  %v1231_v11 = vmul.f32 %v3456_v19, %v3865_v9  ;;  %v3903_v35 = vld [vmem:[#allocation2 + $0x7a] sm:$0xff] }
 0x10e   : > { %v1429_v2 = vmul.f32 1.0614054, %v3851_v59  ;;  %2922 = vrcp.f32 %v1400_v54  ;;  %v3872_v30 = vadd.f32 %v3701_v33, %v1298_v8  ;;  %v1283_v12 = vmul.f32 %v3459_v20, %v3867_v5 }
 0x10f   : > { %v1611_v27 = vmul.f32 1.442695, %v1592_v46  ;;  %v1142_v61 = vadd.f32 %v1126_v42, %v1090_v4  ;;  %v986_v17 = vadd.f32 %v970_v1, %v934_v21  ;;  %v1075_v22 = vmul.f32 %v3825_v28, %v3338_v51 }
 0x110   : > { %v1445_v6 = vadd.f32 -1.4531521, %v1429_v2  ;;  %v3886_v34 = vmul.f32 0.70710677, %v3872_v30  ;;  %v1127_v37 = vmul.f32 %v3834_v7, %v3362_v57  ;;  %v1180_v62 = vmul.f32 %v3453_v18, %v3880_v29 }
 0x111   : > { %v1195_v48 = vadd.f32 %v1179_v3, %v1142_v61  ;;  %v1039_v25 = vadd.f32 %v1023_v58, %v986_v17  ;;  %v1232_v36 = vmul.f32 %v3456_v19, %v3892_v44  ;;  %v867_v55 = vmul.f32 %v3769_v56, %v3335_v50 }
 0x112   : > { %v3882_v14 = vpop.eup %2912  ;;  %v1461_v32 = vmul.f32 %v3851_v59, %v1445_v6  ;;  %v1369_v54 = vand.u32 2147483647, %v3886_v34  ;;  %v919_v1 = vmul.f32 %v3785_v31, %v3294_v39  ;;  %v1284_v21 = vmul.f32 %v3459_v20, %v3903_v35 }
 0x113   : > { %v3894_v24 = vpop.eup %2914  ;;  %v1431_v13 = vmul.f32 1.0614054, %v3882_v14  ;;  %v1247_v46 = vadd.f32 %v1231_v11, %v1195_v48  ;;  %v1091_v63 = vadd.f32 %v1075_v22, %v1039_v25  ;;  %v971_v11 = vmul.f32 %v3798_v45, %v3310_v43 }
 0x114   : > { %v1477_v52 = vadd.f32 1.4214138, %v1461_v32  ;;  %v1430_v53 = vmul.f32 1.0614054, %v3894_v24  ;;  %v2917_v42 = vpop.eup %2916  ;;  %v1385_v3 = vmul.f32 0.3275911, %v1369_v54 }
 0x115   : > { %v1447_v41 = vadd.f32 -1.4531521, %v1431_v13  ;;  %v3907_v2 = vpop.eup %2918  ;;  %v1299_v58 = vadd.f32 %v1283_v12, %v1247_v46  ;;  %v1143_v6 = vadd.f32 %v1127_v37, %v1091_v63  ;;  %v1577_v32 = vsub.f32 0.0, %v1369_v54 }
 0x116   : > { %v1493_v8 = vmul.f32 %v3851_v59, %v1477_v52  ;;  %v1446_v4 = vadd.f32 -1.4531521, %v1430_v53  ;;  %v3915_v61 = vpop.eup %2920  ;;  %v1401_v22 = vadd.f32 1.0, %v1385_v3  ;;  %v935_v52 = vadd.f32 %v919_v1, %v867_v55 }
 0x117   : > { %v1463_v56 = vmul.f32 %v3882_v14, %v1447_v41  ;;  %v3919_v48 = vadd.f32 %v3701_v33, %v1299_v58  ;;  %v1196_v25 = vadd.f32 %v1180_v62, %v1143_v6  ;;  %v3923_v37 = vmul.f32 0.5, %v3811_v10 }
 0x118   : > { %v1509_v17 = vadd.f32 -0.28449672, %v1493_v8  ;;  %v1462_v31 = vmul.f32 %v3894_v24, %v1446_v4  ;;  %2924 = vrcp.f32 %v1401_v22  ;;  %v1593_v1 = vmul.f32 %v1577_v32, %v1369_v54 }
 0x119   : > { %v1479_v13 = vadd.f32 1.4214138, %v1463_v56  ;;  %2926 = vpow2.f32 %v1611_v27  ;;  %v3929_v46 = vmul.f32 0.70710677, %v3919_v48  ;;  %v1248_v63 = vadd.f32 %v1232_v36, %v1196_v25 }
 0x11a   : > { %v1525_v53 = vmul.f32 %v3851_v59, %v1509_v17  ;;  %v1478_v12 = vadd.f32 1.4214138, %v1462_v31  ;;  %vm1669_vm3 = vcmp.ge.f32.partialorder %v3760_v47, 0.0  ;;  %v987_v56 = vadd.f32 %v971_v11, %v935_v52 }
 0x11b   : > { %v3925_v45 = vpop.eup %2922  ;;  %v1495_v41 = vmul.f32 %v3882_v14, %v1479_v13  ;;  %v1370_v4 = vand.u32 2147483647, %v3929_v46  ;;  %v1300_v3 = vadd.f32 %v1284_v21, %v1248_v63  ;;  %v1024_v36 = vmul.f32 %v3861_v60, %v3393_v0 }
 0x11c   : > { %v1541_v8 = vadd.f32 0.2548296, %v1525_v53  ;;  %v1494_v62 = vmul.f32 %v3894_v24, %v1478_v12  ;;  %v1432_v55 = vmul.f32 1.0614054, %v3925_v45  ;;  %v1613_v11 = vmul.f32 1.442695, %v1593_v1 }
 0x11d   : > { %v1511_v10 = vadd.f32 -0.28449672, %v1495_v41  ;;  %v1386_v31 = vmul.f32 0.3275911, %v1370_v4  ;;  %v1578_v22 = vsub.f32 0.0, %v1370_v4  ;;  %v3940_v54 = vadd.f32 %v3701_v33, %v1300_v3 }
 0x11e   : > { %v1557_v58 = vmul.f32 %v3851_v59, %v1541_v8  ;;  %v1510_v27 = vadd.f32 -0.28449672, %v1494_v62  ;;  %v1448_v6 = vadd.f32 -1.4531521, %v1432_v55  ;;  %v1040_v53 = vadd.f32 %v1024_v36, %v987_v56 }
 0x11f   : > { %v1527_v17 = vmul.f32 %v3882_v14, %v1511_v10  ;;  %v1402_v59 = vadd.f32 1.0, %v1386_v31  ;;  %v1594_v52 = vmul.f32 %v1578_v22, %v1370_v4  ;;  %vm1671_vm4 = vcmp.ge.f32.partialorder %v3793_v38, 0.0 }
 0x120   : > { %v1637_v32 = vmul.f32 %v2917_v42, %v1557_v58  ;;  %v1526_v13 = vmul.f32 %v3894_v24, %v1510_v27  ;;  %v1464_v21 = vmul.f32 %v3925_v45, %v1448_v6  ;;  %v1076_v8 = vmul.f32 %v3865_v9, %v3338_v51 }
 0x121   : > { %v1543_v25 = vadd.f32 0.2548296, %v1527_v17  ;;  %vm1670_vm14 = vcmp.ge.f32.partialorder %v3796_v40, 0.0  ;;  %2928 = vrcp.f32 %v1402_v59  ;;  %v1615_v42 = vmul.f32 1.442695, %v1594_v52 }
 0x122   : > { %v1653_v12 = vsub.f32 1.0, %v1637_v32  ;;  %v1542_v41 = vadd.f32 0.2548296, %v1526_v13  ;;  %v1480_v63 = vadd.f32 1.4214138, %v1464_v21  ;;  %v3955_v3 = vmul.f32 0.5, %v3872_v30 }
 0x123   : > { %v1559_v62 = vmul.f32 %v3882_v14, %v1543_v25  ;;  %v3950_v55 = vmul.f32 0.70710677, %v3940_v54  ;;  %2930 = vpow2.f32 %v1613_v11  ;;  %v1092_v58 = vadd.f32 %v1076_v8, %v1040_v53  ;;  %v3969_v32 = vld [vmem:[%s4741_s5] ss:$0 sm:$0xff] }
 0x124   : > { %v1685_v1 = vsub.f32 0.0, %v1653_v12  ;;  %v1558_v10 = vmul.f32 %v3894_v24, %v1542_v41  ;;  %v1496_v4 = vmul.f32 %v3925_v45, %v1480_v63  ;;  %v1128_v24 = vmul.f32 %v3867_v5, %v3362_v57  ;;  %v3976_v53 = vld [vmem:[#allocation2 + $0x80] sm:$0xff] }
 0x125   : > { %v1639_v56 = vmul.f32 %v3907_v2, %v1559_v62  ;;  %v1371_v14 = vand.u32 2147483647, %v3950_v55  ;;  %v3964_v17 = vpop.eup %2924  ;;  %2932 = vpow2.f32 %v1615_v42  ;;  %v1181_v8 = vmul.f32 %v3453_v18, %v3976_v53 }
 0x126   : > { %v1701_v27 = vsel %vm1669_vm3, %v1653_v12, %v1685_v1  ;;  %v1638_v6 = vmul.f32 %v3915_v61, %v1558_v10  ;;  %v1512_v36 = vadd.f32 -0.28449672, %v1496_v4  ;;  %v2927_v2 = vpop.eup %2926  ;;  %v1433_v61 = vmul.f32 1.0614054, %v3964_v17 }
 0x127   : > { %v1717_v31 = vadd.f32 1.0, %v1701_v27  ;;  %v1655_v30 = vsub.f32 1.0, %v1639_v56  ;;  %v1387_v22 = vmul.f32 0.3275911, %v1371_v14  ;;  %v1579_v21 = vsub.f32 0.0, %v1371_v14 }
 0x128   : > { %v1654_v47 = vsub.f32 1.0, %v1638_v6  ;;  %v1528_v13 = vmul.f32 %v3925_v45, %v1512_v36  ;;  %v1144_v52 = vadd.f32 %v1128_v24, %v1092_v58  ;;  %v1449_v63 = vadd.f32 -1.4531521, %v1433_v61  ;;  %v3993_v36 = vld [vmem:[#allocation2 + $0x81] sm:$0xff] }
 0x129   : > { %v3974_v11 = vmul.f32 %v1717_v31, %v3823_v23  ;;  %v1687_v25 = vsub.f32 0.0, %v1655_v30  ;;  %v1403_v59 = vadd.f32 1.0, %v1387_v22  ;;  %vm1672_vm1 = vcmp.ge.f32.partialorder %v3818_v26, 0.0 }
 0x12a   : > { %v1686_v12 = vsub.f32 0.0, %v1654_v47  ;;  %v1544_v41 = vadd.f32 0.2548296, %v1528_v13  ;;  %v3986_v23 = vmul.f32 0.5, %v3919_v48  ;;  %v1465_v56 = vmul.f32 %v3964_v17, %v1449_v63 }
 0x12b   : > { %v1756_v62 = vmul.f32 %v3969_v32, %v3974_v11  ;;  %v1703_v42 = vsel %vm1671_vm4, %v1655_v30, %v1687_v25  ;;  %2934 = vrcp.f32 %v1403_v59  ;;  %v1595_v6 = vmul.f32 %v1579_v21, %v1371_v14  ;;  %v4000_v30 = vld [vmem:[#allocation2 + $0x82] sm:$0xff] }
 0x12c   : > { %v1719_v1 = vadd.f32 1.0, %v1703_v42  ;;  %v1702_v10 = vsel %vm1670_vm14, %v1654_v47, %v1686_v12  ;;  %v1560_v4 = vmul.f32 %v3925_v45, %v1544_v41  ;;  %v1197_v38 = vadd.f32 %v1181_v8, %v1144_v52 }
 0x12d   : > { %v1772_v58 = vsel %vm816_vm5, %v1756_v62, 0.0  ;;  %v1718_v27 = vadd.f32 1.0, %v1702_v10  ;;  %v1481_v31 = vadd.f32 1.4214138, %v1465_v56  ;;  %v1233_v40 = vmul.f32 %v3456_v19, %v3993_v36 }
 0x12e   : > { %1773 = vadd.xlane.f32.xlu0 %v1772_v58  ;;  %v3996_v48 = vmul.f32 %v1719_v1, %v3843_v15  ;;  %v1640_v24 = vmul.f32 %v2927_v2, %v1560_v4  ;;  %v1285_v14 = vmul.f32 %v3459_v20, %v4000_v30  ;;  %v868_v22 = vmul.f32 %v3815_v16, %v3335_v50  ;;  %v4011_v47 = vpop.eup %2928 }
 0x12f   : > { %v4003_v45 = vmul.f32 %v1718_v27, %v3859_v49  ;;  %v920_v15 = vmul.f32 %v3825_v28, %v3294_v39  ;;  %v1497_v61 = vmul.f32 %v3964_v17, %v1481_v31  ;;  %v1249_v21 = vadd.f32 %v1233_v40, %v1197_v38  ;;  %v4038_v40 = vld [vmem:[#allocation2 + $0x90] sm:$0xff] }
 0x130   : > { %v1758_v2 = vmul.f32 %v3969_v32, %v3996_v48  ;;  %v1656_v13 = vsub.f32 1.0, %v1640_v24  ;;  %v1434_v25 = vmul.f32 1.0614054, %v4011_v47  ;;  %v972_v16 = vmul.f32 %v3834_v7, %v3310_v43  ;;  %v2931_v52 = vpop.eup %2930 }
 0x131   : > { %v1757_v49 = vmul.f32 %v3969_v32, %v4003_v45  ;;  %v936_v59 = vadd.f32 %v920_v15, %v868_v22  ;;  %v1513_v41 = vadd.f32 -0.28449672, %v1497_v61  ;;  %v1301_v63 = vadd.f32 %v1285_v14, %v1249_v21  ;;  %v4049_v21 = vld [vmem:[#allocation2 + $0x91] sm:$0xff] }
 0x132   : > { %v1778_v28 = vsel %vm816_vm5, %v1758_v2, 0.0  ;;  %v1688_v12 = vsub.f32 0.0, %v1656_v13  ;;  %v1450_v62 = vadd.f32 -1.4531521, %v1434_v25  ;;  %v1025_v1 = vmul.f32 %v3880_v29, %v3393_v0  ;;  %v4025_v10 = vpop.eup %2932 }
 0x133   : > { %1779 = vadd.xlane.f32.xlu1 %v1778_v28  ;;  %v1775_v8 = vsel %vm816_vm5, %v1757_v49, 0.0  ;;  %v988_v42 = vadd.f32 %v972_v16, %v936_v59  ;;  %v1529_v4 = vmul.f32 %v3964_v17, %v1513_v41  ;;  %v4031_v56 = vadd.f32 %v3701_v33, %v1301_v63  ;;  %v4051_v49 = vld [vmem:[#allocation2 + $0x92] sm:$0xff] }
 0x134   : > { %1776 = vadd.xlane.f32.xlu0 %v1775_v8  ;;  %v1704_v7 = vsel %vm1672_vm1, %v1656_v13, %v1688_v12  ;;  %v1077_v58 = vmul.f32 %v3892_v44, %v3338_v51  ;;  %v1466_v38 = vmul.f32 %v4011_v47, %v1450_v62  ;;  %v1129_v31 = vmul.f32 %v3903_v35, %v3362_v57 }
 0x135   : > { %v1720_v27 = vadd.f32 1.0, %v1704_v7  ;;  %v1041_v24 = vadd.f32 %v1025_v1, %v988_v42  ;;  %v1545_v14 = vadd.f32 0.2548296, %v1529_v4  ;;  %v1617_v26 = vmul.f32 1.442695, %v1595_v6 }
 0x136   : > { %v4041_v22 = vmul.f32 0.70710677, %v4031_v56  ;;  %vm1673_vm0 = vcmp.ge.f32.partialorder %v3886_v34, 0.0  ;;  %v1482_v2 = vadd.f32 1.4214138, %v1466_v38  ;;  %v1182_v61 = vmul.f32 %v3453_v18, %v4038_v40 }
 0x137   : > { %v4044_v15 = vmul.f32 %v1720_v27, %v3923_v37  ;;  %v1093_v13 = vadd.f32 %v1077_v58, %v1041_v24  ;;  %v1561_v6 = vmul.f32 %v3964_v17, %v1545_v14  ;;  %v1234_v37 = vmul.f32 %v3456_v19, %v4049_v21 }
 0x138   : > { %v4053_v25 = vpop.eup %2934  ;;  %v1372_v59 = vand.u32 2147483647, %v4041_v22  ;;  %v1286_v16 = vmul.f32 %v3459_v20, %v4051_v49  ;;  %v1498_v12 = vmul.f32 %v4011_v47, %v1482_v2  ;;  %v869_v17 = vmul.f32 %v3861_v60, %v3335_v50 }
 0x139   : > { %v1759_v28 = vmul.f32 %v3969_v32, %v4044_v15  ;;  %v1435_v41 = vmul.f32 1.0614054, %v4053_v25  ;;  %v1145_v63 = vadd.f32 %v1129_v31, %v1093_v13  ;;  %v1641_v8 = vmul.f32 %v2931_v52, %v1561_v6 }
 0x13a   : > { %v1388_v62 = vmul.f32 0.3275911, %v1372_v59  ;;  %v1580_v42 = vsub.f32 0.0, %v1372_v59  ;;  %v1514_v7 = vadd.f32 -0.28449672, %v1498_v12  ;;  %2936 = vpow2.f32 %v1617_v26 }
 0x13b   : > { %v1781_v1 = vsel %vm816_vm5, %v1759_v28, 0.0  ;;  %v1451_v4 = vadd.f32 -1.4531521, %v1435_v41  ;;  %v1198_v58 = vadd.f32 %v1182_v61, %v1145_v63  ;;  %v1657_v27 = vsub.f32 1.0, %v1641_v8 }
 0x13c   : > { %1782 = vadd.xlane.f32.xlu1 %v1781_v1  ;;  %v1404_v38 = vadd.f32 1.0, %v1388_v62  ;;  %v921_v24 = vmul.f32 %v3865_v9, %v3294_v39  ;;  %v1530_v31 = vmul.f32 %v4011_v47, %v1514_v7  ;;  %v973_v60 = vmul.f32 %v3867_v5, %v3310_v43 }
 0x13d   : > { %v1467_v52 = vmul.f32 %v4053_v25, %v1451_v4  ;;  %v1250_v14 = vadd.f32 %v1234_v37, %v1198_v58  ;;  %v1689_v2 = vsub.f32 0.0, %v1657_v27  ;;  %v1596_v13 = vmul.f32 %v1580_v42, %v1372_v59  ;;  %v4099_v58 = vld [vmem:[#allocation2 + $0x99] sm:$0xff] }
 0x13e   : > { %2938 = vrcp.f32 %v1404_v38  ;;  %v937_v6 = vadd.f32 %v921_v24, %v869_v17  ;;  %v1546_v61 = vadd.f32 0.2548296, %v1530_v31  ;;  %v1026_v26 = vmul.f32 %v3976_v53, %v3393_v0  ;;  %v4091_v17 = vld [vmem:[#allocation2 + $0x98] sm:$0xff] }
 0x13f   : > { %v1483_v28 = vadd.f32 1.4214138, %v1467_v52  ;;  %v1302_v12 = vadd.f32 %v1286_v16, %v1250_v14  ;;  %v1705_v9 = vsel %vm1673_vm0, %v1657_v27, %v1689_v2  ;;  %vm1674_vm8 = vcmp.ge.f32.partialorder %v3929_v46, 0.0  ;;  %v4111_v52 = vld [vmem:[#allocation2 + $0x9a] sm:$0xff] }
 0x140   : > { %v989_v41 = vadd.f32 %v973_v60, %v937_v6  ;;  %v1078_v37 = vmul.f32 %v3993_v36, %v3338_v51  ;;  %v1721_v5 = vadd.f32 1.0, %v1705_v9  ;;  %v1562_v63 = vmul.f32 %v4011_v47, %v1546_v61 }
 0x141   : > { %v1499_v59 = vmul.f32 %v4053_v25, %v1483_v28  ;;  %v4084_v8 = vadd.f32 %v3701_v33, %v1302_v12  ;;  %v4087_v16 = vmul.f32 0.5, %v3940_v54  ;;  %v1619_v62 = vmul.f32 1.442695, %v1596_v13 }
 0x142   : > { %v1042_v34 = vadd.f32 %v1026_v26, %v989_v41  ;;  %v1130_v42 = vmul.f32 %v4000_v30, %v3362_v57  ;;  %v4094_v1 = vmul.f32 %v1721_v5, %v3955_v3  ;;  %v1642_v47 = vmul.f32 %v4025_v10, %v1562_v63 }
 0x143   : > { %v1515_v7 = vadd.f32 -0.28449672, %v1499_v59  ;;  %v1183_v4 = vmul.f32 %v3453_v18, %v4091_v17  ;;  %v4102_v54 = vmul.f32 0.70710677, %v4084_v8  ;;  %v1235_v38 = vmul.f32 %v3456_v19, %v4099_v58 }
 0x144   : > { %v1094_v27 = vadd.f32 %v1078_v37, %v1042_v34  ;;  %v870_v24 = vmul.f32 %v3880_v29, %v3335_v50  ;;  %v1760_v3 = vmul.f32 %v3969_v32, %v4094_v1  ;;  %v1658_v10 = vsub.f32 1.0, %v1642_v47 }
 0x145   : > { %v1531_v31 = vmul.f32 %v4053_v25, %v1515_v7  ;;  %v922_v14 = vmul.f32 %v3892_v44, %v3294_v39  ;;  %v1373_v60 = vand.u32 2147483647, %v4102_v54  ;;  %v1287_v13 = vmul.f32 %v3459_v20, %v4111_v52 }
 0x146   : > { %v1146_v2 = vadd.f32 %v1130_v42, %v1094_v27  ;;  %v974_v29 = vmul.f32 %v3903_v35, %v3310_v43  ;;  %v1784_v6 = vsel %vm816_vm5, %v1760_v3, 0.0  ;;  %v1690_v61 = vsub.f32 0.0, %v1658_v10 }
 0x147   : > { %v1547_v28 = vadd.f32 0.2548296, %v1531_v31  ;;  %v938_v12 = vadd.f32 %v922_v14, %v870_v24  ;;  %1785 = vadd.xlane.f32.xlu0 %v1784_v6  ;;  %v1389_v26 = vmul.f32 0.3275911, %v1373_v60  ;;  %v1581_v9 = vsub.f32 0.0, %v1373_v60  ;;  %v2937_v37 = vpop.eup %2936 }
 0x148   : > { %v1199_v41 = vadd.f32 %v1183_v4, %v1146_v2  ;;  %v1027_v44 = vmul.f32 %v4038_v40, %v3393_v0  ;;  %v1706_v5 = vsel %vm1674_vm8, %v1658_v10, %v1690_v61  ;;  %v1079_v35 = vmul.f32 %v4049_v21, %v3338_v51  ;;  %v4137_v10 = vld [vmem:[#allocation2 + $0xa8] sm:$0xff] }
 0x149   : > { %v1563_v63 = vmul.f32 %v4053_v25, %v1547_v28  ;;  %v990_v59 = vadd.f32 %v974_v29, %v938_v12  ;;  %v1722_v34 = vadd.f32 1.0, %v1706_v5  ;;  %v1405_v42 = vadd.f32 1.0, %v1389_v26 }
 0x14a   : > { %v1597_v47 = vmul.f32 %v1581_v9, %v1373_v60  ;;  %v1251_v7 = vadd.f32 %v1235_v38, %v1199_v41  ;;  %2940 = vpow2.f32 %v1619_v62  ;;  %v1131_v3 = vmul.f32 %v4051_v49, %v3362_v57  ;;  %v4141_v60 = vld [vmem:[#allocation2 + $0xa9] sm:$0xff] }
 0x14b   : > { %v4128_v27 = vpop.eup %2938  ;;  %v1643_v4 = vmul.f32 %v2937_v37, %v1563_v63  ;;  %v1043_v24 = vadd.f32 %v1027_v44, %v990_v59  ;;  %v4133_v46 = vmul.f32 %v1722_v34, %v3986_v23  ;;  %vm1675_vm9 = vcmp.ge.f32.partialorder %v3950_v55, 0.0  ;;  %v4154_v41 = vld [vmem:[#allocation2 + $0xaa] sm:$0xff] }
 0x14c   : > { %v1436_v25 = vmul.f32 1.0614054, %v4128_v27  ;;  %2942 = vrcp.f32 %v1405_v42  ;;  %v1303_v38 = vadd.f32 %v1287_v13, %v1251_v7  ;;  %v1184_v62 = vmul.f32 %v3453_v18, %v4137_v10 }
 0x14d   : > { %v1659_v31 = vsub.f32 1.0, %v1643_v4  ;;  %v1095_v14 = vadd.f32 %v1079_v35, %v1043_v24  ;;  %v1761_v2 = vmul.f32 %v3969_v32, %v4133_v46  ;;  %v1621_v29 = vmul.f32 1.442695, %v1597_v47 }
 0x14e   : > { %v1452_v23 = vadd.f32 -1.4531521, %v1436_v25  ;;  %v1236_v6 = vmul.f32 %v3456_v19, %v4141_v60  ;;  %v4148_v28 = vadd.f32 %v3701_v33, %v1303_v38  ;;  %v871_v13 = vmul.f32 %v3976_v53, %v3335_v50 }
 0x14f   : > { %v1691_v61 = vsub.f32 0.0, %v1659_v31  ;;  %v1147_v12 = vadd.f32 %v1131_v3, %v1095_v14  ;;  %v1787_v26 = vsel %vm816_vm5, %v1761_v2, 0.0  ;;  %v923_v44 = vmul.f32 %v3993_v36, %v3294_v39  ;;  %v4180_v2 = vld [vmem:[#allocation2 + $0xb0] sm:$0xff] }
 0x150   : > { %v1468_v9 = vmul.f32 %v4128_v27, %v1452_v23  ;;  %v975_v37 = vmul.f32 %v4000_v30, %v3310_v43  ;;  %1788 = vadd.xlane.f32.xlu1 %v1787_v26  ;;  %v4163_v63 = vmul.f32 0.70710677, %v4148_v28  ;;  %v1288_v59 = vmul.f32 %v3459_v20, %v4154_v41 }
 0x151   : > { %v1707_v5 = vsel %vm1675_vm9, %v1659_v31, %v1691_v61  ;;  %v1200_v53 = vadd.f32 %v1184_v62, %v1147_v12  ;;  %v939_v42 = vadd.f32 %v923_v44, %v871_v13  ;;  %v1028_v36 = vmul.f32 %v4091_v17, %v3393_v0 }
 0x152   : > { %v1723_v35 = vadd.f32 1.0, %v1707_v5  ;;  %v1484_v34 = vadd.f32 1.4214138, %v1468_v9  ;;  %v1374_v47 = vand.u32 2147483647, %v4163_v63  ;;  %v1080_v24 = vmul.f32 %v4099_v58, %v3338_v51  ;;  %v4189_v9 = vld [vmem:[#allocation2 + $0xb1] sm:$0xff] }
 0x153   : > { %v1252_v30 = vadd.f32 %v1236_v6, %v1200_v53  ;;  %v991_v4 = vadd.f32 %v975_v37, %v939_v42  ;;  %2944 = vpow2.f32 %v1621_v29  ;;  %v1132_v62 = vmul.f32 %v4111_v52, %v3362_v57  ;;  %v4201_v42 = vld [vmem:[#allocation2 + $0xb2] sm:$0xff] }
 0x154   : > { %v4171_v7 = vmul.f32 %v1723_v35, %v4087_v16  ;;  %v1500_v55 = vmul.f32 %v4128_v27, %v1484_v34  ;;  %v1390_v3 = vmul.f32 0.3275911, %v1374_v47  ;;  %v1582_v23 = vsub.f32 0.0, %v1374_v47 }
 0x155   : > { %v1304_v25 = vadd.f32 %v1288_v59, %v1252_v30  ;;  %v1044_v14 = vadd.f32 %v1028_v36, %v991_v4  ;;  %v1185_v29 = vmul.f32 %v3453_v18, %v4180_v2  ;;  %v872_v44 = vmul.f32 %v4038_v40, %v3335_v50 }
 0x156   : > { %v1762_v31 = vmul.f32 %v3969_v32, %v4171_v7  ;;  %v1516_v38 = vadd.f32 -0.28449672, %v1500_v55  ;;  %v1406_v16 = vadd.f32 1.0, %v1390_v3  ;;  %v1237_v53 = vmul.f32 %v3456_v19, %v4189_v9 }
 0x157   : > { %v4183_v6 = vadd.f32 %v3701_v33, %v1304_v25  ;;  %v2941_v61 = vpop.eup %2940  ;;  %v1096_v26 = vadd.f32 %v1080_v24, %v1044_v14  ;;  %v924_v36 = vmul.f32 %v4049_v21, %v3294_v39  ;;  %v1598_v40 = vmul.f32 %v1582_v23, %v1374_v47 }
 0x158   : > { %v1790_v12 = vsel %vm816_vm5, %v1762_v31, 0.0  ;;  %v1532_v13 = vmul.f32 %v4128_v27, %v1516_v38  ;;  %2946 = vrcp.f32 %v1406_v16  ;;  %v1289_v55 = vmul.f32 %v3459_v20, %v4201_v42 }
 0x159   : > { %v4193_v37 = vpop.eup %2942  ;;  %1791 = vadd.xlane.f32.xlu0 %v1790_v12  ;;  %v4196_v5 = vmul.f32 0.70710677, %v4183_v6  ;;  %v1148_v34 = vadd.f32 %v1132_v62, %v1096_v26  ;;  %v976_v4 = vmul.f32 %v4051_v49, %v3310_v43  ;;  %v940_v31 = vadd.f32 %v924_v36, %v872_v44 }
 0x15a   : > { %v1548_v59 = vadd.f32 0.2548296, %v1532_v13  ;;  %v1437_v35 = vmul.f32 1.0614054, %v4193_v37  ;;  %v1029_v62 = vmul.f32 %v4137_v10, %v3393_v0  ;;  %v1081_v21 = vmul.f32 %v4141_v60, %v3338_v51 }
 0x15b   : > { %v1375_v30 = vand.u32 2147483647, %v4196_v5  ;;  %v1201_v25 = vadd.f32 %v1185_v29, %v1148_v34  ;;  %v992_v12 = vadd.f32 %v976_v4, %v940_v31  ;;  %v1340_v49 = vmul.f32 0.5, %v4031_v56 }
 0x15c   : > { %v1564_v24 = vmul.f32 %v4128_v27, %v1548_v59  ;;  %v1453_v3 = vadd.f32 -1.4531521, %v1437_v35  ;;  %vm1676_vm6 = vcmp.ge.f32.partialorder %v4041_v22, 0.0  ;;  %v1623_v59 = vmul.f32 1.442695, %v1598_v40 }
 0x15d   : > { %v1391_v38 = vmul.f32 0.3275911, %v1375_v30  ;;  %v1583_v14 = vsub.f32 0.0, %v1375_v30  ;;  %v1253_v23 = vadd.f32 %v1237_v53, %v1201_v25  ;;  %v1045_v44 = vadd.f32 %v1029_v62, %v992_v12 }
 0x15e   : > { %v1644_v47 = vmul.f32 %v2941_v61, %v1564_v24  ;;  %v1469_v16 = vmul.f32 %v4193_v37, %v1453_v3  ;;  %v1133_v34 = vmul.f32 %v4154_v41, %v3362_v57  ;;  %v4224_v24 = vld [vmem:[#allocation2 + $0xc0] sm:$0xff]  ;;  %v873_v40 = vmul.f32 %v4091_v17, %v3335_v50 }
 0x15f   : > { %v1407_v27 = vadd.f32 1.0, %v1391_v38  ;;  %v1305_v26 = vadd.f32 %v1289_v55, %v1253_v23  ;;  %v1599_v35 = vmul.f32 %v1583_v14, %v1375_v30  ;;  %v1097_v56 = vadd.f32 %v1081_v21, %v1045_v44  ;;  %v4228_v3 = vld [vmem:[#allocation2 + $0xc1] sm:$0xff] }
 0x160   : > { %v1660_v29 = vsub.f32 1.0, %v1644_v47  ;;  %v1485_v13 = vadd.f32 1.4214138, %v1469_v16  ;;  %v2945_v61 = vpop.eup %2944  ;;  %v1186_v55 = vmul.f32 %v3453_v18, %v4224_v24  ;;  %v925_v30 = vmul.f32 %v4099_v58, %v3294_v39  ;;  %v4243_v47 = vld [vmem:[#allocation2 + $0xc2] sm:$0xff] }
 0x161   : > { %2948 = vrcp.f32 %v1407_v27  ;;  %v4222_v4 = vadd.f32 %v3701_v33, %v1305_v26  ;;  %v977_v25 = vmul.f32 %v4111_v52, %v3310_v43  ;;  %v1238_v14 = vmul.f32 %v3456_v19, %v4228_v3 }
 0x162   : > { %v1692_v36 = vsub.f32 0.0, %v1660_v29  ;;  %v1501_v53 = vmul.f32 %v4193_v37, %v1485_v13  ;;  %v1149_v21 = vadd.f32 %v1133_v34, %v1097_v56  ;;  %v941_v17 = vadd.f32 %v925_v30, %v873_v40 }
 0x163   : > { %v4239_v38 = vmul.f32 0.70710677, %v4222_v4  ;;  %v1030_v58 = vmul.f32 %v4180_v2, %v3393_v0  ;;  %v1290_v23 = vmul.f32 %v3459_v20, %v4243_v47  ;;  %v1082_v12 = vmul.f32 %v4189_v9, %v3338_v51 }
 0x164   : > { %v1708_v33 = vsel %vm1676_vm6, %v1660_v29, %v1692_v36  ;;  %v1517_v31 = vadd.f32 -0.28449672, %v1501_v53  ;;  %v1202_v13 = vadd.f32 %v1186_v55, %v1149_v21  ;;  %v993_v26 = vadd.f32 %v977_v25, %v941_v17  ;;  %v4269_v17 = vld [vmem:[#allocation2 + $0xc8] sm:$0xff] }
 0x165   : > { %v1724_v62 = vadd.f32 1.0, %v1708_v33  ;;  %v4247_v16 = vpop.eup %2946  ;;  %v4251_v52 = vand.u32 2147483647, %v4239_v38  ;;  %v1625_v34 = vmul.f32 1.442695, %v1599_v35  ;;  %v1134_v53 = vmul.f32 %v4201_v42, %v3362_v57 }
 0x166   : > { %v1533_v22 = vmul.f32 %v4193_v37, %v1517_v31  ;;  %v1438_v29 = vmul.f32 1.0614054, %v4247_v16  ;;  %v1254_v30 = vadd.f32 %v1238_v14, %v1202_v13  ;;  %v1046_v33 = vadd.f32 %v1030_v58, %v993_v26  ;;  %v4288_v13 = vld [vmem:[#allocation2 + $0xca] sm:$0xff] }
 0x167   : > { %v4257_v27 = vmul.f32 %v1724_v62, %v1340_v49  ;;  %v1392_v36 = vmul.f32 0.3275911, %v4251_v52  ;;  %v1341_v49 = vmul.f32 0.5, %v4084_v8  ;;  %2950 = vpow2.f32 %v1623_v59 }
 0x168   : > { %v1549_v44 = vadd.f32 0.2548296, %v1533_v22  ;;  %v1454_v40 = vadd.f32 -1.4531521, %v1438_v29  ;;  %v1306_v62 = vadd.f32 %v1290_v23, %v1254_v30  ;;  %v1098_v21 = vadd.f32 %v1082_v12, %v1046_v33  ;;  %v4282_v23 = vld [vmem:[#allocation2 + $0xc9] sm:$0xff] }
 0x169   : > { %v1763_v56 = vmul.f32 %v3969_v32, %v4257_v27  ;;  %v1408_v55 = vadd.f32 1.0, %v1392_v36  ;;  %vm1677_vm10 = vcmp.ge.f32.partialorder %v4102_v54, 0.0  ;;  %v1187_v8 = vmul.f32 %v3453_v18, %v4269_v17 }
 0x16a   : > { %v1565_v31 = vmul.f32 %v4193_v37, %v1549_v44  ;;  %v1470_v35 = vmul.f32 %v4247_v16, %v1454_v40  ;;  %v4277_v37 = vld [vmem:[%s4740_s4] ss:$0 sm:$0xff]  ;;  %v1150_v58 = vadd.f32 %v1134_v53, %v1098_v21  ;;  %v1239_v29 = vmul.f32 %v3456_v19, %v4282_v23 }
 0x16b   : > { %v1793_v25 = vsel %vm816_vm5, %v1763_v56, 0.0  ;;  %2952 = vrcp.f32 %v1408_v55  ;;  %v4280_v59 = vadd.f32 %v4277_v37, %v1306_v62  ;;  %v874_v26 = vmul.f32 %v4137_v10, %v3335_v50 }
 0x16c   : > { %1794 = vadd.xlane.f32.xlu1 %v1793_v25  ;;  %v1645_v22 = vmul.f32 %v2945_v61, %v1565_v31  ;;  %v1486_v14 = vadd.f32 1.4214138, %v1470_v35  ;;  %2954 = vpow2.f32 %v1625_v34  ;;  %v926_v44 = vmul.f32 %v4141_v60, %v3294_v39 }
 0x16d   : > { %v4297_v53 = vmul.f32 0.70710677, %v4280_v59  ;;  %v1291_v56 = vmul.f32 %v3459_v20, %v4288_v13  ;;  %v1203_v30 = vadd.f32 %v1187_v8, %v1150_v58  ;;  %v978_v31 = vmul.f32 %v4154_v41, %v3310_v43 }
 0x16e   : > { %v4284_v61 = vpop.eup %2948  ;;  %v1661_v12 = vsub.f32 1.0, %v1645_v22  ;;  %v1502_v34 = vmul.f32 %v4247_v16, %v1486_v14  ;;  %v942_v33 = vadd.f32 %v926_v44, %v874_v26  ;;  %v1031_v25 = vmul.f32 %v4224_v24, %v3393_v0 }
 0x16f   : > { %v1439_v36 = vmul.f32 1.0614054, %v4284_v61  ;;  %v4304_v60 = vand.u32 2147483647, %v4297_v53  ;;  %v1584_v62 = vsub.f32 0.0, %v4251_v52  ;;  %v1255_v21 = vadd.f32 %v1239_v29, %v1203_v30 }
 0x170   : > { %v1693_v40 = vsub.f32 0.0, %v1661_v12  ;;  %v1518_v10 = vadd.f32 -0.28449672, %v1502_v34  ;;  %v994_v22 = vadd.f32 %v978_v31, %v942_v33  ;;  %v1083_v34 = vmul.f32 %v4228_v3, %v3338_v51  ;;  %v1168_v31 = vld [vmem:[#allocation2 + $0xd8] sm:$0xff] }
 0x171   : > { %v1455_v55 = vadd.f32 -1.4531521, %v1439_v36  ;;  %v1393_v58 = vmul.f32 0.3275911, %v4304_v60  ;;  %v1307_v26 = vadd.f32 %v1291_v56, %v1255_v21  ;;  %v1600_v29 = vmul.f32 %v1584_v62, %v4251_v52 }
 0x172   : > { %v1709_v35 = vsel %vm1677_vm10, %v1661_v12, %v1693_v40  ;;  %v1534_v14 = vmul.f32 %v4247_v16, %v1518_v10  ;;  %v1047_v44 = vadd.f32 %v1031_v25, %v994_v22  ;;  %v1135_v33 = vmul.f32 %v4243_v47, %v3362_v57 }
 0x173   : > { %v1725_v8 = vadd.f32 1.0, %v1709_v35  ;;  %v1471_v41 = vmul.f32 %v4284_v61, %v1455_v55  ;;  %v1409_v36 = vadd.f32 1.0, %v1393_v58  ;;  %v4320_v40 = vadd.f32 %v4277_v37, %v1307_v26  ;;  %v1220_v35 = vld [vmem:[#allocation2 + $0xd9] sm:$0xff] }
 0x174   : > { %v1550_v54 = vadd.f32 0.2548296, %v1534_v14  ;;  %v1099_v30 = vadd.f32 %v1083_v34, %v1047_v44  ;;  %v2951_v56 = vpop.eup %2950  ;;  %v1342_v55 = vmul.f32 0.5, %v4148_v28  ;;  %vm1678_vm11 = vcmp.ge.f32.partialorder %v4163_v63, 0.0 }
 0x175   : > { %v4316_v24 = vmul.f32 %v1725_v8, %v1341_v49  ;;  %v1487_v12 = vadd.f32 1.4214138, %v1471_v41  ;;  %2956 = vrcp.f32 %v1409_v36  ;;  %v4331_v52 = vmul.f32 0.70710677, %v4320_v40  ;;  %v1272_v8 = vld [vmem:[#allocation2 + $0xda] sm:$0xff] }
 0x176   : > { %v1566_v3 = vmul.f32 %v4247_v16, %v1550_v54  ;;  %v1151_v25 = vadd.f32 %v1135_v33, %v1099_v30  ;;  %v1188_v16 = vmul.f32 %v3453_v18, %v1168_v31  ;;  %v1627_v41 = vmul.f32 1.442695, %v1600_v29 }
 0x177   : > { %v1764_v10 = vmul.f32 %v3969_v32, %v4316_v24  ;;  %v1503_v49 = vmul.f32 %v4284_v61, %v1487_v12  ;;  %v1378_v58 = vand.u32 2147483647, %v4331_v52  ;;  %v1240_v54 = vmul.f32 %v3456_v19, %v1220_v35 }
 0x178   : > { %v4333_v47 = vpop.eup %2952  ;;  %v1646_v21 = vmul.f32 %v2951_v56, %v1566_v3  ;;  %v1204_v34 = vadd.f32 %v1188_v16, %v1151_v25  ;;  %v1585_v36 = vsub.f32 0.0, %v4304_v60  ;;  %v1292_v33 = vmul.f32 %v3459_v20, %v1272_v8 }
 0x179   : > { %v1796_v62 = vsel %vm816_vm5, %v1764_v10, 0.0  ;;  %v1519_v22 = vadd.f32 -0.28449672, %v1503_v49  ;;  %v2955_v14 = vpop.eup %2954  ;;  %v1440_v28 = vmul.f32 1.0614054, %v4333_v47  ;;  %v875_v29 = vmul.f32 %v4180_v2, %v3335_v50 }
 0x17a   : > { %1797 = vadd.xlane.f32.xlu0 %v1796_v62  ;;  %v1662_v26 = vsub.f32 1.0, %v1646_v21  ;;  %v1394_v30 = vmul.f32 0.3275911, %v1378_v58  ;;  %v1256_v10 = vadd.f32 %v1240_v54, %v1204_v34  ;;  %2958 = vpow2.f32 %v1627_v41  ;;  %v1169_v34 = vld [vmem:[#allocation2 + $0xe0] sm:$0xff] }
 0x17b   : > { %v1535_v44 = vmul.f32 %v4284_v61, %v1519_v22  ;;  %v1456_v12 = vadd.f32 -1.4531521, %v1440_v28  ;;  %v927_v25 = vmul.f32 %v4189_v9, %v3294_v39  ;;  %v979_v22 = vmul.f32 %v4201_v42, %v3310_v43 }
 0x17c   : > { %v1694_v31 = vsub.f32 0.0, %v1662_v26  ;;  %v1410_v49 = vadd.f32 1.0, %v1394_v30  ;;  %v1308_v21 = vadd.f32 %v1292_v33, %v1256_v10  ;;  %v1601_v50 = vmul.f32 %v1585_v36, %v4304_v60 }
 0x17d   : > { %v1551_v56 = vadd.f32 0.2548296, %v1535_v44  ;;  %v1472_v3 = vmul.f32 %v4333_v47, %v1456_v12  ;;  %v943_v41 = vadd.f32 %v927_v25, %v875_v29  ;;  %v1032_v9 = vmul.f32 %v4269_v17, %v3393_v0  ;;  %v1221_v29 = vld [vmem:[#allocation2 + $0xe1] sm:$0xff] }
 0x17e   : > { %v1710_v35 = vsel %vm1678_vm11, %v1662_v26, %v1694_v31  ;;  %2960 = vrcp.f32 %v1410_v49  ;;  %v4355_v28 = vadd.f32 %v4277_v37, %v1308_v21  ;;  %vm1679_vm13 = vcmp.ge.f32.partialorder %v4196_v5, 0.0 }
 0x17f   : > { %v1567_v62 = vmul.f32 %v4284_v61, %v1551_v56  ;;  %v1726_v16 = vadd.f32 1.0, %v1710_v35  ;;  %v1488_v8 = vadd.f32 1.4214138, %v1472_v3  ;;  %v995_v42 = vadd.f32 %v979_v22, %v943_v41 }
 0x180   : > { %v4364_v43 = vmul.f32 0.70710677, %v4355_v28  ;;  %v1084_v44 = vmul.f32 %v4282_v23, %v3338_v51  ;;  %v1586_v17 = vsub.f32 0.0, %v1378_v58  ;;  %v1136_v31 = vmul.f32 %v4288_v13, %v3362_v57  ;;  %v1273_v57 = vld [vmem:[#allocation2 + $0xe2] sm:$0xff] }
 0x181   : > { %v1647_v2 = vmul.f32 %v2955_v14, %v1567_v62  ;;  %v4357_v39 = vmul.f32 %v1726_v16, %v1342_v55  ;;  %v1504_v63 = vmul.f32 %v4333_v47, %v1488_v8  ;;  %v1629_v55 = vmul.f32 1.442695, %v1601_v50 }
 0x182   : > { %v4366_v60 = vpop.eup %2956  ;;  %v1379_v12 = vand.u32 2147483647, %v4364_v43  ;;  %v1048_v33 = vadd.f32 %v1032_v9, %v995_v42  ;;  %v1343_v56 = vmul.f32 0.5, %v4183_v6  ;;  %v1189_v35 = vmul.f32 %v3453_v18, %v1169_v34 }
 0x183   : > { %v1663_v61 = vsub.f32 1.0, %v1647_v2  ;;  %v1765_v14 = vmul.f32 %v3969_v32, %v4357_v39  ;;  %v1520_v26 = vadd.f32 -0.28449672, %v1504_v63  ;;  %v1441_v0 = vmul.f32 1.0614054, %v4366_v60 }
 0x184   : > { %v1395_v10 = vmul.f32 0.3275911, %v1379_v12  ;;  %v1100_v25 = vadd.f32 %v1084_v44, %v1048_v33  ;;  %2962 = vpow2.f32 %v1629_v55  ;;  %v1602_v21 = vmul.f32 %v1586_v17, %v1378_v58 }
 0x185   : > { %v1695_v54 = vsub.f32 0.0, %v1663_v61  ;;  %v1799_v36 = vsel %vm816_vm5, %v1765_v14, 0.0  ;;  %v1536_v30 = vmul.f32 %v4333_v47, %v1520_v26  ;;  %v1457_v23 = vadd.f32 -1.4531521, %v1441_v0 }
 0x186   : > { %1800 = vadd.xlane.f32.xlu1 %v1799_v36  ;;  %v1411_v22 = vadd.f32 1.0, %v1395_v10  ;;  %v1152_v5 = vadd.f32 %v1136_v31, %v1100_v25  ;;  %v1241_v16 = vmul.f32 %v3456_v19, %v1221_v29  ;;  %v1293_v63 = vmul.f32 %v3459_v20, %v1273_v57 }
 0x187   : > { %v1711_v51 = vsel %vm1679_vm13, %v1663_v61, %v1695_v54  ;;  %v1552_v49 = vadd.f32 0.2548296, %v1536_v30  ;;  %v1473_v62 = vmul.f32 %v4366_v60, %v1457_v23  ;;  %v2959_v8 = vpop.eup %2958  ;;  %v1631_v61 = vmul.f32 1.442695, %v1602_v21 }
 0x188   : > { %v1727_v3 = vadd.f32 1.0, %v1711_v51  ;;  %2964 = vrcp.f32 %v1411_v22  ;;  %v1205_v41 = vadd.f32 %v1189_v35, %v1152_v5  ;;  %vm1680_vm15 = vcmp.ge.f32.partialorder %v4239_v38, 0.0 }
 0x189   : > { %v1568_v6 = vmul.f32 %v4333_v47, %v1552_v49  ;;  %v1489_v50 = vadd.f32 1.4214138, %v1473_v62  ;;  %v1587_v0 = vsub.f32 0.0, %v1379_v12  ;;  %2966 = vpow2.f32 %v1631_v61 }
 0x18a   : > { %v4383_v13 = vmul.f32 %v1727_v3, %v1343_v56  ;;  %v1257_v26 = vadd.f32 %v1241_v16, %v1205_v41  ;;  %v1344_v30 = vmul.f32 0.5, %v4222_v4  ;;  %vm1681_vm7 = vcmp.ge.f32.partialorder %v4297_v53, 0.0 }
 0x18b   : > { %v1648_v18 = vmul.f32 %v2959_v8, %v1568_v6  ;;  %v2961_v58 = vpop.eup %2960  ;;  %v1505_v9 = vmul.f32 %v4366_v60, %v1489_v50  ;;  %v1603_v10 = vmul.f32 %v1587_v0, %v1379_v12  ;;  %vm1682_vm2 = vcmp.ge.f32.partialorder %v4331_v52, 0.0 }
 0x18c   : > { %v1766_v2 = vmul.f32 %v3969_v32, %v4383_v13  ;;  %v1442_v14 = vmul.f32 1.0614054, %v2961_v58  ;;  %v1309_v34 = vadd.f32 %v1293_v63, %v1257_v26  ;;  %v1346_v0 = vmul.f32 0.5, %v4320_v40 }
 0x18d   : > { %v1664_v47 = vsub.f32 1.0, %v1648_v18  ;;  %v1521_v19 = vadd.f32 -0.28449672, %v1505_v9  ;;  %v1633_v6 = vmul.f32 1.442695, %v1603_v10  ;;  %v1345_v18 = vmul.f32 0.5, %v4280_v59 }
 0x18e   : > { %v1802_v42 = vsel %vm816_vm5, %v1766_v2, 0.0  ;;  %v1458_v44 = vadd.f32 -1.4531521, %v1442_v14  ;;  %v4395_v36 = vadd.f32 %v4277_v37, %v1309_v34  ;;  %v3039_v10 = vld [vmem:[%s4741_s5] ss:$0 sm:$0xff]  ;;  %vm1683_vm12 = vcmp.ge.f32.partialorder %v4364_v43, 0.0 }
 0x18f   : > { %1803 = vadd.xlane.f32.xlu0 %v1802_v42  ;;  %v1696_v55 = vsub.f32 0.0, %v1664_v47  ;;  %v1537_v54 = vmul.f32 %v4366_v60, %v1521_v19 }
 0x190   : > { %v1474_v17 = vmul.f32 %v2961_v58, %v1458_v44  ;;  %v4399_v51 = vmul.f32 0.70710677, %v4395_v36 }
 0x191   : > { %v1712_v20 = vsel %vm1680_vm15, %v1664_v47, %v1696_v55  ;;  %v1553_v31 = vadd.f32 0.2548296, %v1537_v54  ;;  %v2963_v29 = vpop.eup %2962 }
 0x192   : > { %v1728_v33 = vadd.f32 1.0, %v1712_v20  ;;  %v1490_v56 = vadd.f32 1.4214138, %v1474_v17  ;;  %v1380_v49 = vand.u32 2147483647, %v4399_v51  ;;  %vm1684_vm3 = vcmp.ge.f32.partialorder %v4399_v51, 0.0 }
 0x193   : > { %v1569_v38 = vmul.f32 %v4366_v60, %v1553_v31 }
 0x194   : > { %v4401_v23 = vmul.f32 %v1728_v33, %v1344_v30  ;;  %v1506_v3 = vmul.f32 %v2961_v58, %v1490_v56  ;;  %v1396_v62 = vmul.f32 0.3275911, %v1380_v49  ;;  %v1588_v53 = vsub.f32 0.0, %v1380_v49 }
 0x195   : > { %v1649_v25 = vmul.f32 %v2963_v29, %v1569_v38  ;;  %v2965_v4 = vpop.eup %2964 }
 0x196   : > { %v1767_v37 = vmul.f32 %v3969_v32, %v4401_v23  ;;  %v1522_v35 = vadd.f32 -0.28449672, %v1506_v3  ;;  %v1443_v57 = vmul.f32 1.0614054, %v2965_v4  ;;  %v1412_v60 = vadd.f32 1.0, %v1396_v62  ;;  %v2967_v9 = vpop.eup %2966 }
 0x197   : > { %v1665_v22 = vsub.f32 1.0, %v1649_v25  ;;  %v1604_v54 = vmul.f32 %v1588_v53, %v1380_v49  ;;  %v1347_v62 = vmul.f32 0.5, %v4355_v28 }
 0x198   : > { %v1805_v21 = vsel %vm816_vm5, %v1767_v37, 0.0  ;;  %v1538_v5 = vmul.f32 %v2961_v58, %v1522_v35  ;;  %v1459_v16 = vadd.f32 -1.4531521, %v1443_v57  ;;  %2968 = vrcp.f32 %v1412_v60 }
 0x199   : > { %1806 = vadd.xlane.f32.xlu1 %v1805_v21  ;;  %v1697_v12 = vsub.f32 0.0, %v1665_v22  ;;  %2970 = vpow2.f32 %v1633_v6  ;;  %v1635_v38 = vmul.f32 1.442695, %v1604_v54  ;;  %v1348_v54 = vmul.f32 0.5, %v4395_v36 }
 0x19a   : > { %v1554_v8 = vadd.f32 0.2548296, %v1538_v5  ;;  %v1475_v2 = vmul.f32 %v2965_v4, %v1459_v16  ;;  %v4428_v5 = vld [vmem:[#allocation3] ss:$0 sm:$0xff] }
 0x19b   : > { %v1713_v50 = vsel %vm1681_vm7, %v1665_v22, %v1697_v12  ;;  %2972 = vpow2.f32 %v1635_v38 }
 0x19c   : > { %v1729_v41 = vadd.f32 1.0, %v1713_v50  ;;  %v1570_v63 = vmul.f32 %v2961_v58, %v1554_v8  ;;  %v1491_v61 = vadd.f32 1.4214138, %v1475_v2 }
 0x19e   : > { %v4410_v42 = vmul.f32 %v1729_v41, %v1345_v18  ;;  %v1650_v47 = vmul.f32 %v2967_v9, %v1570_v63  ;;  %v1507_v14 = vmul.f32 %v2965_v4, %v1491_v61 }
 0x1a0   : > { %v1768_v26 = vmul.f32 %v3969_v32, %v4410_v42  ;;  %v1666_v19 = vsub.f32 1.0, %v1650_v47  ;;  %v1523_v55 = vadd.f32 -0.28449672, %v1507_v14 }
 0x1a2   : > { %v1808_v44 = vsel %vm816_vm5, %v1768_v26, 0.0  ;;  %v1698_v34 = vsub.f32 0.0, %v1666_v19  ;;  %v1539_v59 = vmul.f32 %v2965_v4, %v1523_v55 }
 0x1a3   : > { %1809 = vadd.xlane.f32.xlu0 %v1808_v44 }
 0x1a4   : > { %v1714_v58 = vsel %vm1682_vm2, %v1666_v19, %v1698_v34  ;;  %v1555_v17 = vadd.f32 0.2548296, %v1539_v59 }
 0x1a5   : > { %v1730_v20 = vadd.f32 1.0, %v1714_v58  ;;  %v2969_v30 = vpop.eup %2968 }
 0x1a6   : > { %v1571_v32 = vmul.f32 %v2965_v4, %v1555_v17  ;;  %v2971_v31 = vpop.eup %2970  ;;  %v1444_v56 = vmul.f32 1.0614054, %v2969_v30 }
 0x1a7   : > { %v4417_v33 = vmul.f32 %v1730_v20, %v1346_v0 }
 0x1a8   : > { %v1651_v29 = vmul.f32 %v2971_v31, %v1571_v32  ;;  %v1460_v3 = vadd.f32 -1.4531521, %v1444_v56  ;;  %v2973_v18 = vpop.eup %2972 }
 0x1a9   : > { %v1769_v52 = vmul.f32 %v3039_v10, %v4417_v33 }
 0x1aa   : > { %v1667_v40 = vsub.f32 1.0, %v1651_v29  ;;  %v1476_v37 = vmul.f32 %v2969_v30, %v1460_v3 }
 0x1ab   : > { %v1811_v49 = vsel %vm816_vm5, %v1769_v52, 0.0 }
 0x1ac   : > { %1812 = vadd.xlane.f32.xlu1 %v1811_v49  ;;  %v1699_v25 = vsub.f32 0.0, %v1667_v40  ;;  %v1492_v4 = vadd.f32 1.4214138, %v1476_v37 }
 0x1ae   : > { %v1715_v35 = vsel %vm1683_vm12, %v1667_v40, %v1699_v25  ;;  %v1508_v22 = vmul.f32 %v2969_v30, %v1492_v4 }
 0x1af   : > { %v1731_v21 = vadd.f32 1.0, %v1715_v35 }
 0x1b0   : > { %v1524_v6 = vadd.f32 -0.28449672, %v1508_v22 }
 0x1b1   : > { %v4426_v57 = vmul.f32 %v1731_v21, %v1347_v62 }
 0x1b2   : > { %v1540_v12 = vmul.f32 %v2969_v30, %v1524_v6 }
 0x1b3   : > { %v1770_v60 = vmul.f32 %v3039_v10, %v4426_v57 }
 0x1b4   : > { %v1556_v50 = vadd.f32 0.2548296, %v1540_v12 }
 0x1b5   : > { %v1814_v8 = vsel %vm816_vm5, %v1770_v60, 0.0 }
 0x1b6   : > { %1815 = vadd.xlane.f32.xlu0 %v1814_v8  ;;  %v1572_v2 = vmul.f32 %v2969_v30, %v1556_v50 }
 0x1b7   : > { %v1774_v16 = vpop.xlane.xlu0 %1773 }
 0x1b8   : > { %v4433_v43 = vadd.f32 %v4428_v5, %v1774_v16  ;;  %v1652_v41 = vmul.f32 %v2973_v18, %v1572_v2 }
 0x1ba   : > { %v4436_v28 = vmul.f32 0.70710677, %v4433_v43  ;;  %v1668_v14 = vsub.f32 1.0, %v1652_v41 }
 0x1bc   : > { %v1876_v63 = vand.u32 2147483647, %v4436_v28  ;;  %v1780_v9 = vpop.xlane.xlu1 %1779  ;;  %v1700_v55 = vsub.f32 0.0, %v1668_v14  ;;  %vm2180_vm4 = vcmp.ge.f32.partialorder %v4436_v28, 0.0 }
 0x1bd   : > { %v4440_v61 = vadd.f32 %v4428_v5, %v1780_v9  ;;  %v1777_v47 = vpop.xlane.xlu0 %1776 }
 0x1be   : > { %v1892_v26 = vmul.f32 0.3275911, %v1876_v63  ;;  %v4443_v19 = vadd.f32 %v4428_v5, %v1777_v47  ;;  %v1716_v58 = vsel %vm1684_vm3, %v1668_v14, %v1700_v55  ;;  %v2084_v29 = vsub.f32 0.0, %v1876_v63 }
 0x1bf   : > { %v4446_v53 = vmul.f32 0.70710677, %v4440_v61  ;;  %v1732_v0 = vadd.f32 1.0, %v1716_v58 }
 0x1c0   : > { %v1908_v44 = vadd.f32 1.0, %v1892_v26  ;;  %v4451_v59 = vmul.f32 0.70710677, %v4443_v19  ;;  %v2100_v40 = vmul.f32 %v2084_v29, %v1876_v63 }
 0x1c1   : > { %v1878_v34 = vand.u32 2147483647, %v4446_v53  ;;  %v4455_v30 = vmul.f32 %v1732_v0, %v1348_v54  ;;  %vm2182_vm14 = vcmp.ge.f32.partialorder %v4446_v53, 0.0  ;;  %v1846_v53 = vmul.f32 0.5, %v4440_v61 }
 0x1c2   : > { %2974 = vrcp.f32 %v1908_v44  ;;  %v1877_v17 = vand.u32 2147483647, %v4451_v59  ;;  %v2116_v21 = vmul.f32 1.442695, %v2100_v40  ;;  %vm2181_vm1 = vcmp.ge.f32.partialorder %v4451_v59, 0.0 }
 0x1c3   : > { %v1894_v20 = vmul.f32 0.3275911, %v1878_v34  ;;  %v1771_v38 = vmul.f32 %v3039_v10, %v4455_v30  ;;  %v2086_v25 = vsub.f32 0.0, %v1878_v34 }
 0x1c4   : > { %v1893_v31 = vmul.f32 0.3275911, %v1877_v17  ;;  %v2085_v62 = vsub.f32 0.0, %v1877_v17 }
 0x1c5   : > { %v1910_v32 = vadd.f32 1.0, %v1894_v20  ;;  %v1783_v56 = vpop.xlane.xlu1 %1782  ;;  %v1817_v36 = vsel %vm816_vm5, %v1771_v38, 0.0  ;;  %v2102_v6 = vmul.f32 %v2086_v25, %v1878_v34 }
 0x1c6   : > { %v4458_v51 = vadd.f32 %v4428_v5, %v1783_v56  ;;  %v1909_v52 = vadd.f32 1.0, %v1893_v31  ;;  %1818 = vadd.xlane.f32.xlu1 %v1817_v36  ;;  %v2101_v16 = vmul.f32 %v2085_v62, %v1877_v17 }
 0x1c7   : > { %2976 = vrcp.f32 %v1910_v32  ;;  %v2120_v63 = vmul.f32 1.442695, %v2102_v6 }
 0x1c8   : > { %v4462_v3 = vmul.f32 0.70710677, %v4458_v51  ;;  %2978 = vrcp.f32 %v1909_v52  ;;  %v2118_v26 = vmul.f32 1.442695, %v2101_v16 }
 0x1ca   : > { %v1879_v49 = vand.u32 2147483647, %v4462_v3  ;;  %vm2183_vm0 = vcmp.ge.f32.partialorder %v4462_v3, 0.0  ;;  %v1847_v3 = vmul.f32 0.5, %v4458_v51 }
 0x1cc   : > { %v1895_v37 = vmul.f32 0.3275911, %v1879_v49  ;;  %v2087_v18 = vsub.f32 0.0, %v1879_v49 }
 0x1ce   : > { %v1911_v4 = vadd.f32 1.0, %v1895_v37  ;;  %v2103_v54 = vmul.f32 %v2087_v18, %v1879_v49 }
 0x1cf   : > { %v2975_v35 = vpop.eup %2974 }
 0x1d0   : > { %2980 = vrcp.f32 %v1911_v4  ;;  %v1940_v10 = vmul.f32 1.0614054, %v2975_v35  ;;  %v1786_v22 = vpop.xlane.xlu0 %1785  ;;  %v2122_v40 = vmul.f32 1.442695, %v2103_v54 }
 0x1d1   : > { %v4467_v60 = vadd.f32 %v4428_v5, %v1786_v22  ;;  %2982 = vpow2.f32 %v2116_v21 }
 0x1d2   : > { %v1956_v12 = vadd.f32 -1.4531521, %v1940_v10  ;;  %2984 = vpow2.f32 %v2120_v63 }
 0x1d3   : > { %v4472_v50 = vmul.f32 0.70710677, %v4467_v60  ;;  %2986 = vpow2.f32 %v2118_v26 }
 0x1d4   : > { %v4469_v8 = vpop.eup %2976  ;;  %v1972_v2 = vmul.f32 %v2975_v35, %v1956_v12 }
 0x1d5   : > { %v1942_v41 = vmul.f32 1.0614054, %v4469_v8  ;;  %v1880_v9 = vand.u32 2147483647, %v4472_v50  ;;  %v4476_v14 = vpop.eup %2978  ;;  %vm2184_vm8 = vcmp.ge.f32.partialorder %v4472_v50, 0.0 }
 0x1d6   : > { %v1988_v47 = vadd.f32 1.4214138, %v1972_v2  ;;  %v1941_v58 = vmul.f32 1.0614054, %v4476_v14 }
 0x1d7   : > { %v1958_v55 = vadd.f32 -1.4531521, %v1942_v41  ;;  %v1896_v44 = vmul.f32 0.3275911, %v1880_v9  ;;  %v2088_v21 = vsub.f32 0.0, %v1880_v9  ;;  %v3081_v41 = vmov 0  }
 0x1d8   : > { %v2004_v34 = vmul.f32 %v2975_v35, %v1988_v47  ;;  %v1957_v31 = vadd.f32 -1.4531521, %v1941_v58  ;;  %2908 = vset.pattern.permute.xlu0 %v3081_v41  ;;  %2909 = vset.pattern.permute.xlu1 %v3081_v41 }
 0x1d9   : > { %v1974_v0 = vmul.f32 %v4469_v8, %v1958_v55  ;;  %v1912_v20 = vadd.f32 1.0, %v1896_v44  ;;  %v1789_v17 = vpop.xlane.xlu1 %1788 }
 0x1da   : > { %v2020_v32 = vadd.f32 -0.28449672, %v2004_v34  ;;  %v4481_v56 = vadd.f32 %v4428_v5, %v1789_v17  ;;  %v1973_v29 = vmul.f32 %v4476_v14, %v1957_v31  ;;  %v2104_v34 = vmul.f32 %v2088_v21, %v1880_v9 }
 0x1db   : > { %v1990_v38 = vadd.f32 1.4214138, %v1974_v0  ;;  %2988 = vrcp.f32 %v1912_v20 }
 0x1dc   : > { %v2036_v52 = vmul.f32 %v2975_v35, %v2020_v32  ;;  %v4487_v49 = vmul.f32 0.70710677, %v4481_v56  ;;  %v1989_v4 = vadd.f32 1.4214138, %v1973_v29  ;;  %2990 = vpow2.f32 %v2122_v40 }
 0x1dd   : > { %v4484_v36 = vpop.eup %2980  ;;  %v2006_v37 = vmul.f32 %v4469_v8, %v1990_v38  ;;  %v2124_v40 = vmul.f32 1.442695, %v2104_v34 }
 0x1de   : > { %v2052_v25 = vadd.f32 0.2548296, %v2036_v52  ;;  %v1943_v62 = vmul.f32 1.0614054, %v4484_v36  ;;  %v1881_v10 = vand.u32 2147483647, %v4487_v49  ;;  %v2005_v12 = vmul.f32 %v4476_v14, %v1989_v4  ;;  %v2983_v2 = vpop.eup %2982 }
 0x1df   : > { %v2022_v22 = vadd.f32 -0.28449672, %v2006_v37  ;;  %v2985_v9 = vpop.eup %2984  ;;  %vm2185_vm9 = vcmp.ge.f32.partialorder %v4487_v49, 0.0 }
 0x1e0   : > { %v2068_v6 = vmul.f32 %v2975_v35, %v2052_v25  ;;  %v1959_v16 = vadd.f32 -1.4531521, %v1943_v62  ;;  %v1897_v18 = vmul.f32 0.3275911, %v1881_v10  ;;  %v2021_v55 = vadd.f32 -0.28449672, %v2005_v12  ;;  %v2987_v25 = vpop.eup %2986 }
 0x1e1   : > { %v2038_v63 = vmul.f32 %v4469_v8, %v2022_v22  ;;  %v1844_v12 = vmul.f32 0.5, %v4433_v43 }
 0x1e2   : > { %v1792_v47 = vpop.xlane.xlu0 %1791  ;;  %v2148_v26 = vmul.f32 %v2983_v2, %v2068_v6  ;;  %v1975_v44 = vmul.f32 %v4484_v36, %v1959_v16  ;;  %v1913_v58 = vadd.f32 1.0, %v1897_v18  ;;  %v2037_v20 = vmul.f32 %v4476_v14, %v2021_v55 }
 0x1e3   : > { %v4496_v35 = vadd.f32 %v4428_v5, %v1792_v47  ;;  %v2054_v54 = vadd.f32 0.2548296, %v2038_v63  ;;  %v2089_v16 = vsub.f32 0.0, %v1881_v10 }
 0x1e4   : > { %v2164_v0 = vsub.f32 1.0, %v2148_v26  ;;  %v1991_v17 = vadd.f32 1.4214138, %v1975_v44  ;;  %2992 = vrcp.f32 %v1913_v58  ;;  %v2053_v38 = vadd.f32 0.2548296, %v2037_v20 }
 0x1e5   : > { %v4500_v32 = vmul.f32 0.70710677, %v4496_v35  ;;  %v2070_v52 = vmul.f32 %v4469_v8, %v2054_v54  ;;  %2994 = vpow2.f32 %v2124_v40  ;;  %v2105_v58 = vmul.f32 %v2089_v16, %v1881_v10 }
 0x1e6   : > { %v2196_v31 = vsub.f32 0.0, %v2164_v0  ;;  %v2007_v29 = vmul.f32 %v4484_v36, %v1991_v17  ;;  %v2069_v62 = vmul.f32 %v4476_v14, %v2053_v38 }
 0x1e7   : > { %v1882_v37 = vand.u32 2147483647, %v4500_v32  ;;  %v2150_v21 = vmul.f32 %v2985_v9, %v2070_v52  ;;  %vm2186_vm6 = vcmp.ge.f32.partialorder %v4500_v32, 0.0 }
 0x1e8   : > { %v2212_v4 = vsel %vm2180_vm4, %v2164_v0, %v2196_v31  ;;  %v2023_v22 = vadd.f32 -0.28449672, %v2007_v29  ;;  %v2989_v6 = vpop.eup %2988  ;;  %v2149_v18 = vmul.f32 %v2987_v25, %v2069_v62  ;;  %v1845_v29 = vmul.f32 0.5, %v4443_v19 }
 0x1e9   : > { %v1898_v2 = vmul.f32 0.3275911, %v1882_v37  ;;  %v2228_v8 = vadd.f32 1.0, %v2212_v4  ;;  %v2166_v41 = vsub.f32 1.0, %v2150_v21  ;;  %v1944_v28 = vmul.f32 1.0614054, %v2989_v6  ;;  %v2991_v20 = vpop.eup %2990 }
 0x1ea   : > { %v2039_v63 = vmul.f32 %v4484_v36, %v2023_v22  ;;  %v2165_v55 = vsub.f32 1.0, %v2149_v18  ;;  %v2126_v25 = vmul.f32 1.442695, %v2105_v58  ;;  %v2090_v62 = vsub.f32 0.0, %v1882_v37 }
 0x1eb   : > { %v1914_v47 = vadd.f32 1.0, %v1898_v2  ;;  %v2244_v26 = vmul.f32 %v2228_v8, %v1844_v12  ;;  %v2198_v44 = vsub.f32 0.0, %v2166_v41  ;;  %v1960_v14 = vadd.f32 -1.4531521, %v1944_v28 }
 0x1ec   : > { %v2055_v34 = vadd.f32 0.2548296, %v2039_v63  ;;  %v2197_v54 = vsub.f32 0.0, %v2165_v55 }
 0x1ed   : > { %2996 = vrcp.f32 %v1914_v47  ;;  %2262 = vperm.xlu0 %2908, %v2244_v26   ;;  %v1976_v0 = vmul.f32 %v2989_v6, %v1960_v14  ;;  %v2214_v31 = vsel %vm2182_vm14, %v2166_v41, %v2198_v44  ;;  %v2106_v41 = vmul.f32 %v2090_v62, %v1882_v37 }
 0x1ee   : > { %v2071_v43 = vmul.f32 %v4484_v36, %v2055_v34  ;;  %v2213_v17 = vsel %vm2181_vm1, %v2165_v55, %v2197_v54  ;;  %v2230_v36 = vadd.f32 1.0, %v2214_v31  ;;  %2998 = vpow2.f32 %v2126_v25 }
 0x1ef   : > { %v1992_v52 = vadd.f32 1.4214138, %v1976_v0  ;;  %v2229_v9 = vadd.f32 1.0, %v2213_v17  ;;  %v2128_v54 = vmul.f32 1.442695, %v2106_v41 }
 0x1f0   : > { %v2151_v38 = vmul.f32 %v2991_v20, %v2071_v43  ;;  %v2246_v63 = vmul.f32 %v2230_v36, %v1846_v53 }
 0x1f1   : > { %v2993_v40 = vpop.eup %2992  ;;  %v2008_v10 = vmul.f32 %v2989_v6, %v1992_v52  ;;  %v2245_v21 = vmul.f32 %v2229_v9, %v1845_v29  ;;  %3000 = vpow2.f32 %v2128_v54 }
 0x1f2   : > { %v2167_v4 = vsub.f32 1.0, %v2151_v38  ;;  %v1945_v22 = vmul.f32 1.0614054, %v2993_v40  ;;  %v2995_v26 = vpop.eup %2994 }
 0x1f3   : > { %v2024_v16 = vadd.f32 -0.28449672, %v2008_v10  ;;  %2267 = vperm.xlu1 %2909, %v2245_v21   ;;  %v1848_v21 = vmul.f32 0.5, %v4467_v60 }
 0x1f4   : > { %v2199_v12 = vsub.f32 0.0, %v2167_v4  ;;  %v1961_v2 = vadd.f32 -1.4531521, %v1945_v22 }
 0x1f5   : > { %v1795_v59 = vpop.xlane.xlu1 %1794  ;;  %v2040_v18 = vmul.f32 %v2989_v6, %v2024_v16 }
 0x1f6   : > { %v4516_v19 = vadd.f32 %v4428_v5, %v1795_v59  ;;  %v2215_v8 = vsel %vm2183_vm0, %v2167_v4, %v2199_v12  ;;  %v1977_v47 = vmul.f32 %v2993_v40, %v1961_v2 }
 0x1f7   : > { %v2231_v28 = vadd.f32 1.0, %v2215_v8  ;;  %v2056_v61 = vadd.f32 0.2548296, %v2040_v18  ;;  %2272 = vperm.xlu1 %2909, %v2246_v63  }
 0x1f8   : > { %v4519_v55 = vmul.f32 0.70710677, %v4516_v19  ;;  %v1993_v44 = vadd.f32 1.4214138, %v1977_v47 }
 0x1f9   : > { %v2072_v58 = vmul.f32 %v2989_v6, %v2056_v61  ;;  %v2247_v43 = vmul.f32 %v2231_v28, %v1847_v3  ;;  %v2394_v3 = vld [vmem:[%s4744_s8] sm:$0xff] }
 0x1fa   : > { %v2997_v34 = vpop.eup %2996  ;;  %v1883_v14 = vand.u32 2147483647, %v4519_v55  ;;  %v2009_v0 = vmul.f32 %v2993_v40, %v1993_v44  ;;  %vm2187_vm10 = vcmp.ge.f32.partialorder %v4519_v55, 0.0 }
 0x1fb   : > { %v1946_v37 = vmul.f32 1.0614054, %v2997_v34  ;;  %v2152_v17 = vmul.f32 %v2995_v26, %v2072_v58  ;;  %2277 = vperm.xlu1 %2909, %v2247_v43   ;;  %v2999_v62 = vpop.eup %2998  ;;  %v1849_v43 = vmul.f32 0.5, %v4481_v56 }
 0x1fc   : > { %v1899_v20 = vmul.f32 0.3275911, %v1883_v14  ;;  %v2025_v31 = vadd.f32 -0.28449672, %v2009_v0  ;;  %v2091_v18 = vsub.f32 0.0, %v1883_v14 }
 0x1fd   : > { %v1962_v38 = vadd.f32 -1.4531521, %v1946_v37  ;;  %v2168_v29 = vsub.f32 1.0, %v2152_v17 }
 0x1fe   : > { %v1915_v52 = vadd.f32 1.0, %v1899_v20  ;;  %v2041_v9 = vmul.f32 %v2993_v40, %v2025_v31  ;;  %v2107_v26 = vmul.f32 %v2091_v18, %v1883_v14  ;;  %v3001_v54 = vpop.eup %3000 }
 0x1ff   : > { %v1978_v51 = vmul.f32 %v2997_v34, %v1962_v38  ;;  %v2200_v25 = vsub.f32 0.0, %v2168_v29 }
 0x200   : > { %3002 = vrcp.f32 %v1915_v52  ;;  %v2057_v4 = vadd.f32 0.2548296, %v2041_v9  ;;  %v2130_v49 = vmul.f32 1.442695, %v2107_v26 }
 0x201   : > { %v1994_v6 = vadd.f32 1.4214138, %v1978_v51  ;;  %v2216_v10 = vsel %vm2184_vm8, %v2168_v29, %v2200_v25 }
 0x202   : > { %v2232_v22 = vadd.f32 1.0, %v2216_v10  ;;  %v2073_v12 = vmul.f32 %v2993_v40, %v2057_v4  ;;  %v2395_v40 = vld [vmem:[%s4744_s8 + $0x8] sm:$0xff]  ;;  %v1850_v4 = vmul.f32 0.5, %v4496_v35 }
 0x203   : > { %v1798_v36 = vpop.xlane.xlu0 %1797  ;;  %v2010_v16 = vmul.f32 %v2997_v34, %v1994_v6  ;;  %2835 = vmatprep.subr.mxu1 %v2395_v40 }
 0x204   : > { %v4526_v53 = vadd.f32 %v4428_v5, %v1798_v36  ;;  %v2248_v59 = vmul.f32 %v2232_v22, %v1848_v21  ;;  %v2153_v2 = vmul.f32 %v2999_v62, %v2073_v12  ;;  %2836 = vmatpush3.msra.mxu1 %v2395_v40 }
 0x205   : > { %v2026_v8 = vadd.f32 -0.28449672, %v2010_v16  ;;  %2837 = vmatprep.subr.mxu1 %v2394_v3 }
 0x206   : > { %v4529_v41 = vmul.f32 0.70710677, %v4526_v53  ;;  %2282 = vperm.xlu1 %2909, %v2248_v59   ;;  %v2169_v50 = vsub.f32 1.0, %v2153_v2  ;;  %2838 = vmatpush3.msra.mxu1 %v2394_v3 }
 0x207   : > { %v2042_v63 = vmul.f32 %v2997_v34, %v2026_v8 }
 0x208   : > { %v1884_v28 = vand.u32 2147483647, %v4529_v41  ;;  %v2201_v60 = vsub.f32 0.0, %v2169_v50  ;;  %vm2188_vm11 = vcmp.ge.f32.partialorder %v4529_v41, 0.0 }
 0x209   : > { %v2058_v47 = vadd.f32 0.2548296, %v2042_v63 }
 0x20a   : > { %v1900_v61 = vmul.f32 0.3275911, %v1884_v28  ;;  %v2217_v44 = vsel %vm2185_vm9, %v2169_v50, %v2201_v60  ;;  %v2092_v6 = vsub.f32 0.0, %v1884_v28 }
 0x20b   : > { %v2074_v58 = vmul.f32 %v2997_v34, %v2058_v47  ;;  %v2233_v37 = vadd.f32 1.0, %v2217_v44 }
 0x20c   : > { %v1916_v0 = vadd.f32 1.0, %v1900_v61  ;;  %v2108_v16 = vmul.f32 %v2092_v6, %v1884_v28 }
 0x20d   : > { %v3003_v20 = vpop.eup %3002  ;;  %v2154_v17 = vmul.f32 %v3001_v54, %v2074_v58  ;;  %v2249_v14 = vmul.f32 %v2233_v37, %v1849_v43 }
 0x20e   : > { %3004 = vrcp.f32 %v1916_v0  ;;  %v1947_v31 = vmul.f32 1.0614054, %v3003_v20  ;;  %v2132_v63 = vmul.f32 1.442695, %v2108_v16 }
 0x20f   : > { %v2170_v38 = vsub.f32 1.0, %v2154_v17  ;;  %v1801_v52 = vpop.xlane.xlu1 %1800  ;;  %2287 = vperm.xlu1 %2909, %v2249_v14   ;;  %3006 = vpow2.f32 %v2130_v49 }
 0x210   : > { %v1963_v29 = vadd.f32 -1.4531521, %v1947_v31  ;;  %v4541_v34 = vadd.f32 %v4428_v5, %v1801_v52 }
 0x211   : > { %v2202_v9 = vsub.f32 0.0, %v2170_v38 }
 0x212   : > { %v1979_v56 = vmul.f32 %v3003_v20, %v1963_v29  ;;  %v4545_v51 = vmul.f32 0.70710677, %v4541_v34 }
 0x213   : > { %v2218_v25 = vsel %vm2186_vm6, %v2170_v38, %v2202_v9  ;;  %v1851_v9 = vmul.f32 0.5, %v4516_v19 }
 0x214   : > { %v2234_v10 = vadd.f32 1.0, %v2218_v25  ;;  %v1995_v62 = vadd.f32 1.4214138, %v1979_v56  ;;  %v1885_v21 = vand.u32 2147483647, %v4545_v51  ;;  %vm2189_vm13 = vcmp.ge.f32.partialorder %v4545_v51, 0.0 }
 0x216   : > { %v2250_v36 = vmul.f32 %v2234_v10, %v1850_v4  ;;  %v2011_v22 = vmul.f32 %v3003_v20, %v1995_v62  ;;  %v1901_v12 = vmul.f32 0.3275911, %v1885_v21  ;;  %v2093_v54 = vsub.f32 0.0, %v1885_v21 }
 0x218   : > { %v1804_v59 = vpop.xlane.xlu0 %1803  ;;  %2292 = vperm.xlu1 %2909, %v2250_v36   ;;  %v2027_v32 = vadd.f32 -0.28449672, %v2011_v22  ;;  %v1917_v2 = vadd.f32 1.0, %v1901_v12 }
 0x219   : > { %v4550_v8 = vadd.f32 %v4428_v5, %v1804_v59 }
 0x21a   : > { %v2043_v18 = vmul.f32 %v3003_v20, %v2027_v32  ;;  %3008 = vrcp.f32 %v1917_v2 }
 0x21b   : > { %v3005_v50 = vpop.eup %3004  ;;  %v4553_v35 = vmul.f32 0.70710677, %v4550_v8  ;;  %3010 = vpow2.f32 %v2132_v63 }
 0x21c   : > { %v2059_v60 = vadd.f32 0.2548296, %v2043_v18  ;;  %v1948_v47 = vmul.f32 1.0614054, %v3005_v50  ;;  %v3007_v61 = vpop.eup %3006 }
 0x21d   : > { %v1886_v40 = vand.u32 2147483647, %v4553_v35  ;;  %vm2190_vm15 = vcmp.ge.f32.partialorder %v4553_v35, 0.0 }
 0x21e   : > { %v2075_v26 = vmul.f32 %v3003_v20, %v2059_v60  ;;  %v1964_v28 = vadd.f32 -1.4531521, %v1948_v47  ;;  %v2109_v20 = vmul.f32 %v2093_v54, %v1885_v21 }
 0x21f   : > { %v1902_v3 = vmul.f32 0.3275911, %v1886_v40  ;;  %v2094_v16 = vsub.f32 0.0, %v1886_v40 }
 0x220   : > { %v2155_v44 = vmul.f32 %v3007_v61, %v2075_v26  ;;  %v1980_v58 = vmul.f32 %v3005_v50, %v1964_v28  ;;  %v2134_v10 = vmul.f32 1.442695, %v2109_v20 }
 0x221   : > { %v1918_v43 = vadd.f32 1.0, %v1902_v3  ;;  %v2110_v63 = vmul.f32 %v2094_v16, %v1886_v40 }
 0x222   : > { %v2171_v0 = vsub.f32 1.0, %v2155_v44  ;;  %v1996_v37 = vadd.f32 1.4214138, %v1980_v58  ;;  %v1807_v17 = vpop.xlane.xlu1 %1806 }
 0x223   : > { %3012 = vrcp.f32 %v1918_v43  ;;  %v4557_v49 = vadd.f32 %v4428_v5, %v1807_v17  ;;  %v2136_v58 = vmul.f32 1.442695, %v2110_v63  ;;  %v1852_v17 = vmul.f32 0.5, %v4526_v53 }
 0x224   : > { %v2203_v14 = vsub.f32 0.0, %v2171_v0  ;;  %v2012_v31 = vmul.f32 %v3005_v50, %v1996_v37  ;;  %3014 = vpow2.f32 %v2134_v10 }
 0x225   : > { %v4561_v38 = vmul.f32 0.70710677, %v4557_v49 }
 0x226   : > { %v2219_v52 = vsel %vm2187_vm10, %v2171_v0, %v2203_v14  ;;  %v2028_v29 = vadd.f32 -0.28449672, %v2012_v31 }
 0x227   : > { %v2235_v56 = vadd.f32 1.0, %v2219_v52  ;;  %v3009_v25 = vpop.eup %3008  ;;  %v1887_v4 = vand.u32 2147483647, %v4561_v38  ;;  %vm2191_vm7 = vcmp.ge.f32.partialorder %v4561_v38, 0.0 }
 0x228   : > { %v2044_v6 = vmul.f32 %v3005_v50, %v2028_v29  ;;  %v1949_v62 = vmul.f32 1.0614054, %v3009_v25  ;;  %v3011_v32 = vpop.eup %3010 }
 0x229   : > { %v2251_v36 = vmul.f32 %v2235_v56, %v1851_v9  ;;  %v1903_v22 = vmul.f32 0.3275911, %v1887_v4  ;;  %v2095_v0 = vsub.f32 0.0, %v1887_v4 }
 0x22a   : > { %v2060_v12 = vadd.f32 0.2548296, %v2044_v6  ;;  %v1965_v55 = vadd.f32 -1.4531521, %v1949_v62 }
 0x22b   : > { %2297 = vperm.xlu1 %2909, %v2251_v36   ;;  %v1919_v21 = vadd.f32 1.0, %v1903_v22  ;;  %v2111_v41 = vmul.f32 %v2095_v0, %v1887_v4 }
 0x22c   : > { %v2076_v59 = vmul.f32 %v3005_v50, %v2060_v12  ;;  %v1981_v2 = vmul.f32 %v3009_v25, %v1965_v55  ;;  %v1810_v19 = vpop.xlane.xlu0 %1809 }
 0x22d   : > { %3016 = vrcp.f32 %v1919_v21  ;;  %v4566_v60 = vadd.f32 %v4428_v5, %v1810_v19  ;;  %v2138_v21 = vmul.f32 1.442695, %v2111_v41 }
 0x22e   : > { %v2156_v18 = vmul.f32 %v3011_v32, %v2076_v59  ;;  %v1997_v47 = vadd.f32 1.4214138, %v1981_v2  ;;  %3018 = vpow2.f32 %v2136_v58 }
 0x22f   : > { %v4569_v61 = vmul.f32 0.70710677, %v4566_v60 }
 0x230   : > { %v3013_v26 = vpop.eup %3012  ;;  %v2172_v28 = vsub.f32 1.0, %v2156_v18  ;;  %v2013_v3 = vmul.f32 %v3009_v25, %v1997_v47 }
 0x231   : > { %v1950_v44 = vmul.f32 1.0614054, %v3013_v26  ;;  %v1888_v54 = vand.u32 2147483647, %v4569_v61  ;;  %v3015_v22 = vpop.eup %3014  ;;  %vm2192_vm2 = vcmp.ge.f32.partialorder %v4569_v61, 0.0 }
 0x232   : > { %v2204_v50 = vsub.f32 0.0, %v2172_v28  ;;  %v2029_v43 = vadd.f32 -0.28449672, %v2013_v3 }
 0x233   : > { %v1966_v37 = vadd.f32 -1.4531521, %v1950_v44  ;;  %v1904_v14 = vmul.f32 0.3275911, %v1888_v54  ;;  %v2096_v19 = vsub.f32 0.0, %v1888_v54  ;;  %v1853_v44 = vmul.f32 0.5, %v4541_v34 }
 0x234   : > { %v2220_v40 = vsel %vm2188_vm11, %v2172_v28, %v2204_v50  ;;  %v2045_v31 = vmul.f32 %v3009_v25, %v2029_v43 }
 0x235   : > { %v2236_v20 = vadd.f32 1.0, %v2220_v40  ;;  %v1982_v52 = vmul.f32 %v3013_v26, %v1966_v37  ;;  %v1920_v29 = vadd.f32 1.0, %v1904_v14  ;;  %v1813_v9 = vpop.xlane.xlu1 %1812  ;;  %v2112_v43 = vmul.f32 %v2096_v19, %v1888_v54 }
 0x236   : > { %v2061_v56 = vadd.f32 0.2548296, %v2045_v31  ;;  %v4575_v10 = vadd.f32 %v4428_v5, %v1813_v9 }
 0x237   : > { %v2252_v6 = vmul.f32 %v2236_v20, %v1852_v17  ;;  %v1998_v62 = vadd.f32 1.4214138, %v1982_v52  ;;  %3020 = vrcp.f32 %v1920_v29  ;;  %v2140_v34 = vmul.f32 1.442695, %v2112_v43 }
 0x238   : > { %v2077_v36 = vmul.f32 %v3009_v25, %v2061_v56  ;;  %v4578_v53 = vmul.f32 0.70710677, %v4575_v10  ;;  %3022 = vpow2.f32 %v2138_v21 }
 0x239   : > { %2302 = vperm.xlu1 %2909, %v2252_v6   ;;  %v2014_v12 = vmul.f32 %v3013_v26, %v1998_v62 }
 0x23a   : > { %v3017_v16 = vpop.eup %3016  ;;  %v2157_v55 = vmul.f32 %v3015_v22, %v2077_v36  ;;  %v1889_v59 = vand.u32 2147483647, %v4578_v53  ;;  %vm2193_vm12 = vcmp.ge.f32.partialorder %v4578_v53, 0.0 }
 0x23b   : > { %v1951_v32 = vmul.f32 1.0614054, %v3017_v16  ;;  %v2030_v4 = vadd.f32 -0.28449672, %v2014_v12  ;;  %v3019_v31 = vpop.eup %3018 }
 0x23c   : > { %v2173_v2 = vsub.f32 1.0, %v2157_v55  ;;  %v1905_v18 = vmul.f32 0.3275911, %v1889_v59  ;;  %v2097_v62 = vsub.f32 0.0, %v1889_v59 }
 0x23d   : > { %v1967_v63 = vadd.f32 -1.4531521, %v1951_v32  ;;  %v2046_v28 = vmul.f32 %v3013_v26, %v2030_v4  ;;  %v1854_v4 = vmul.f32 0.5, %v4550_v8 }
 0x23e   : > { %v2205_v47 = vsub.f32 0.0, %v2173_v2  ;;  %v1921_v25 = vadd.f32 1.0, %v1905_v18  ;;  %v2113_v19 = vmul.f32 %v2097_v62, %v1889_v59 }
 0x23f   : > { %v1983_v3 = vmul.f32 %v3017_v16, %v1967_v63  ;;  %v2062_v58 = vadd.f32 0.2548296, %v2046_v28  ;;  %v1816_v0 = vpop.xlane.xlu0 %1815 }
 0x240   : > { %v2221_v50 = vsel %vm2189_vm13, %v2173_v2, %v2205_v47  ;;  %3024 = vrcp.f32 %v1921_v25  ;;  %v4584_v17 = vadd.f32 %v4428_v5, %v1816_v0 }
 0x241   : > { %v2237_v40 = vadd.f32 1.0, %v2221_v50  ;;  %v1999_v37 = vadd.f32 1.4214138, %v1983_v3  ;;  %v2078_v14 = vmul.f32 %v3013_v26, %v2062_v58  ;;  %3026 = vpow2.f32 %v2140_v34 }
 0x242   : > { %v4587_v51 = vmul.f32 0.70710677, %v4584_v17  ;;  %v2142_v58 = vmul.f32 1.442695, %v2113_v19 }
 0x243   : > { %v2253_v20 = vmul.f32 %v2237_v40, %v1853_v44  ;;  %v2015_v52 = vmul.f32 %v3017_v16, %v1999_v37  ;;  %v2158_v29 = vmul.f32 %v3019_v31, %v2078_v14 }
 0x244   : > { %v3021_v9 = vpop.eup %3020  ;;  %v1890_v54 = vand.u32 2147483647, %v4587_v51  ;;  %vm2194_vm3 = vcmp.ge.f32.partialorder %v4587_v51, 0.0 }
 0x245   : > { %2307 = vperm.xlu0 %2908, %v2253_v20   ;;  %v2031_v56 = vadd.f32 -0.28449672, %v2015_v52  ;;  %v2174_v6 = vsub.f32 1.0, %v2158_v29  ;;  %v1952_v41 = vmul.f32 1.0614054, %v3021_v9  ;;  %v3023_v47 = vpop.eup %3022  ;;  %v1855_v52 = vmul.f32 0.5, %v4557_v49 }
 0x246   : > { %v1906_v22 = vmul.f32 0.3275911, %v1890_v54  ;;  %v2098_v8 = vsub.f32 0.0, %v1890_v54 }
 0x247   : > { %v2047_v36 = vmul.f32 %v3017_v16, %v2031_v56  ;;  %v2206_v12 = vsub.f32 0.0, %v2174_v6  ;;  %v1968_v26 = vadd.f32 -1.4531521, %v1952_v41 }
 0x248   : > { %v1922_v21 = vadd.f32 1.0, %v1906_v22  ;;  %v2114_v41 = vmul.f32 %v2098_v8, %v1890_v54 }
 0x249   : > { %v2063_v55 = vadd.f32 0.2548296, %v2047_v36  ;;  %v2222_v32 = vsel %vm2190_vm15, %v2174_v6, %v2206_v12  ;;  %v1984_v2 = vmul.f32 %v3021_v9, %v1968_v26 }
 0x24a   : > { %v2238_v63 = vadd.f32 1.0, %v2222_v32  ;;  %3028 = vrcp.f32 %v1922_v21  ;;  %v2144_v32 = vmul.f32 1.442695, %v2114_v41 }
 0x24b   : > { %v2079_v18 = vmul.f32 %v3017_v16, %v2063_v55  ;;  %v2000_v28 = vadd.f32 1.4214138, %v1984_v2  ;;  %3030 = vpow2.f32 %v2142_v58 }
 0x24c   : > { %v2254_v3 = vmul.f32 %v2238_v63, %v1854_v4 }
 0x24d   : > { %v2159_v25 = vmul.f32 %v3023_v47, %v2079_v18  ;;  %v3025_v44 = vpop.eup %3024  ;;  %v2016_v50 = vmul.f32 %v3021_v9, %v2000_v28  ;;  %v1856_v28 = vmul.f32 0.5, %v4566_v60  ;;  %v4607_v60 = vld [vmem:[%s4743_s7] ss:$0 sm:$0xff] }
 0x24e   : > { %v1953_v35 = vmul.f32 1.0614054, %v3025_v44  ;;  %2312 = vperm.xlu1 %2909, %v2254_v3   ;;  %v3027_v36 = vpop.eup %3026 }
 0x24f   : > { %v2175_v43 = vsub.f32 1.0, %v2159_v25  ;;  %v2032_v0 = vadd.f32 -0.28449672, %v2016_v50  ;;  %v1819_v59 = vpop.xlane.xlu1 %1818 }
 0x250   : > { %v1969_v37 = vadd.f32 -1.4531521, %v1953_v35  ;;  %v4594_v14 = vadd.f32 %v4428_v5, %v1819_v59 }
 0x251   : > { %v2207_v40 = vsub.f32 0.0, %v2175_v43  ;;  %v2048_v16 = vmul.f32 %v3021_v9, %v2032_v0 }
 0x252   : > { %v1985_v20 = vmul.f32 %v3025_v44, %v1969_v37  ;;  %v4598_v56 = vmul.f32 0.70710677, %v4594_v14 }
 0x253   : > { %v2223_v31 = vsel %vm2191_vm7, %v2175_v43, %v2207_v40  ;;  %v2064_v34 = vadd.f32 0.2548296, %v2048_v16 }
 0x254   : > { %v2239_v29 = vadd.f32 1.0, %v2223_v31  ;;  %v2001_v6 = vadd.f32 1.4214138, %v1985_v20  ;;  %v1891_v22 = vand.u32 2147483647, %v4598_v56  ;;  %v1857_v20 = vmul.f32 0.5, %v4575_v10 }
 0x255   : > { %v2080_v38 = vmul.f32 %v3021_v9, %v2064_v34  ;;  %vm2195_vm4 = vcmp.ge.f32.partialorder %v4598_v56, 0.0 }
 0x256   : > { %v2255_v62 = vmul.f32 %v2239_v29, %v1855_v52  ;;  %v2017_v12 = vmul.f32 %v3025_v44, %v2001_v6  ;;  %v1907_v55 = vmul.f32 0.3275911, %v1891_v22  ;;  %v2099_v40 = vsub.f32 0.0, %v1891_v22 }
 0x257   : > { %v2160_v5 = vmul.f32 %v3027_v36, %v2080_v38  ;;  %v3029_v26 = vpop.eup %3028 }
 0x258   : > { %2317 = vperm.xlu0 %2908, %v2255_v62   ;;  %v2033_v21 = vadd.f32 -0.28449672, %v2017_v12  ;;  %v1954_v2 = vmul.f32 1.0614054, %v3029_v26  ;;  %v1923_v4 = vadd.f32 1.0, %v1907_v55  ;;  %v3031_v50 = vpop.eup %3030  ;;  %v2115_v16 = vmul.f32 %v2099_v40, %v1891_v22 }
 0x259   : > { %v2176_v49 = vsub.f32 1.0, %v2160_v5 }
 0x25a   : > { %v2049_v19 = vmul.f32 %v3025_v44, %v2033_v21  ;;  %v1970_v63 = vadd.f32 -1.4531521, %v1954_v2  ;;  %3032 = vrcp.f32 %v1923_v4  ;;  %v2146_v36 = vmul.f32 1.442695, %v2115_v16 }
 0x25b   : > { %v2208_v18 = vsub.f32 0.0, %v2176_v49  ;;  %3034 = vpow2.f32 %v2144_v32 }
 0x25c   : > { %v2065_v9 = vadd.f32 0.2548296, %v2049_v19  ;;  %v1986_v47 = vmul.f32 %v3029_v26, %v1970_v63  ;;  %3036 = vpow2.f32 %v2146_v36 }
 0x25d   : > { %v2224_v54 = vsel %vm2192_vm2, %v2176_v49, %v2208_v18  ;;  %v1858_v18 = vmul.f32 0.5, %v4584_v17 }
 0x25e   : > { %v2081_v25 = vmul.f32 %v3025_v44, %v2065_v9  ;;  %v2240_v3 = vadd.f32 1.0, %v2224_v54  ;;  %v2002_v58 = vadd.f32 1.4214138, %v1986_v47 }
 0x260   : > { %v2161_v43 = vmul.f32 %v3031_v50, %v2081_v25  ;;  %v2256_v35 = vmul.f32 %v2240_v3, %v1856_v28  ;;  %v2018_v0 = vmul.f32 %v3029_v26, %v2002_v58 }
 0x262   : > { %v2177_v37 = vsub.f32 1.0, %v2161_v43  ;;  %2322 = vperm.xlu1 %2909, %v2256_v35   ;;  %v2034_v8 = vadd.f32 -0.28449672, %v2018_v0 }
 0x264   : > { %v2209_v59 = vsub.f32 0.0, %v2177_v37  ;;  %v2050_v61 = vmul.f32 %v3029_v26, %v2034_v8 }
 0x266   : > { %v2225_v31 = vsel %vm2193_vm12, %v2177_v37, %v2209_v59  ;;  %v2066_v29 = vadd.f32 0.2548296, %v2050_v61 }
 0x267   : > { %v2241_v52 = vadd.f32 1.0, %v2225_v31  ;;  %v3033_v6 = vpop.eup %3032  ;;  %v1859_v31 = vmul.f32 0.5, %v4594_v14 }
 0x268   : > { %v2263_v44 = vpop.permute.xlu0 %2262  ;;  %v2082_v62 = vmul.f32 %v3029_v26, %v2066_v29  ;;  %v3035_v38 = vpop.eup %3034  ;;  %v1955_v22 = vmul.f32 1.0614054, %v3033_v6 }
 0x269   : > { %v2340_v34 = vsub.f32 %v3974_v11, %v2263_v44  ;;  %v2257_v41 = vmul.f32 %v2241_v52, %v1857_v20  ;;  %v3037_v0 = vpop.eup %3036 }
 0x26a   : > { %v2162_v12 = vmul.f32 %v3035_v38, %v2082_v62  ;;  %v1971_v55 = vadd.f32 -1.4531521, %v1955_v22 }
 0x26b   : > { %v2362_v53 = vmul.f32 %v4607_v60, %v2340_v34  ;;  %2327 = vperm.xlu0 %2908, %v2257_v41  }
 0x26c   : > { %v2178_v21 = vsub.f32 1.0, %v2162_v12  ;;  %v1987_v10 = vmul.f32 %v3033_v6, %v1971_v55 }
 0x26d   : > { %v2378_v5 = vadd.f32 %v2362_v53, %v3974_v11 }
 0x26e   : > { %v2268_v32 = vpop.permute.xlu1 %2267  ;;  %v2210_v49 = vsub.f32 0.0, %v2178_v21  ;;  %v2003_v26 = vadd.f32 1.4214138, %v1987_v10 }
 0x26f   : > { %2839 = vmatprep.mubr.msk.f32.mxu1 %vm816_vm5, %v2378_v5  ;;  %v2341_v2 = vsub.f32 %v4003_v45, %v2268_v32 }
 0x270   : > { %v2226_v4 = vsel %vm2194_vm3, %v2178_v21, %v2210_v49  ;;  %v2019_v63 = vmul.f32 %v3033_v6, %v2003_v26 }
 0x271   : > { %v2363_v19 = vmul.f32 %v4607_v60, %v2341_v2  ;;  %v2242_v11 = vadd.f32 1.0, %v2226_v4 }
 0x272   : > { %v2273_v9 = vpop.permute.xlu1 %2272  ;;  %v2035_v28 = vadd.f32 -0.28449672, %v2019_v63 }
 0x273   : > { %v2379_v54 = vadd.f32 %v2363_v19, %v4003_v45  ;;  %v2342_v47 = vsub.f32 %v3996_v48, %v2273_v9  ;;  %v2258_v25 = vmul.f32 %v2242_v11, %v1858_v18 }
 0x274   : > { %v2051_v51 = vmul.f32 %v3033_v6, %v2035_v28 }
 0x275   : > { %v2364_v3 = vmul.f32 %v4607_v60, %v2342_v47  ;;  %2840 = vmatmul.mubr.msk.f32.vlgmr.msra.gmra.mxu1 %vm816_vm5, %v2379_v54  ;;  %2332 = vperm.xlu1 %2909, %v2258_v25  }
 0x276   : > { %v2278_v50 = vpop.permute.xlu1 %2277  ;;  %v2067_v43 = vadd.f32 0.2548296, %v2051_v51 }
 0x277   : > { %v2380_v58 = vadd.f32 %v2364_v3, %v3996_v48  ;;  %v2343_v17 = vsub.f32 %v4044_v15, %v2278_v50 }
 0x278   : > { %v2083_v45 = vmul.f32 %v3033_v6, %v2067_v43 }
 0x279   : > { %v2365_v35 = vmul.f32 %v4607_v60, %v2343_v17  ;;  %2842 = vmatprep.mubr.msk.f32.mxu1 %vm816_vm5, %v2380_v58 }
 0x27a   : > { %v2163_v37 = vmul.f32 %v3037_v0, %v2083_v45 }
 0x27b   : > { %v2381_v40 = vadd.f32 %v2365_v35, %v4044_v15 }
 0x27c   : > { %v2179_v8 = vsub.f32 1.0, %v2163_v37 }
 0x27d   : > { %2843 = vmatmul.mubr.msk.f32.gmra.mxu1 %vm816_vm5, %v2381_v40 }
 0x27e   : > { %v2211_v59 = vsub.f32 0.0, %v2179_v8 }
 0x280   : > { %v2227_v16 = vsel %vm2195_vm4, %v2179_v8, %v2211_v59 }
 0x281   : > { %v2283_v61 = vpop.permute.xlu1 %2282  ;;  %v2243_v44 = vadd.f32 1.0, %v2227_v16 }
 0x282   : > { %v2344_v48 = vsub.f32 %v4094_v1, %v2283_v61 }
 0x283   : > { %v2259_v52 = vmul.f32 %v2243_v44, %v1859_v31 }
 0x284   : > { %v2366_v20 = vmul.f32 %v4607_v60, %v2344_v48 }
 0x285   : > { %2337 = vperm.xlu0 %2908, %v2259_v52  }
 0x286   : > { %v2382_v29 = vadd.f32 %v2366_v20, %v4094_v1 }
 0x288   : > { %2845 = vmatprep.mubr.msk.f32.mxu1 %vm816_vm5, %v2382_v29 }
 0x28a   : > { %v2288_v15 = vpop.permute.xlu1 %2287 }
 0x28b   : > { %v2345_v34 = vsub.f32 %v4133_v46, %v2288_v15 }
 0x28d   : > { %v2367_v6 = vmul.f32 %v4607_v60, %v2345_v34 }
 0x28f   : > { %v2383_v56 = vadd.f32 %v2367_v6, %v4133_v46 }
 0x291   : > { %2846 = vmatmul.mubr.msk.f32.gmra.mxu1 %vm816_vm5, %v2383_v56 }
 0x293   : > { %v2293_v41 = vpop.permute.xlu1 %2292 }
 0x294   : > { %v2346_v14 = vsub.f32 %v4171_v7, %v2293_v41 }
 0x296   : > { %v2368_v62 = vmul.f32 %v4607_v60, %v2346_v14 }
 0x298   : > { %v2384_v53 = vadd.f32 %v2368_v62, %v4171_v7 }
 0x29a   : > { %2848 = vmatprep.mubr.msk.f32.mxu1 %vm816_vm5, %v2384_v53 }
 0x2a6   : > { %v2298_v1 = vpop.permute.xlu1 %2297 }
 0x2a7   : > { %v2347_v38 = vsub.f32 %v4257_v27, %v2298_v1 }
 0x2a9   : > { %v2369_v36 = vmul.f32 %v4607_v60, %v2347_v38 }
 0x2ab   : > { %v2385_v22 = vadd.f32 %v2369_v36, %v4257_v27 }
 0x2ad   : > { %2849 = vmatmul.mubr.msk.f32.gmra.mxu1 %vm816_vm5, %v2385_v22 }
 0x2b4   : > { %v2303_v46 = vpop.permute.xlu1 %2302 }
 0x2b5   : > { %v2348_v12 = vsub.f32 %v4316_v24, %v2303_v46 }
 0x2b7   : > { %v2370_v5 = vmul.f32 %v4607_v60, %v2348_v12 }
 0x2b9   : > { %v2386_v55 = vadd.f32 %v2370_v5, %v4316_v24 }
 0x2bb   : > { %2851 = vmatprep.mubr.msk.f32.mxu1 %vm816_vm5, %v2386_v55 }
 0x2c0   : > { %v2308_v7 = vpop.permute.xlu0 %2307 }
 0x2c1   : > { %v2349_v21 = vsub.f32 %v4357_v39, %v2308_v7 }
 0x2c3   : > { %v2371_v10 = vmul.f32 %v4607_v60, %v2349_v21 }
 0x2c5   : > { %v2387_v32 = vadd.f32 %v2371_v10, %v4357_v39 }
 0x2c7   : > { %2852 = vmatmul.mubr.msk.f32.gmra.mxu1 %vm816_vm5, %v2387_v32 }
 0x2c9   : > { %v2313_v27 = vpop.permute.xlu1 %2312 }
 0x2ca   : > { %v2350_v49 = vsub.f32 %v4383_v13, %v2313_v27 }
 0x2cc   : > { %v2372_v2 = vmul.f32 %v4607_v60, %v2350_v49 }
 0x2ce   : > { %v2388_v26 = vadd.f32 %v2372_v2, %v4383_v13 }
 0x2d0   : > { %2854 = vmatprep.mubr.msk.f32.mxu1 %vm816_vm5, %v2388_v26 }
 0x2d3   : > { %v2318_v24 = vpop.permute.xlu0 %2317 }
 0x2d4   : > { %v2351_v4 = vsub.f32 %v4401_v23, %v2318_v24 }
 0x2d6   : > { %v2373_v19 = vmul.f32 %v4607_v60, %v2351_v4 }
 0x2d8   : > { %v2389_v18 = vadd.f32 %v2373_v19, %v4401_v23 }
 0x2da   : > { %2855 = vmatmul.mubr.msk.f32.gmra.mxu1 %vm816_vm5, %v2389_v18 }
 0x2dd   : > { %v2323_v39 = vpop.permute.xlu1 %2322 }
 0x2de   : > { %v2352_v63 = vsub.f32 %v4410_v42, %v2323_v39 }
 0x2e0   : > { %v2374_v11 = vmul.f32 %v4607_v60, %v2352_v63 }
 0x2e2   : > { %v2390_v9 = vadd.f32 %v2374_v11, %v4410_v42 }
 0x2e4   : > { %2857 = vmatprep.mubr.msk.f32.mxu1 %vm816_vm5, %v2390_v9 }
 0x2e6   : > { %v2328_v13 = vpop.permute.xlu0 %2327 }
 0x2e7   : > { %v2353_v54 = vsub.f32 %v4417_v33, %v2328_v13 }
 0x2e9   : > { %v2375_v47 = vmul.f32 %v4607_v60, %v2353_v54 }
 0x2eb   : > { %v2391_v23 = vadd.f32 %v2375_v47, %v4417_v33  ;;  %v2744_v33 = vld [vmem:[%s4745_s9] ss:$0 sm:$0xff] }
 0x2ed   : > { %2858 = vmatmul.mubr.msk.f32.gmra.mxu1 %vm816_vm5, %v2391_v23 }
 0x2f0   : > { %v2333_v28 = vpop.permute.xlu1 %2332 }
 0x2f1   : > { %v2354_v25 = vsub.f32 %v4426_v57, %v2333_v28 }
 0x2f3   : > { %v2376_v3 = vmul.f32 %v4607_v60, %v2354_v25 }
 0x2f5   : > { %v2392_v42 = vadd.f32 %v2376_v3, %v4426_v57 }
 0x2f7   : > { %2860 = vmatprep.mubr.msk.f32.mxu1 %vm816_vm5, %v2392_v42 }
 0x300   : > { %v2338_v51 = vpop.permute.xlu0 %2337 }
 0x301   : > { %v2355_v50 = vsub.f32 %v4455_v30, %v2338_v51 }
 0x303   : > { %v2377_v58 = vmul.f32 %v4607_v60, %v2355_v50 }
 0x305   : > { %v2393_v17 = vadd.f32 %v2377_v58, %v4455_v30 }
 0x307   : > { %2861 = vmatmul.mubr.msk.f32.gmra.mxu1 %vm816_vm5, %v2393_v17  ;;  %vm4790_vm5 = vcmask 31744  }
 0x308   : > { %vm4791_vm14 = vmmov %vm4790_vm5 }
 0x309   : > { %vm4792_vm1 = vmmov %vm4790_vm5 }
 0x30a   : > { %vm4793_vm0 = vmmov %vm4792_vm1 }
 0x30b   : > { %vm4794_vm8 = vmmov %vm4793_vm0 }
 0x30c   : > { %vm4795_vm9 = vmmov %vm4793_vm0 }
 0x30d   : > { %vm4796_vm6 = vmmov %vm4793_vm0 }
 0x30e   : > { %vm4797_vm10 = vmmov %vm4793_vm0 }
 0x30f   : > { %vm4798_vm11 = vmmov %vm4793_vm0 }
 0x310   : > { %vm4799_vm13 = vmmov %vm4793_vm0 }
 0x311   : > { %vm4800_vm15 = vmmov %vm4793_vm0 }
 0x312   : > { %vm4801_vm7 = vmmov %vm4793_vm0 }
 0x313   : > { %vm4802_vm2 = vmmov %vm4793_vm0 }
 0x314   : > { %vm4803_vm12 = vmmov %vm4793_vm0 }
 0x315   : > { %vm4804_vm3 = vmmov %vm4793_vm0 }
 0x316   : > { %vm4805_vm4 = vmmov %vm4793_vm0 }
 0x335   : > { %v2841_v57 = vpop.f32.mrf.mxu1 }
 0x336   : > { %v2523_v30 = vadd.f32 %v2841_v57, %v2744_v33 }
 0x337   : > { %v2517_v60 = vpop.f32.mrf.mxu1 }
 0x338   : > { %2597 = vst.msk [vmem:[%s4687_s21 + $0x8] sm:$0xff] %vm4790_vm5, %v2523_v30  ;;  %v2518_v43 = vadd.f32 %v2744_v33, %v2517_v60 }
 0x33a   : > { %2596 = vst.msk [vmem:[%s4687_s21] sm:$0xff] %vm4791_vm14, %v2518_v43 }
 0x33d   : > { %v2844_v35 = vpop.f32.mrf.mxu1 }
 0x33e   : > { %v2533_v45 = vadd.f32 %v2844_v35, %v2744_v33 }
 0x33f   : > { %v2527_v0 = vpop.f32.mrf.mxu1 }
 0x340   : > { %2599 = vst.msk [vmem:[%s4687_s21 + $0x18] sm:$0xff] %vm4792_vm1, %v2533_v45  ;;  %v2528_v40 = vadd.f32 %v2744_v33, %v2527_v0 }
 0x342   : > { %2598 = vst.msk [vmem:[%s4687_s21 + $0x10] sm:$0xff] %vm4793_vm0, %v2528_v40 }
 0x351   : > { %v2847_v37 = vpop.f32.mrf.mxu1 }
 0x352   : > { %v2543_v8 = vadd.f32 %v2847_v37, %v2744_v33 }
 0x353   : > { %v2537_v59 = vpop.f32.mrf.mxu1 }
 0x354   : > { %2601 = vst.msk [vmem:[%s4687_s21 + $0x28] sm:$0xff] %vm4794_vm8, %v2543_v8  ;;  %v2538_v61 = vadd.f32 %v2744_v33, %v2537_v59 }
 0x356   : > { %2600 = vst.msk [vmem:[%s4687_s21 + $0x20] sm:$0xff] %vm4795_vm9, %v2538_v61 }
 0x36d   : > { %v2850_v48 = vpop.f32.mrf.mxu1 }
 0x36e   : > { %v2553_v16 = vadd.f32 %v2850_v48, %v2744_v33 }
 0x36f   : > { %v2547_v31 = vpop.f32.mrf.mxu1 }
 0x370   : > { %2603 = vst.msk [vmem:[%s4687_s21 + $0x38] sm:$0xff] %vm4796_vm6, %v2553_v16  ;;  %v2548_v44 = vadd.f32 %v2744_v33, %v2547_v31 }
 0x372   : > { %2602 = vst.msk [vmem:[%s4687_s21 + $0x30] sm:$0xff] %vm4797_vm10, %v2548_v44 }
 0x387   : > { %v2853_v20 = vpop.f32.mrf.mxu1 }
 0x388   : > { %v2563_v52 = vadd.f32 %v2853_v20, %v2744_v33 }
 0x389   : > { %v2557_v29 = vpop.f32.mrf.mxu1 }
 0x38a   : > { %2605 = vst.msk [vmem:[%s4687_s21 + $0x48] sm:$0xff] %vm4798_vm11, %v2563_v52  ;;  %v2558_v15 = vadd.f32 %v2744_v33, %v2557_v29 }
 0x38c   : > { %2604 = vst.msk [vmem:[%s4687_s21 + $0x40] sm:$0xff] %vm4799_vm13, %v2558_v15 }
 0x39a   : > { %v2856_v34 = vpop.f32.mrf.mxu1 }
 0x39b   : > { %v2573_v6 = vadd.f32 %v2856_v34, %v2744_v33 }
 0x39c   : > { %v2567_v56 = vpop.f32.mrf.mxu1 }
 0x39d   : > { %2607 = vst.msk [vmem:[%s4687_s21 + $0x58] sm:$0xff] %vm4800_vm15, %v2573_v6  ;;  %v2568_v41 = vadd.f32 %v2744_v33, %v2567_v56 }
 0x39f   : > { %2606 = vst.msk [vmem:[%s4687_s21 + $0x50] sm:$0xff] %vm4801_vm7, %v2568_v41 }
 0x3ad   : > { %v2859_v14 = vpop.f32.mrf.mxu1 }
 0x3ae   : > { %v2583_v62 = vadd.f32 %v2859_v14, %v2744_v33 }
 0x3af   : > { %v2577_v53 = vpop.f32.mrf.mxu1 }
 0x3b0   : > { %2609 = vst.msk [vmem:[%s4687_s21 + $0x68] sm:$0xff] %vm4802_vm2, %v2583_v62  ;;  %v2578_v1 = vadd.f32 %v2744_v33, %v2577_v53 }
 0x3b2   : > { %2608 = vst.msk [vmem:[%s4687_s21 + $0x60] sm:$0xff] %vm4803_vm12, %v2578_v1 }
 0x3c7   : > { %v2862_v38 = vpop.f32.mrf.mxu1 }
 0x3c8   : > { %v2593_v36 = vadd.f32 %v2862_v38, %v2744_v33 }
 0x3c9   : > { %v2587_v22 = vpop.f32.mrf.mxu1 }
 0x3ca   : > { %2611 = vst.msk [vmem:[%s4687_s21 + $0x78] sm:$0xff] %vm4804_vm3, %v2593_v36  ;;  %v2588_v46 = vadd.f32 %v2744_v33, %v2587_v22 }
 0x3cc   : > { %2610 = vst.msk [vmem:[%s4687_s21 + $0x70] sm:$0xff] %vm4805_vm4, %v2588_v46 }
 0x3cd PF: > { %s22_s19 = sadd.s32 1, %s3078_s19   ;;  %s4806_s15 = smov %s3070_s17 }
 0x3ce   : > { %p19_p7 = scmp.ge.s32.totalorder %s22_s19, 6   ;;  %s4807_s16 = smov %s3074_s18 }
 0x3cf   : > { %s4808_s17 = smov %s4811_s6  ;;  %s4809_s18 = smov %s4815_s20 }
 0x3d0   :  { %21 = sbr.rel (!%p19_p7) target bundleno = 3 (0x3), region = 93 }

</bundles_post_ra>
